<compile_context>
chip_gen: v6e
topology: v6e:2x2x1
jax: 0.10.0
libtpu: 0.0.40
codegen_flags: <defaults>
</compile_context>

<pallas_src>
import jax
import jax.numpy as jnp
from jax.experimental import pallas as pl
from jax.experimental.pallas import tpu as pltpu

# Module hyper-parameters from hw3.py
INPUT_SIZE = 32 * 32 * 3   # 3072
HIDDEN_SIZE = 512
NUM_CLASSES = 10
LANE_PAD = 128             # fc2 output padded to one full lane width


def _round_up(n, m):
    return ((n + m - 1) // m) * m


def mlp_kernel(x_ref, w1_ref, b1_ref, w2_ref, b2_ref, o_ref):
    x = x_ref[...]
    if x.dtype != jnp.bfloat16:        # trace-time branch; no-op for bf16 callers
        x = x.astype(jnp.bfloat16)
    # fc1: (tm, 3072) bf16 @ (3072, 512) bf16 -> f32 accumulation on the MXU.
    h = jnp.dot(x, w1_ref[...], preferred_element_type=jnp.float32)
    # Bias add in f32; downcast fused into the tanh input (bf16 EUP path on v6e/v7x).
    a = jnp.tanh((h + b1_ref[...]).astype(jnp.bfloat16))
    # fc2: (tm, 512) bf16 @ (512, 128) bf16 -> f32, lane-dense 128-wide output.
    o_ref[...] = jnp.dot(a, w2_ref[...], preferred_element_type=jnp.float32) + b2_ref[...]


def prepare_params(w1, b1, w2, b2):
    """One-time parameter prep, hoisted out of the forward path (do NOT call per step):
    bf16 weights for the MXU, f32 biases, W2/b2 zero-padded to 128 output lanes."""
    w1b = w1.astype(jnp.bfloat16)
    w2b = jnp.pad(w2, ((0, 0), (0, LANE_PAD - NUM_CLASSES))).astype(jnp.bfloat16)
    b1f = b1.reshape(1, HIDDEN_SIZE).astype(jnp.float32)
    b2p = jnp.pad(b2.reshape(1, NUM_CLASSES),
                  ((0, 0), (0, LANE_PAD - NUM_CLASSES))).astype(jnp.float32)
    return w1b, b1f, w2b, b2p


def _choose_tile(B, tm_max):
    """Balanced batch tiles: minimal padding, tm a multiple of 16 (bf16 sublane
    packing), and >= 2 grid steps when B > 16 so both v7x TensorCores get work."""
    num_tiles = pl.cdiv(B, tm_max)
    if B > 16:
        num_tiles = max(2, num_tiles)
    tm = _round_up(pl.cdiv(B, num_tiles), 16)
    num_tiles = pl.cdiv(B, tm)
    return tm, num_tiles


def mlp_forward(x, params, *, tm_max=512):
    """x: (B, 3072) bf16 (preferred) or f32; params: output of prepare_params().
    Returns (B, NUM_CLASSES) f32 logits."""
    w1b, b1f, w2b, b2p = params
    B = x.shape[0]

    tm, num_tiles = _choose_tile(B, tm_max)
    Bp = tm * num_tiles
    if Bp != B:
        x = jnp.pad(x, ((0, Bp - B), (0, 0)))   # bounded by < 16 rows per tile

    out = pl.pallas_call(
        mlp_kernel,
        out_shape=jax.ShapeDtypeStruct((Bp, LANE_PAD), jnp.float32),
        grid=(num_tiles,),
        in_specs=[
            pl.BlockSpec((tm, INPUT_SIZE), lambda i: (i, 0)),            # x tile (pipelined)
            pl.BlockSpec((INPUT_SIZE, HIDDEN_SIZE), lambda i: (0, 0)),   # W1 (VMEM-resident)
            pl.BlockSpec((1, HIDDEN_SIZE), lambda i: (0, 0)),            # b1 (resident)
            pl.BlockSpec((HIDDEN_SIZE, LANE_PAD), lambda i: (0, 0)),     # W2 (resident)
            pl.BlockSpec((1, LANE_PAD), lambda i: (0, 0)),               # b2 (resident)
        ],
        out_specs=pl.BlockSpec((tm, LANE_PAD), lambda i: (i, 0)),
        compiler_params=pltpu.CompilerParams(
            dimension_semantics=("parallel",),   # megacore batch sharding on v7x
            vmem_limit_bytes=32 << 20,           # safe on v5e/v6e/v7x
        ),
    )(x, w1b, b1f, w2b, b2p)

    return out[:B, :NUM_CLASSES]


def init_params(key):
    """Deterministic init mimicking nn.Linear's uniform(-1/sqrt(fan_in), ...)."""
    k1, k2, k3, k4 = jax.random.split(key, 4)
    lim1 = 1.0 / jnp.sqrt(jnp.float32(INPUT_SIZE))
    lim2 = 1.0 / jnp.sqrt(jnp.float32(HIDDEN_SIZE))
    w1 = jax.random.uniform(k1, (INPUT_SIZE, HIDDEN_SIZE), jnp.float32,
                            minval=-lim1, maxval=lim1)
    b1 = jax.random.uniform(k2, (1, HIDDEN_SIZE), jnp.float32,
                            minval=-lim1, maxval=lim1)
    w2 = jax.random.uniform(k3, (HIDDEN_SIZE, NUM_CLASSES), jnp.float32,
                            minval=-lim2, maxval=lim2)
    b2 = jax.random.uniform(k4, (1, NUM_CLASSES), jnp.float32,
                            minval=-lim2, maxval=lim2)
    return w1, b1, w2, b2


if __name__ == "__main__":
    key = jax.random.PRNGKey(0)
    kx, kp = jax.random.split(key)

    B = 8  # small example batch
    # Activations kept bf16 end-to-end upstream (per perf review); f32 also works.
    x = jax.random.normal(kx, (B, INPUT_SIZE), jnp.float32).astype(jnp.bfloat16)

    w1, b1, w2, b2 = init_params(kp)
    params = prepare_params(w1, b1, w2, b2)   # one-time, outside the forward path

    out = jax.block_until_ready(mlp_forward(x, params))

    # Pure-JAX reference using the same bf16-rounded operands / op order as the kernel
    # (f32 accumulation), so only accumulation-order / tanh-ulp differences remain.
    xf = x.astype(jnp.float32)
    w1r = params[0].astype(jnp.float32)
    w2r = params[2][:, :NUM_CLASSES].astype(jnp.float32)
    h = xf @ w1r + b1
    a = jnp.tanh(h.astype(jnp.bfloat16)).astype(jnp.float32)
    ref = a @ w2r + b2

    assert out.shape == (B, NUM_CLASSES)
    assert jnp.allclose(out, ref, atol=2e-2, rtol=2e-2), \
        float(jnp.max(jnp.abs(out - ref)))

    print("KERNEL_OK")
</pallas_src>

<mosaic_0001>
module attributes {stable_mosaic.version = 11 : i64} {
  func.func @mlp_kernel(%arg0: i32, %arg1: memref<16x3072xbf16, #tpu.memory_space<vmem>>, %arg2: memref<3072x512xbf16, #tpu.memory_space<vmem>>, %arg3: memref<1x512xf32, #tpu.memory_space<vmem>>, %arg4: memref<512x128xbf16, #tpu.memory_space<vmem>>, %arg5: memref<1x128xf32, #tpu.memory_space<vmem>>, %arg6: memref<16x128xf32, #tpu.memory_space<vmem>>) attributes {dimension_semantics = [#tpu.dimension_semantics<parallel>], iteration_bounds = array<i64: 1>, scalar_prefetch = 0 : i64, scratch_operands = 0 : i64, tpu.core_type = #tpu.core_type<tc>, window_params = [{transform_indices = @transform_0, window_bounds = array<i64: 16, 3072>}, {pipeline_mode = #tpu.pipeline_mode<synchronous>, transform_indices = @transform_1, window_bounds = array<i64: 3072, 512>}, {pipeline_mode = #tpu.pipeline_mode<synchronous>, transform_indices = @transform_2, window_bounds = array<i64: 1, 512>}, {pipeline_mode = #tpu.pipeline_mode<synchronous>, transform_indices = @transform_3, window_bounds = array<i64: 512, 128>}, {pipeline_mode = #tpu.pipeline_mode<synchronous>, transform_indices = @transform_4, window_bounds = array<i64: 1, 128>}, {transform_indices = @transform_5, window_bounds = array<i64: 16, 128>}]} {
    %c0 = arith.constant 0 : index
    %c0_0 = arith.constant 0 : index
    %0 = vector.load %arg1[%c0, %c0_0] : memref<16x3072xbf16, #tpu.memory_space<vmem>>, vector<16x3072xbf16>
    %c0_1 = arith.constant 0 : index
    %c0_2 = arith.constant 0 : index
    %1 = vector.load %arg2[%c0_1, %c0_2] : memref<3072x512xbf16, #tpu.memory_space<vmem>>, vector<3072x512xbf16>
    %cst = arith.constant dense<0.000000e+00> : vector<16x512xf32>
    %2 = tpu.matmul %0, %1, %cst {dimension_numbers = #tpu.dot_dimension_numbers<[1], [0], [0], [1], [0, 0, 1, 1], [], []>} : vector<16x3072xbf16>, vector<3072x512xbf16>, vector<16x512xf32> -> vector<16x512xf32>
    %c0_3 = arith.constant 0 : index
    %c0_4 = arith.constant 0 : index
    %3 = vector.load %arg3[%c0_3, %c0_4] : memref<1x512xf32, #tpu.memory_space<vmem>>, vector<1x512xf32>
    %4 = vector.broadcast %3 : vector<1x512xf32> to vector<16x512xf32>
    %5 = arith.addf %2, %4 : vector<16x512xf32>
    %6 = arith.truncf %5 : vector<16x512xf32> to vector<16x512xbf16>
    %7 = math.tanh %6 : vector<16x512xbf16>
    %c0_5 = arith.constant 0 : index
    %c0_6 = arith.constant 0 : index
    %8 = vector.load %arg4[%c0_5, %c0_6] : memref<512x128xbf16, #tpu.memory_space<vmem>>, vector<512x128xbf16>
    %cst_7 = arith.constant dense<0.000000e+00> : vector<16x128xf32>
    %9 = tpu.matmul %7, %8, %cst_7 {dimension_numbers = #tpu.dot_dimension_numbers<[1], [0], [0], [1], [0, 0, 1, 1], [], []>} : vector<16x512xbf16>, vector<512x128xbf16>, vector<16x128xf32> -> vector<16x128xf32>
    %c0_8 = arith.constant 0 : index
    %c0_9 = arith.constant 0 : index
    %10 = vector.load %arg5[%c0_8, %c0_9] : memref<1x128xf32, #tpu.memory_space<vmem>>, vector<1x128xf32>
    %11 = vector.broadcast %10 : vector<1x128xf32> to vector<16x128xf32>
    %12 = arith.addf %9, %11 : vector<16x128xf32>
    %c0_10 = arith.constant 0 : index
    %c0_11 = arith.constant 0 : index
    %13 = vector.load %arg6[%c0_10, %c0_11] : memref<16x128xf32, #tpu.memory_space<vmem>>, vector<16x128xf32>
    tpu.vector_store %arg6[%c0_10, %c0_11], %12 {strides = array<i32>} : memref<16x128xf32, #tpu.memory_space<vmem>>, vector<16x128xf32>,
    return
  }
  func.func @transform_0(%arg0: i32) -> (i32, i32) {
    %c0_i32 = arith.constant 0 : i32
    %c0_i32_0 = arith.constant 0 : i32
    return %arg0, %c0_i32 : i32, i32
  }
  func.func @transform_1(%arg0: i32) -> (i32, i32) {
    %c0_i32 = arith.constant 0 : i32
    %c0_i32_0 = arith.constant 0 : i32
    %c0_i32_1 = arith.constant 0 : i32
    return %c0_i32, %c0_i32_0 : i32, i32
  }
  func.func @transform_2(%arg0: i32) -> (i32, i32) {
    %c0_i32 = arith.constant 0 : i32
    %c0_i32_0 = arith.constant 0 : i32
    %c0_i32_1 = arith.constant 0 : i32
    return %c0_i32, %c0_i32_0 : i32, i32
  }
  func.func @transform_3(%arg0: i32) -> (i32, i32) {
    %c0_i32 = arith.constant 0 : i32
    %c0_i32_0 = arith.constant 0 : i32
    %c0_i32_1 = arith.constant 0 : i32
    return %c0_i32, %c0_i32_0 : i32, i32
  }
  func.func @transform_4(%arg0: i32) -> (i32, i32) {
    %c0_i32 = arith.constant 0 : i32
    %c0_i32_0 = arith.constant 0 : i32
    %c0_i32_1 = arith.constant 0 : i32
    return %c0_i32, %c0_i32_0 : i32, i32
  }
  func.func @transform_5(%arg0: i32) -> (i32, i32) {
    %c0_i32 = arith.constant 0 : i32
    %c0_i32_0 = arith.constant 0 : i32
    return %arg0, %c0_i32 : i32, i32
  }
}

</mosaic_0001>

<bundles_post_ra>
// kernel: tpu_custom_call.1
= control target key start
LH: loop header
LB: loop body
LE: loop exit
PB: predicated region body
PF: predicated region fallthrough
CT: control target
= control target key end

     0   :  { %10 = vsyncpa [#allocation3], 0  ;;  %s8836_s0 = inlined_call_operand.hbm [shape: bf16[16,3072], index: 0, kind: input, shape index: {}]   ;;  %s8837_s1 = inlined_call_operand.hbm [shape: bf16[3072,512], index: 1, kind: input, shape index: {}]   ;;  %s8838_s2 = inlined_call_operand.hbm [shape: f32[1,512], index: 2, kind: input, shape index: {}]   ;;  %s8839_s3 = inlined_call_operand.hbm [shape: bf16[512,128], index: 3, kind: input, shape index: {}]   ;;  %s8840_s4 = inlined_call_operand.hbm [shape: f32[1,128], index: 4, kind: input, shape index: {}]   ;;  %s8841_s5 = inlined_call_operand.hbm [shape: f32[16,128], index: 5, kind: output, shape index: {}]  }
   0x1   :  { %11 = vsyncpa [#allocation6], 0 }
   0x2   :  { %12 = vsyncpa [#allocation9], 0 }
   0x3   :  { %13 = vsyncpa [#allocation4], 0  ;;  %s8469_s18 = smov [#allocation5]  }
   0x4   :  { %s31_s19 = sshll.u32 %s8469_s18, 4  ;;  %s32_s19 = int_to_ptr.vmem [resolvable:$true] %s31_s19 }
   0x5   :  { %s8349_s20 = scalar_lea.vmem %s32_s19, 98304  ;;  %p8354_p1 = scmp.lt.s32.totalorder %s32_s19, %s32_s19 }
   0x6   :  { %p8350_p0 = scmp.ne.s32.totalorder %s32_s19, %s8349_s20  ;;  %p8355_p2 = scmp.lt.s32.totalorder %s8349_s20, %s8349_s20 }
   0x8   :  { %p8356_p3 = por %p8355_p2, %p8354_p1 }
   0xa   :  { %p8357_p4 = pnand %p8356_p3, %p8350_p0 }
   0xc   :  { %8360 = shalt.err (!%p8357_p4)
}
   0xd   :  { %s8470_s21 = smov 256   ;;  %s8471_s22 = smov 16  }
   0xe   :  { %37 = dma.hbm_to_vmem [thread:$0]  %s8837_s1, 98304, %s32_s19, [#allocation6], %s8470_s21, %s8470_s21, %s8471_s22  }
   0xf   :  { %s8472_s25 = smov [#allocation8]  }
  0x10   :  { %s53_s26 = sshll.u32 %s8472_s25, 4  ;;  %s54_s26 = int_to_ptr.vmem [resolvable:$true] %s53_s26 }
  0x11   :  { %s8369_s27 = scalar_lea.vmem %s54_s26, 4096  ;;  %p8374_p6 = scmp.lt.s32.totalorder %s54_s26, %s54_s26 }
  0x12   :  { %p8370_p5 = scmp.ne.s32.totalorder %s54_s26, %s8369_s27  ;;  %p8375_p7 = scmp.lt.s32.totalorder %s8369_s27, %s8369_s27 }
  0x14   :  { %p8376_p8 = por %p8375_p7, %p8374_p6 }
  0x16   :  { %p8377_p9 = pnand %p8376_p8, %p8370_p5 }
  0x18   :  { %8380 = shalt.err (!%p8377_p9)
}
  0x19   :  { %s8473_s28 = smov 64   ;;  %s8474_s29 = smov 4  }
  0x1a   :  { %59 = dma.hbm_to_vmem [thread:$0]  %s8839_s3, 4096, %s54_s26, [#allocation9], %s8473_s28, %s8473_s28, %s8474_s29  }
  0x1b   :  { %s8475_s7 = smov [#allocation2]  }
  0x1c   :  { %s19_s8 = sshll.u32 %s8475_s7, 4  ;;  %s20_s8 = int_to_ptr.vmem [resolvable:$true] %s19_s8 }
  0x1d   :  { %s8389_s1 = scalar_lea.vmem %s20_s8, 3072  ;;  %p8394_p11 = scmp.lt.s32.totalorder %s20_s8, %s20_s8 }
  0x1e   :  { %p8390_p10 = scmp.ne.s32.totalorder %s20_s8, %s8389_s1  ;;  %p8395_p12 = scmp.lt.s32.totalorder %s8389_s1, %s8389_s1 }
  0x20   :  { %p8396_p13 = por %p8395_p12, %p8394_p11 }
  0x22   :  { %p8397_p0 = pnand %p8396_p13, %p8390_p10 }
  0x24   :  { %8400 = shalt.err (!%p8397_p0)
}
  0x25   :  { %s8476_s9 = smov 1536   ;;  %s8477_s10 = smov 96  }
  0x26   :  { %25 = dma.hbm_to_vmem [thread:$0]  %s8836_s0, 3072, %s20_s8, [#allocation3], %s8476_s9, %s8476_s9, %s8477_s10  }
  0x27   :  { %s8478_s13 = smov [#allocation7]   ;;  %s8479_s3 = smov [#allocation10]  }
  0x28   :  { %s44_s14 = sshll.u32 %s8478_s13, 4  ;;  %s66_s15 = sshll.u32 %s8479_s3, 4  ;;  %s45_s14 = int_to_ptr.vmem [resolvable:$true] %s44_s14  ;;  %s67_s15 = int_to_ptr.vmem [resolvable:$true] %s66_s15 }
  0x29   :  { %s8409_s16 = scalar_lea.vmem %s45_s14, 64  ;;  %p8414_p2 = scmp.lt.s32.totalorder %s45_s14, %s45_s14 }
  0x2a   :  { %p8410_p1 = scmp.ne.s32.totalorder %s45_s14, %s8409_s16  ;;  %p8415_p3 = scmp.lt.s32.totalorder %s8409_s16, %s8409_s16 }
  0x2c   :  { %p8416_p4 = por %p8415_p3, %p8414_p2 }
  0x2e   :  { %p8417_p5 = pnand %p8416_p4, %p8410_p1 }
  0x30   :  { %8420 = shalt.err (!%p8417_p5)
}
  0x31   :  { %47 = dma.hbm_to_vmem [thread:$0]  %s8838_s2, 64, %s45_s14, [#allocation6]  }
  0x32   :  { %s8429_s19 = scalar_lea.vmem %s67_s15, 16  ;;  %s8433_s0 = scalar_lea.vmem %s67_s15, 32 }
  0x33   :  { %p8430_p6 = scmp.ne.s32.totalorder %s67_s15, %s8429_s19  ;;  %p8434_p7 = scmp.lt.s32.totalorder %s67_s15, %s67_s15 }
  0x34   :  { %p8435_p8 = scmp.lt.s32.totalorder %s8433_s0, %s8429_s19 }
  0x36   :  { %p8436_p9 = por %p8435_p8, %p8434_p7 }
  0x38   :  { %p8437_p10 = pnand %p8436_p9, %p8430_p6 }
  0x3a   :  { %8440 = shalt.err (!%p8437_p10)
}
  0x3b   :  { %69 = dma.hbm_to_vmem [thread:$0]  %s8840_s4, 16, %s67_s15, [#allocation9]  }
  0x3c   :  { %8461 = dma.done.wait [#allocation3], 3072  }
  0x3d   :  { %8462 = vsyncadd [#allocation3], 4294964224 }
  0x3e   :  { %8463 = dma.done.wait [#allocation6], 98368  }
  0x3f   :  { %8464 = vsyncadd [#allocation6], 4294868928 }
  0x40   :  { %8465 = dma.done.wait [#allocation9], 4112  }
  0x41   :  { %8466 = vsyncadd [#allocation9], 4294963184  ;;  %v7149_v0 = vld [vmem:[#allocation5 + $0xe4] ss:$16 sps:$4 sm:$0xff]   ;;  %v7153_v2 = vld [vmem:[#allocation5 + $0xe0] ss:$16 sps:$4 sm:$0xff]  }
  0x42   :  { %v7151_v1 = vld [vmem:[#allocation5 + $0x2e4] ss:$16 sps:$4 sm:$0xff]   ;;  %4860 = vmatprep.subr.bf16.mxu0 %v7149_v0  ;;  %v7154_v3 = vld [vmem:[#allocation5 + $0x2e0] ss:$16 sps:$4 sm:$0xff]   ;;  %v87_v50 = vld [vmem:[#allocation2 + $0x8] sm:$0xff]  ;;  %s8480_s2 = smov [#allocation11]  }
  0x43   :  { %4903 = vmatprep.subr.bf16.mxu1 %v7151_v1  ;;  %v7155_v4 = vld [vmem:[#allocation5 + $0xc4] ss:$16 sps:$4 sm:$0xff]   ;;  %4861 = vmatpush1.bf16.msra.mxu0 %v7153_v2  ;;  %v7159_v6 = vld [vmem:[#allocation5 + $0xc0] ss:$16 sps:$4 sm:$0xff]   ;;  %v99_v51 = vld [vmem:[#allocation2 + $0x68] sm:$0xff]  ;;  %s6252_s4 = sshll.u32 %s8480_s2, 4  ;;  %s6253_s4 = int_to_ptr.vmem [resolvable:$true] %s6252_s4 }
  0x44   :  { %4904 = vmatpush1.bf16.msra.mxu1 %v7154_v3  ;;  %v7157_v5 = vld [vmem:[#allocation5 + $0x2c4] ss:$16 sps:$4 sm:$0xff]   ;;  %4862 = vmatprep.subr.bf16.mxu0 %v7155_v4  ;;  %v7160_v7 = vld [vmem:[#allocation5 + $0x2c0] ss:$16 sps:$4 sm:$0xff]   ;;  %v8530_v55 = vcombine.high %v87_v50, %v99_v51  ;;  %s8441_s22 = scalar_lea.vmem %s6253_s4, 256  ;;  %p8446_p12 = scmp.lt.s32.totalorder %s6253_s4, %s6253_s4 }
  0x45   :  { %4905 = vmatprep.subr.bf16.mxu1 %v7157_v5  ;;  %v7161_v8 = vld [vmem:[#allocation5 + $0xa4] ss:$16 sps:$4 sm:$0xff]   ;;  %v7165_v10 = vld [vmem:[#allocation5 + $0xa0] ss:$16 sps:$4 sm:$0xff]   ;;  %p8442_p11 = scmp.ne.s32.totalorder %s6253_s4, %s8441_s22  ;;  %p8447_p13 = scmp.lt.s32.totalorder %s8441_s22, %s8441_s22 }
  0x46   :  { %v7163_v9 = vld [vmem:[#allocation5 + $0x2a4] ss:$16 sps:$4 sm:$0xff]   ;;  %v7166_v11 = vld [vmem:[#allocation5 + $0x2a0] ss:$16 sps:$4 sm:$0xff]   ;;  %4935 = vmatprep.mubr.bf16.mxu1 %v8530_v55 }
  0x47   :  { %4863 = vmatpush1.bf16.msra.mxu0 %v7159_v6  ;;  %v7167_v12 = vld [vmem:[#allocation5 + $0x84] ss:$16 sps:$4 sm:$0xff]   ;;  %v7171_v14 = vld [vmem:[#allocation5 + $0x80] ss:$16 sps:$4 sm:$0xff]   ;;  %p8448_p0 = por %p8447_p13, %p8446_p12 }
  0x48   :  { %4906 = vmatpush1.bf16.msra.mxu1 %v7160_v7  ;;  %4864 = vmatprep.subr.bf16.mxu0 %v7161_v8  ;;  %v7169_v13 = vld [vmem:[#allocation5 + $0x284] ss:$16 sps:$4 sm:$0xff]   ;;  %v7172_v15 = vld [vmem:[#allocation5 + $0x280] ss:$16 sps:$4 sm:$0xff]  }
  0x49   :  { %4907 = vmatprep.subr.bf16.mxu1 %v7163_v9  ;;  %v7173_v16 = vld [vmem:[#allocation5 + $0x64] ss:$16 sps:$4 sm:$0xff]   ;;  %v7177_v18 = vld [vmem:[#allocation5 + $0x60] ss:$16 sps:$4 sm:$0xff]   ;;  %v8536_v9 = vcombine.low %v87_v50, %v99_v51  ;;  %p8449_p1 = pnand %p8448_p0, %p8442_p11 }
  0x4a   :  { %v7175_v17 = vld [vmem:[#allocation5 + $0x264] ss:$16 sps:$4 sm:$0xff]   ;;  %v7178_v19 = vld [vmem:[#allocation5 + $0x260] ss:$16 sps:$4 sm:$0xff]  }
  0x4b   :  { %4865 = vmatpush1.bf16.msra.mxu0 %v7165_v10  ;;  %v7179_v20 = vld [vmem:[#allocation5 + $0x44] ss:$16 sps:$4 sm:$0xff]   ;;  %v7183_v22 = vld [vmem:[#allocation5 + $0x40] ss:$16 sps:$4 sm:$0xff]  }
  0x4c   :  { %4908 = vmatpush1.bf16.msra.mxu1 %v7166_v11  ;;  %4866 = vmatprep.subr.bf16.mxu0 %v7167_v12  ;;  %v7181_v21 = vld [vmem:[#allocation5 + $0x244] ss:$16 sps:$4 sm:$0xff]   ;;  %v7184_v23 = vld [vmem:[#allocation5 + $0x240] ss:$16 sps:$4 sm:$0xff]  }
  0x4d   :  { %4909 = vmatprep.subr.bf16.mxu1 %v7169_v13  ;;  %v7185_v24 = vld [vmem:[#allocation5 + $0x24] ss:$16 sps:$4 sm:$0xff]   ;;  %v7189_v26 = vld [vmem:[#allocation5 + $0x20] ss:$16 sps:$4 sm:$0xff]  }
  0x4e   :  { %v7187_v25 = vld [vmem:[#allocation5 + $0x224] ss:$16 sps:$4 sm:$0xff]   ;;  %v7190_v27 = vld [vmem:[#allocation5 + $0x220] ss:$16 sps:$4 sm:$0xff]  }
  0x4f   :  { %4867 = vmatpush1.bf16.msra.mxu0 %v7171_v14  ;;  %v7191_v28 = vld [vmem:[#allocation5 + $0x4] ss:$16 sps:$4 sm:$0xff]   ;;  %v7195_v30 = vld [vmem:[#allocation5] ss:$16 sps:$4 sm:$0xff]  }
  0x50   :  { %4910 = vmatpush1.bf16.msra.mxu1 %v7172_v15  ;;  %4868 = vmatprep.subr.bf16.mxu0 %v7173_v16  ;;  %v7193_v29 = vld [vmem:[#allocation5 + $0x204] ss:$16 sps:$4 sm:$0xff]   ;;  %v7196_v31 = vld [vmem:[#allocation5 + $0x200] ss:$16 sps:$4 sm:$0xff]  }
  0x51   :  { %4911 = vmatprep.subr.bf16.mxu1 %v7175_v17  ;;  %v7197_v32 = vld [vmem:[#allocation5 + $0x1e4] ss:$16 sps:$4 sm:$0xff]   ;;  %v7201_v34 = vld [vmem:[#allocation5 + $0x1e0] ss:$16 sps:$4 sm:$0xff]  }
  0x52   :  { %v7199_v33 = vld [vmem:[#allocation5 + $0x3e4] ss:$16 sps:$4 sm:$0xff]   ;;  %v7202_v35 = vld [vmem:[#allocation5 + $0x3e0] ss:$16 sps:$4 sm:$0xff]  }
  0x53   :  { %4869 = vmatpush1.bf16.msra.mxu0 %v7177_v18  ;;  %v7203_v36 = vld [vmem:[#allocation5 + $0x1c4] ss:$16 sps:$4 sm:$0xff]   ;;  %v7207_v38 = vld [vmem:[#allocation5 + $0x1c0] ss:$16 sps:$4 sm:$0xff]  }
  0x54   :  { %4912 = vmatpush1.bf16.msra.mxu1 %v7178_v19  ;;  %4870 = vmatprep.subr.bf16.mxu0 %v7179_v20  ;;  %v7205_v37 = vld [vmem:[#allocation5 + $0x3c4] ss:$16 sps:$4 sm:$0xff]   ;;  %v7208_v39 = vld [vmem:[#allocation5 + $0x3c0] ss:$16 sps:$4 sm:$0xff]  }
  0x55   :  { %4913 = vmatprep.subr.bf16.mxu1 %v7181_v21  ;;  %v7209_v40 = vld [vmem:[#allocation5 + $0x1a4] ss:$16 sps:$4 sm:$0xff]   ;;  %v7213_v42 = vld [vmem:[#allocation5 + $0x1a0] ss:$16 sps:$4 sm:$0xff]  }
  0x56   :  { %v7211_v41 = vld [vmem:[#allocation5 + $0x3a4] ss:$16 sps:$4 sm:$0xff]   ;;  %v7214_v43 = vld [vmem:[#allocation5 + $0x3a0] ss:$16 sps:$4 sm:$0xff]  }
  0x57   :  { %4871 = vmatpush1.bf16.msra.mxu0 %v7183_v22  ;;  %v7215_v44 = vld [vmem:[#allocation5 + $0x184] ss:$16 sps:$4 sm:$0xff]   ;;  %v7219_v46 = vld [vmem:[#allocation5 + $0x180] ss:$16 sps:$4 sm:$0xff]  }
  0x58   :  { %4914 = vmatpush1.bf16.msra.mxu1 %v7184_v23  ;;  %4872 = vmatprep.subr.bf16.mxu0 %v7185_v24  ;;  %v7217_v45 = vld [vmem:[#allocation5 + $0x384] ss:$16 sps:$4 sm:$0xff]   ;;  %v7220_v47 = vld [vmem:[#allocation5 + $0x380] ss:$16 sps:$4 sm:$0xff]  }
  0x59   :  { %4915 = vmatprep.subr.bf16.mxu1 %v7187_v25  ;;  %v86_v48 = vld [vmem:[#allocation2] sm:$0xff] }
  0x5a   :  { %v98_v49 = vld [vmem:[#allocation2 + $0x60] sm:$0xff] }
  0x5b   :  { %4873 = vmatpush1.bf16.msra.mxu0 %v7189_v26  ;;  %v7221_v52 = vld [vmem:[#allocation5 + $0x164] ss:$16 sps:$4 sm:$0xff]   ;;  %v8528_v53 = vcombine.high %v86_v48, %v98_v49  ;;  %v7225_v56 = vld [vmem:[#allocation5 + $0x160] ss:$16 sps:$4 sm:$0xff]   ;;  %v8534_v8 = vcombine.low %v86_v48, %v98_v49 }
  0x5c   :  { %4916 = vmatpush1.bf16.msra.mxu1 %v7190_v27  ;;  %4874 = vmatprep.subr.bf16.mxu0 %v7191_v28  ;;  %v7223_v54 = vld [vmem:[#allocation5 + $0x364] ss:$16 sps:$4 sm:$0xff]   ;;  %v7226_v57 = vld [vmem:[#allocation5 + $0x360] ss:$16 sps:$4 sm:$0xff]  }
  0x5d   :  { %4917 = vmatprep.subr.bf16.mxu1 %v7193_v29  ;;  %4892 = vmatprep.mubr.bf16.mxu0 %v8528_v53  ;;  %v7227_v58 = vld [vmem:[#allocation5 + $0x144] ss:$16 sps:$4 sm:$0xff]   ;;  %v7231_v60 = vld [vmem:[#allocation5 + $0x140] ss:$16 sps:$4 sm:$0xff]  }
  0x5e   :  { %v7229_v59 = vld [vmem:[#allocation5 + $0x344] ss:$16 sps:$4 sm:$0xff]   ;;  %v7232_v61 = vld [vmem:[#allocation5 + $0x340] ss:$16 sps:$4 sm:$0xff]  }
  0x5f   :  { %4875 = vmatpush1.bf16.msra.mxu0 %v7195_v30  ;;  %v7233_v62 = vld [vmem:[#allocation5 + $0x124] ss:$16 sps:$4 sm:$0xff]   ;;  %v7237_v0 = vld [vmem:[#allocation5 + $0x120] ss:$16 sps:$4 sm:$0xff]  }
  0x60   :  { %4918 = vmatpush1.bf16.msra.mxu1 %v7196_v31  ;;  %4876 = vmatprep.subr.bf16.mxu0 %v7197_v32  ;;  %v7235_v63 = vld [vmem:[#allocation5 + $0x324] ss:$16 sps:$4 sm:$0xff]   ;;  %v7238_v1 = vld [vmem:[#allocation5 + $0x320] ss:$16 sps:$4 sm:$0xff]  }
  0x61   :  { %4919 = vmatprep.subr.bf16.mxu1 %v7199_v33  ;;  %v7239_v2 = vld [vmem:[#allocation5 + $0x104] ss:$16 sps:$4 sm:$0xff]   ;;  %v7243_v4 = vld [vmem:[#allocation5 + $0x100] ss:$16 sps:$4 sm:$0xff]  }
  0x62   :  { %v7241_v3 = vld [vmem:[#allocation5 + $0x304] ss:$16 sps:$4 sm:$0xff]   ;;  %v7244_v5 = vld [vmem:[#allocation5 + $0x300] ss:$16 sps:$4 sm:$0xff]  }
  0x63   :  { %4877 = vmatpush2.bf16.msra.mxu0 %v7201_v34  ;;  %v7247_v6 = vld [vmem:[#allocation5 + $0x4e4] ss:$16 sps:$4 sm:$0xff]   ;;  %v7245_v10 = vld [vmem:[#allocation5 + $0x4e0] ss:$16 sps:$4 sm:$0xff]  }
  0x64   :  { %4920 = vmatpush2.bf16.msra.mxu1 %v7202_v35  ;;  %4878 = vmatprep.subr.bf16.mxu0 %v7203_v36  ;;  %v7250_v7 = vld [vmem:[#allocation5 + $0x6e4] ss:$16 sps:$4 sm:$0xff]   ;;  %v7248_v11 = vld [vmem:[#allocation5 + $0x6e0] ss:$16 sps:$4 sm:$0xff]  }
  0x65   :  { %4921 = vmatprep.subr.bf16.mxu1 %v7205_v37  ;;  %v7253_v12 = vld [vmem:[#allocation5 + $0x4c4] ss:$16 sps:$4 sm:$0xff]   ;;  %v7251_v14 = vld [vmem:[#allocation5 + $0x4c0] ss:$16 sps:$4 sm:$0xff]  }
  0x66   :  { %v7256_v13 = vld [vmem:[#allocation5 + $0x6c4] ss:$16 sps:$4 sm:$0xff]   ;;  %v7254_v15 = vld [vmem:[#allocation5 + $0x6c0] ss:$16 sps:$4 sm:$0xff]  }
  0x67   :  { %4879 = vmatpush2.bf16.msra.mxu0 %v7207_v38  ;;  %v7259_v16 = vld [vmem:[#allocation5 + $0x4a4] ss:$16 sps:$4 sm:$0xff]   ;;  %v7257_v18 = vld [vmem:[#allocation5 + $0x4a0] ss:$16 sps:$4 sm:$0xff]   ;;  %v8544_v38 = vld [vmem:[#allocation2 + $0x18] sm:$0xff] }
  0x68   :  { %4922 = vmatpush2.bf16.msra.mxu1 %v7208_v39  ;;  %4880 = vmatprep.subr.bf16.mxu0 %v7209_v40  ;;  %v7262_v17 = vld [vmem:[#allocation5 + $0x6a4] ss:$16 sps:$4 sm:$0xff]   ;;  %v7260_v19 = vld [vmem:[#allocation5 + $0x6a0] ss:$16 sps:$4 sm:$0xff]   ;;  %v8546_v39 = vld [vmem:[#allocation2 + $0x78] sm:$0xff] }
  0x69   :  { %4923 = vmatprep.subr.bf16.mxu1 %v7211_v41  ;;  %v7265_v20 = vld [vmem:[#allocation5 + $0x484] ss:$16 sps:$4 sm:$0xff]   ;;  %v7263_v22 = vld [vmem:[#allocation5 + $0x480] ss:$16 sps:$4 sm:$0xff]  }
  0x6a   :  { %v7268_v21 = vld [vmem:[#allocation5 + $0x684] ss:$16 sps:$4 sm:$0xff]   ;;  %v7266_v23 = vld [vmem:[#allocation5 + $0x680] ss:$16 sps:$4 sm:$0xff]  }
  0x6b   :  { %4881 = vmatpush2.bf16.msra.mxu0 %v7213_v42  ;;  %v7271_v24 = vld [vmem:[#allocation5 + $0x464] ss:$16 sps:$4 sm:$0xff]   ;;  %v7269_v26 = vld [vmem:[#allocation5 + $0x460] ss:$16 sps:$4 sm:$0xff]  }
  0x6c   :  { %4924 = vmatpush2.bf16.msra.mxu1 %v7214_v43  ;;  %4882 = vmatprep.subr.bf16.mxu0 %v7215_v44  ;;  %v7274_v25 = vld [vmem:[#allocation5 + $0x664] ss:$16 sps:$4 sm:$0xff]   ;;  %v7272_v27 = vld [vmem:[#allocation5 + $0x660] ss:$16 sps:$4 sm:$0xff]   ;;  %v8554_v43 = vcombine.high %v8544_v38, %v8546_v39 }
  0x6d   :  { %4925 = vmatprep.subr.bf16.mxu1 %v7217_v45  ;;  %v7277_v28 = vld [vmem:[#allocation5 + $0x444] ss:$16 sps:$4 sm:$0xff]   ;;  %v7275_v30 = vld [vmem:[#allocation5 + $0x440] ss:$16 sps:$4 sm:$0xff]  }
  0x6e   :  { %v7280_v29 = vld [vmem:[#allocation5 + $0x644] ss:$16 sps:$4 sm:$0xff]   ;;  %v7278_v31 = vld [vmem:[#allocation5 + $0x640] ss:$16 sps:$4 sm:$0xff]  }
  0x6f   :  { %4883 = vmatpush2.bf16.msra.mxu0 %v7219_v46  ;;  %v7283_v32 = vld [vmem:[#allocation5 + $0x424] ss:$16 sps:$4 sm:$0xff]   ;;  %v7281_v34 = vld [vmem:[#allocation5 + $0x420] ss:$16 sps:$4 sm:$0xff]  }
  0x70   :  { %4926 = vmatpush2.bf16.msra.mxu1 %v7220_v47  ;;  %4884 = vmatprep.subr.bf16.mxu0 %v7221_v52  ;;  %v7286_v33 = vld [vmem:[#allocation5 + $0x624] ss:$16 sps:$4 sm:$0xff]   ;;  %v7284_v35 = vld [vmem:[#allocation5 + $0x620] ss:$16 sps:$4 sm:$0xff]  }
  0x71   :  { %4927 = vmatprep.subr.bf16.mxu1 %v7223_v54  ;;  %v8540_v36 = vld [vmem:[#allocation2 + $0x10] sm:$0xff] }
  0x72   :  { %v8542_v37 = vld [vmem:[#allocation2 + $0x70] sm:$0xff] }
  0x73   :  { %4885 = vmatpush2.bf16.msra.mxu0 %v7225_v56  ;;  %v7289_v40 = vld [vmem:[#allocation5 + $0x404] ss:$16 sps:$4 sm:$0xff]   ;;  %v8550_v41 = vcombine.high %v8540_v36, %v8542_v37  ;;  %v7287_v44 = vld [vmem:[#allocation5 + $0x400] ss:$16 sps:$4 sm:$0xff]  }
  0x74   :  { %4928 = vmatpush2.bf16.msra.mxu1 %v7226_v57  ;;  %4886 = vmatprep.subr.bf16.mxu0 %v7227_v58  ;;  %v7292_v42 = vld [vmem:[#allocation5 + $0x604] ss:$16 sps:$4 sm:$0xff]   ;;  %v7290_v45 = vld [vmem:[#allocation5 + $0x600] ss:$16 sps:$4 sm:$0xff]  }
  0x75   :  { %4929 = vmatprep.subr.bf16.mxu1 %v7229_v59  ;;  %v7295_v46 = vld [vmem:[#allocation5 + $0x5e4] ss:$16 sps:$4 sm:$0xff]   ;;  %v7293_v48 = vld [vmem:[#allocation5 + $0x5e0] ss:$16 sps:$4 sm:$0xff]  }
  0x76   :  { %v7298_v47 = vld [vmem:[#allocation5 + $0x7e4] ss:$16 sps:$4 sm:$0xff]   ;;  %v7296_v49 = vld [vmem:[#allocation5 + $0x7e0] ss:$16 sps:$4 sm:$0xff]  }
  0x77   :  { %4887 = vmatpush2.bf16.msra.mxu0 %v7231_v60  ;;  %v7301_v50 = vld [vmem:[#allocation5 + $0x5c4] ss:$16 sps:$4 sm:$0xff]   ;;  %v7299_v52 = vld [vmem:[#allocation5 + $0x5c0] ss:$16 sps:$4 sm:$0xff]  }
  0x78   :  { %4930 = vmatpush2.bf16.msra.mxu1 %v7232_v61  ;;  %4888 = vmatprep.subr.bf16.mxu0 %v7233_v62  ;;  %v7304_v51 = vld [vmem:[#allocation5 + $0x7c4] ss:$16 sps:$4 sm:$0xff]   ;;  %v7302_v54 = vld [vmem:[#allocation5 + $0x7c0] ss:$16 sps:$4 sm:$0xff]  }
  0x79   :  { %4931 = vmatprep.subr.bf16.mxu1 %v7235_v63  ;;  %v7307_v56 = vld [vmem:[#allocation5 + $0x5a4] ss:$16 sps:$4 sm:$0xff]   ;;  %v7305_v58 = vld [vmem:[#allocation5 + $0x5a0] ss:$16 sps:$4 sm:$0xff]  }
  0x7a   :  { %v7310_v57 = vld [vmem:[#allocation5 + $0x7a4] ss:$16 sps:$4 sm:$0xff]   ;;  %v7308_v59 = vld [vmem:[#allocation5 + $0x7a0] ss:$16 sps:$4 sm:$0xff]  }
  0x7b   :  { %4889 = vmatpush2.bf16.msra.mxu0 %v7237_v0  ;;  %v7313_v60 = vld [vmem:[#allocation5 + $0x584] ss:$16 sps:$4 sm:$0xff]   ;;  %v7311_v62 = vld [vmem:[#allocation5 + $0x580] ss:$16 sps:$4 sm:$0xff]  }
  0x7c   :  { %4932 = vmatpush2.bf16.msra.mxu1 %v7238_v1  ;;  %4890 = vmatprep.subr.bf16.mxu0 %v7239_v2  ;;  %v7316_v61 = vld [vmem:[#allocation5 + $0x784] ss:$16 sps:$4 sm:$0xff]   ;;  %v7314_v63 = vld [vmem:[#allocation5 + $0x780] ss:$16 sps:$4 sm:$0xff]  }
  0x7d   :  { %4933 = vmatprep.subr.bf16.mxu1 %v7241_v3  ;;  %v7319_v0 = vld [vmem:[#allocation5 + $0x564] ss:$16 sps:$4 sm:$0xff]   ;;  %v7317_v2 = vld [vmem:[#allocation5 + $0x560] ss:$16 sps:$4 sm:$0xff]  }
  0x7e   :  { %v7322_v1 = vld [vmem:[#allocation5 + $0x764] ss:$16 sps:$4 sm:$0xff]   ;;  %v7320_v3 = vld [vmem:[#allocation5 + $0x760] ss:$16 sps:$4 sm:$0xff]  }
  0x7f   :  { %4891 = vmatpush2.bf16.msra.mxu0 %v7243_v4  ;;  %v7325_v4 = vld [vmem:[#allocation5 + $0x544] ss:$16 sps:$4 sm:$0xff]  }
  0x80   :  { %4934 = vmatpush2.bf16.msra.mxu1 %v7244_v5  ;;  %4946 = vmatprep.subr.bf16.mxu0 %v7247_v6  ;;  %v7328_v5 = vld [vmem:[#allocation5 + $0x744] ss:$16 sps:$4 sm:$0xff]   ;;  %v7323_v6 = vld [vmem:[#allocation5 + $0x540] ss:$16 sps:$4 sm:$0xff]  }
  0x81   :  { %4989 = vmatprep.subr.bf16.mxu1 %v7250_v7  ;;  %v7326_v7 = vld [vmem:[#allocation5 + $0x740] ss:$16 sps:$4 sm:$0xff]  }
  0x82   :  { %4893 = vmatmul.mubr.bf16.vlgmr.msra.gmra.mxu0 %v8534_v8 }
  0x83   :  { %4936 = vmatmul.mubr.bf16.vlgmr.msra.gmra.mxu1 %v8536_v9  ;;  %4947 = vmatpush1.bf16.msra.mxu0 %v7245_v10  ;;  %v7331_v10 = vld [vmem:[#allocation5 + $0x524] ss:$16 sps:$4 sm:$0xff]  }
  0x84   :  { %4990 = vmatpush1.bf16.msra.mxu1 %v7248_v11  ;;  %4948 = vmatprep.subr.bf16.mxu0 %v7253_v12  ;;  %v7334_v11 = vld [vmem:[#allocation5 + $0x724] ss:$16 sps:$4 sm:$0xff]   ;;  %v7329_v12 = vld [vmem:[#allocation5 + $0x520] ss:$16 sps:$4 sm:$0xff]  }
  0x85   :  { %4991 = vmatprep.subr.bf16.mxu1 %v7256_v13  ;;  %4978 = vmatprep.mubr.bf16.mxu0 %v8550_v41  ;;  %v7332_v13 = vld [vmem:[#allocation5 + $0x720] ss:$16 sps:$4 sm:$0xff]  }
  0x86   :  { %5021 = vmatprep.mubr.bf16.mxu1 %v8554_v43 }
  0x87   :  { %4949 = vmatpush1.bf16.msra.mxu0 %v7251_v14  ;;  %v7337_v14 = vld [vmem:[#allocation5 + $0x504] ss:$16 sps:$4 sm:$0xff]  }
  0x88   :  { %4992 = vmatpush1.bf16.msra.mxu1 %v7254_v15  ;;  %4950 = vmatprep.subr.bf16.mxu0 %v7259_v16  ;;  %v7340_v15 = vld [vmem:[#allocation5 + $0x704] ss:$16 sps:$4 sm:$0xff]   ;;  %v7335_v16 = vld [vmem:[#allocation5 + $0x500] ss:$16 sps:$4 sm:$0xff]  }
  0x89   :  { %4993 = vmatprep.subr.bf16.mxu1 %v7262_v17  ;;  %v7338_v17 = vld [vmem:[#allocation5 + $0x700] ss:$16 sps:$4 sm:$0xff]  }
  0x8b   :  { %4951 = vmatpush1.bf16.msra.mxu0 %v7257_v18  ;;  %v7343_v18 = vld [vmem:[#allocation5 + $0x8e4] ss:$16 sps:$4 sm:$0xff]  }
  0x8c   :  { %4994 = vmatpush1.bf16.msra.mxu1 %v7260_v19  ;;  %4952 = vmatprep.subr.bf16.mxu0 %v7265_v20  ;;  %v7346_v19 = vld [vmem:[#allocation5 + $0xae4] ss:$16 sps:$4 sm:$0xff]   ;;  %v8560_v20 = vcombine.low %v8540_v36, %v8542_v37  ;;  %v7353_v36 = vld [vmem:[#allocation5 + $0x8a0] ss:$16 sps:$4 sm:$0xff]  }
  0x8d   :  { %4995 = vmatprep.subr.bf16.mxu1 %v7268_v21  ;;  %v8564_v21 = vcombine.low %v8544_v38, %v8546_v39  ;;  %v7356_v37 = vld [vmem:[#allocation5 + $0xaa0] ss:$16 sps:$4 sm:$0xff]   ;;  %v7361_v38 = vld [vmem:[#allocation5 + $0x884] ss:$16 sps:$4 sm:$0xff]  }
  0x8e   :  { %v7364_v39 = vld [vmem:[#allocation5 + $0xa84] ss:$16 sps:$4 sm:$0xff]  }
  0x8f   :  { %4953 = vmatpush1.bf16.msra.mxu0 %v7263_v22  ;;  %v7341_v22 = vld [vmem:[#allocation5 + $0x8e0] ss:$16 sps:$4 sm:$0xff]  }
  0x90   :  { %4996 = vmatpush1.bf16.msra.mxu1 %v7266_v23  ;;  %4954 = vmatprep.subr.bf16.mxu0 %v7271_v24  ;;  %v7344_v23 = vld [vmem:[#allocation5 + $0xae0] ss:$16 sps:$4 sm:$0xff]   ;;  %v7349_v24 = vld [vmem:[#allocation5 + $0x8c4] ss:$16 sps:$4 sm:$0xff]  }
  0x91   :  { %4997 = vmatprep.subr.bf16.mxu1 %v7274_v25  ;;  %v7352_v25 = vld [vmem:[#allocation5 + $0xac4] ss:$16 sps:$4 sm:$0xff]  }
  0x93   :  { %4955 = vmatpush1.bf16.msra.mxu0 %v7269_v26  ;;  %v7347_v26 = vld [vmem:[#allocation5 + $0x8c0] ss:$16 sps:$4 sm:$0xff]  }
  0x94   :  { %4998 = vmatpush1.bf16.msra.mxu1 %v7272_v27  ;;  %4956 = vmatprep.subr.bf16.mxu0 %v7277_v28  ;;  %v7350_v27 = vld [vmem:[#allocation5 + $0xac0] ss:$16 sps:$4 sm:$0xff]  }
  0x95   :  { %4999 = vmatprep.subr.bf16.mxu1 %v7280_v29  ;;  %v8566_v28 = vld [vmem:[#allocation2 + $0x20] sm:$0xff] }
  0x96   :  { %v8570_v29 = vld [vmem:[#allocation2 + $0x80] sm:$0xff] }
  0x97   :  { %4957 = vmatpush1.bf16.msra.mxu0 %v7275_v30  ;;  %v8572_v30 = vld [vmem:[#allocation2 + $0x28] sm:$0xff] }
  0x98   :  { %5000 = vmatpush1.bf16.msra.mxu1 %v7278_v31  ;;  %4958 = vmatprep.subr.bf16.mxu0 %v7283_v32  ;;  %v8574_v31 = vld [vmem:[#allocation2 + $0x88] sm:$0xff]  ;;  %v7355_v32 = vld [vmem:[#allocation5 + $0x8a4] ss:$16 sps:$4 sm:$0xff]  }
  0x99   :  { %5001 = vmatprep.subr.bf16.mxu1 %v7286_v33  ;;  %v8578_v33 = vcombine.high %v8566_v28, %v8570_v29 }
  0x9b   :  { %4959 = vmatpush1.bf16.msra.mxu0 %v7281_v34  ;;  %v7358_v34 = vld [vmem:[#allocation5 + $0xaa4] ss:$16 sps:$4 sm:$0xff]  }
  0x9c   :  { %5002 = vmatpush1.bf16.msra.mxu1 %v7284_v35  ;;  %4960 = vmatprep.subr.bf16.mxu0 %v7289_v40  ;;  %v8582_v35 = vcombine.high %v8572_v30, %v8574_v31  ;;  %v7359_v40 = vld [vmem:[#allocation5 + $0x880] ss:$16 sps:$4 sm:$0xff]  }
  0x9d   :  { %5003 = vmatprep.subr.bf16.mxu1 %v7292_v42  ;;  %v7362_v42 = vld [vmem:[#allocation5 + $0xa80] ss:$16 sps:$4 sm:$0xff]  }
  0x9f   :  { %4961 = vmatpush1.bf16.msra.mxu0 %v7287_v44  ;;  %v7367_v44 = vld [vmem:[#allocation5 + $0x864] ss:$16 sps:$4 sm:$0xff]  }
  0xa0   :  { %5004 = vmatpush1.bf16.msra.mxu1 %v7290_v45  ;;  %4962 = vmatprep.subr.bf16.mxu0 %v7295_v46  ;;  %v7370_v45 = vld [vmem:[#allocation5 + $0xa64] ss:$16 sps:$4 sm:$0xff]   ;;  %v7365_v46 = vld [vmem:[#allocation5 + $0x860] ss:$16 sps:$4 sm:$0xff]  }
  0xa1   :  { %5005 = vmatprep.subr.bf16.mxu1 %v7298_v47  ;;  %v7368_v47 = vld [vmem:[#allocation5 + $0xa60] ss:$16 sps:$4 sm:$0xff]  }
  0xa3   :  { %4963 = vmatpush2.bf16.msra.mxu0 %v7293_v48  ;;  %v7373_v48 = vld [vmem:[#allocation5 + $0x844] ss:$16 sps:$4 sm:$0xff]  }
  0xa4   :  { %5006 = vmatpush2.bf16.msra.mxu1 %v7296_v49  ;;  %4964 = vmatprep.subr.bf16.mxu0 %v7301_v50  ;;  %v7376_v49 = vld [vmem:[#allocation5 + $0xa44] ss:$16 sps:$4 sm:$0xff]   ;;  %v7371_v50 = vld [vmem:[#allocation5 + $0x840] ss:$16 sps:$4 sm:$0xff]  }
  0xa5   :  { %5007 = vmatprep.subr.bf16.mxu1 %v7304_v51  ;;  %v7374_v51 = vld [vmem:[#allocation5 + $0xa40] ss:$16 sps:$4 sm:$0xff]  }
  0xa7   :  { %4965 = vmatpush2.bf16.msra.mxu0 %v7299_v52  ;;  %v7379_v52 = vld [vmem:[#allocation5 + $0x824] ss:$16 sps:$4 sm:$0xff]  }
  0xa8   :  { %5008 = vmatpush2.bf16.msra.mxu1 %v7302_v54  ;;  %4966 = vmatprep.subr.bf16.mxu0 %v7307_v56  ;;  %v7382_v54 = vld [vmem:[#allocation5 + $0xa24] ss:$16 sps:$4 sm:$0xff]   ;;  %v7377_v56 = vld [vmem:[#allocation5 + $0x820] ss:$16 sps:$4 sm:$0xff]  }
  0xa9   :  { %5009 = vmatprep.subr.bf16.mxu1 %v7310_v57  ;;  %v7380_v57 = vld [vmem:[#allocation5 + $0xa20] ss:$16 sps:$4 sm:$0xff]  }
  0xab   :  { %4967 = vmatpush2.bf16.msra.mxu0 %v7305_v58  ;;  %v7385_v58 = vld [vmem:[#allocation5 + $0x804] ss:$16 sps:$4 sm:$0xff]  }
  0xac   :  { %5010 = vmatpush2.bf16.msra.mxu1 %v7308_v59  ;;  %4968 = vmatprep.subr.bf16.mxu0 %v7313_v60  ;;  %v7388_v59 = vld [vmem:[#allocation5 + $0xa04] ss:$16 sps:$4 sm:$0xff]   ;;  %v7383_v60 = vld [vmem:[#allocation5 + $0x800] ss:$16 sps:$4 sm:$0xff]  }
  0xad   :  { %5011 = vmatprep.subr.bf16.mxu1 %v7316_v61  ;;  %v7386_v61 = vld [vmem:[#allocation5 + $0xa00] ss:$16 sps:$4 sm:$0xff]  }
  0xaf   :  { %4969 = vmatpush2.bf16.msra.mxu0 %v7311_v62  ;;  %v7391_v62 = vld [vmem:[#allocation5 + $0x9e4] ss:$16 sps:$4 sm:$0xff]  }
  0xb0   :  { %5012 = vmatpush2.bf16.msra.mxu1 %v7314_v63  ;;  %4970 = vmatprep.subr.bf16.mxu0 %v7319_v0  ;;  %v7394_v63 = vld [vmem:[#allocation5 + $0xbe4] ss:$16 sps:$4 sm:$0xff]   ;;  %v7389_v0 = vld [vmem:[#allocation5 + $0x9e0] ss:$16 sps:$4 sm:$0xff]  }
  0xb1   :  { %5013 = vmatprep.subr.bf16.mxu1 %v7322_v1  ;;  %v7392_v1 = vld [vmem:[#allocation5 + $0xbe0] ss:$16 sps:$4 sm:$0xff]  }
  0xb3   :  { %4971 = vmatpush2.bf16.msra.mxu0 %v7317_v2  ;;  %v7397_v2 = vld [vmem:[#allocation5 + $0x9c4] ss:$16 sps:$4 sm:$0xff]  }
  0xb4   :  { %5014 = vmatpush2.bf16.msra.mxu1 %v7320_v3  ;;  %4972 = vmatprep.subr.bf16.mxu0 %v7325_v4  ;;  %v7400_v3 = vld [vmem:[#allocation5 + $0xbc4] ss:$16 sps:$4 sm:$0xff]   ;;  %v7395_v4 = vld [vmem:[#allocation5 + $0x9c0] ss:$16 sps:$4 sm:$0xff]  }
  0xb5   :  { %5015 = vmatprep.subr.bf16.mxu1 %v7328_v5  ;;  %v7398_v5 = vld [vmem:[#allocation5 + $0xbc0] ss:$16 sps:$4 sm:$0xff]  }
  0xb7   :  { %4973 = vmatpush2.bf16.msra.mxu0 %v7323_v6  ;;  %v7403_v6 = vld [vmem:[#allocation5 + $0x9a4] ss:$16 sps:$4 sm:$0xff]  }
  0xb8   :  { %5016 = vmatpush2.bf16.msra.mxu1 %v7326_v7  ;;  %4974 = vmatprep.subr.bf16.mxu0 %v7331_v10  ;;  %v7406_v7 = vld [vmem:[#allocation5 + $0xba4] ss:$16 sps:$4 sm:$0xff]   ;;  %v7401_v10 = vld [vmem:[#allocation5 + $0x9a0] ss:$16 sps:$4 sm:$0xff]  }
  0xb9   :  { %5017 = vmatprep.subr.bf16.mxu1 %v7334_v11  ;;  %v7404_v11 = vld [vmem:[#allocation5 + $0xba0] ss:$16 sps:$4 sm:$0xff]  }
  0xbb   :  { %4975 = vmatpush2.bf16.msra.mxu0 %v7329_v12  ;;  %v7409_v12 = vld [vmem:[#allocation5 + $0x984] ss:$16 sps:$4 sm:$0xff]  }
  0xbc   :  { %5018 = vmatpush2.bf16.msra.mxu1 %v7332_v13  ;;  %4976 = vmatprep.subr.bf16.mxu0 %v7337_v14  ;;  %v7412_v13 = vld [vmem:[#allocation5 + $0xb84] ss:$16 sps:$4 sm:$0xff]   ;;  %v7407_v14 = vld [vmem:[#allocation5 + $0x980] ss:$16 sps:$4 sm:$0xff]  }
  0xbd   :  { %5019 = vmatprep.subr.bf16.mxu1 %v7340_v15  ;;  %v7410_v15 = vld [vmem:[#allocation5 + $0xb80] ss:$16 sps:$4 sm:$0xff]  }
  0xbf   :  { %4977 = vmatpush2.bf16.msra.mxu0 %v7335_v16  ;;  %v7415_v16 = vld [vmem:[#allocation5 + $0x964] ss:$16 sps:$4 sm:$0xff]  }
  0xc0   :  { %5020 = vmatpush2.bf16.msra.mxu1 %v7338_v17  ;;  %5032 = vmatprep.subr.bf16.mxu0 %v7343_v18  ;;  %v7418_v17 = vld [vmem:[#allocation5 + $0xb64] ss:$16 sps:$4 sm:$0xff]   ;;  %v7413_v18 = vld [vmem:[#allocation5 + $0x960] ss:$16 sps:$4 sm:$0xff]  }
  0xc1   :  { %5075 = vmatprep.subr.bf16.mxu1 %v7346_v19  ;;  %v7416_v19 = vld [vmem:[#allocation5 + $0xb60] ss:$16 sps:$4 sm:$0xff]  }
  0xc2   :  { %4979 = vmatmul.mubr.bf16.vlgmr.msra.gmra.mxu0 %v8560_v20 }
  0xc3   :  { %5022 = vmatmul.mubr.bf16.vlgmr.msra.gmra.mxu1 %v8564_v21  ;;  %5033 = vmatpush1.bf16.msra.mxu0 %v7341_v22  ;;  %v7421_v22 = vld [vmem:[#allocation5 + $0x944] ss:$16 sps:$4 sm:$0xff]  }
  0xc4   :  { %5076 = vmatpush1.bf16.msra.mxu1 %v7344_v23  ;;  %5034 = vmatprep.subr.bf16.mxu0 %v7349_v24  ;;  %v7424_v23 = vld [vmem:[#allocation5 + $0xb44] ss:$16 sps:$4 sm:$0xff]   ;;  %v7419_v24 = vld [vmem:[#allocation5 + $0x940] ss:$16 sps:$4 sm:$0xff]  }
  0xc5   :  { %5077 = vmatprep.subr.bf16.mxu1 %v7352_v25  ;;  %5064 = vmatprep.mubr.bf16.mxu0 %v8578_v33  ;;  %v7422_v25 = vld [vmem:[#allocation5 + $0xb40] ss:$16 sps:$4 sm:$0xff]  }
  0xc6   :  { %5107 = vmatprep.mubr.bf16.mxu1 %v8582_v35 }
  0xc7   :  { %5035 = vmatpush1.bf16.msra.mxu0 %v7347_v26  ;;  %v7427_v26 = vld [vmem:[#allocation5 + $0x924] ss:$16 sps:$4 sm:$0xff]  }
  0xc8   :  { %5078 = vmatpush1.bf16.msra.mxu1 %v7350_v27  ;;  %5036 = vmatprep.subr.bf16.mxu0 %v7355_v32  ;;  %v7430_v27 = vld [vmem:[#allocation5 + $0xb24] ss:$16 sps:$4 sm:$0xff]   ;;  %v7425_v32 = vld [vmem:[#allocation5 + $0x920] ss:$16 sps:$4 sm:$0xff]  }
  0xc9   :  { %5079 = vmatprep.subr.bf16.mxu1 %v7358_v34  ;;  %v7428_v34 = vld [vmem:[#allocation5 + $0xb20] ss:$16 sps:$4 sm:$0xff]  }
  0xcb   :  { %5037 = vmatpush1.bf16.msra.mxu0 %v7353_v36  ;;  %v7433_v36 = vld [vmem:[#allocation5 + $0x904] ss:$16 sps:$4 sm:$0xff]  }
  0xcc   :  { %5080 = vmatpush1.bf16.msra.mxu1 %v7356_v37  ;;  %5038 = vmatprep.subr.bf16.mxu0 %v7361_v38  ;;  %v7436_v37 = vld [vmem:[#allocation5 + $0xb04] ss:$16 sps:$4 sm:$0xff]   ;;  %v7431_v38 = vld [vmem:[#allocation5 + $0x900] ss:$16 sps:$4 sm:$0xff]  }
  0xcd   :  { %5081 = vmatprep.subr.bf16.mxu1 %v7364_v39  ;;  %v7434_v39 = vld [vmem:[#allocation5 + $0xb00] ss:$16 sps:$4 sm:$0xff]  }
  0xcf   :  { %5039 = vmatpush1.bf16.msra.mxu0 %v7359_v40  ;;  %v7439_v40 = vld [vmem:[#allocation5 + $0xce4] ss:$16 sps:$4 sm:$0xff]  }
  0xd0   :  { %5082 = vmatpush1.bf16.msra.mxu1 %v7362_v42  ;;  %5040 = vmatprep.subr.bf16.mxu0 %v7367_v44  ;;  %v7442_v42 = vld [vmem:[#allocation5 + $0xee4] ss:$16 sps:$4 sm:$0xff]  }
  0xd1   :  { %5083 = vmatprep.subr.bf16.mxu1 %v7370_v45  ;;  %v8586_v44 = vld [vmem:[#allocation2 + $0x30] sm:$0xff] }
  0xd2   :  { %v7437_v45 = vld [vmem:[#allocation5 + $0xce0] ss:$16 sps:$4 sm:$0xff]  }
  0xd3   :  { %5041 = vmatpush1.bf16.msra.mxu0 %v7365_v46  ;;  %v8588_v46 = vld [vmem:[#allocation2 + $0x90] sm:$0xff] }
  0xd4   :  { %5084 = vmatpush1.bf16.msra.mxu1 %v7368_v47  ;;  %5042 = vmatprep.subr.bf16.mxu0 %v7373_v48  ;;  %v8590_v47 = vld [vmem:[#allocation2 + $0x38] sm:$0xff]  ;;  %v8594_v48 = vcombine.low %v8566_v28, %v8570_v29  ;;  %v7443_v29 = vld [vmem:[#allocation5 + $0xcc0] ss:$16 sps:$4 sm:$0xff]  }
  0xd5   :  { %5085 = vmatprep.subr.bf16.mxu1 %v7376_v49  ;;  %v8598_v49 = vcombine.low %v8572_v30, %v8574_v31  ;;  %v7446_v30 = vld [vmem:[#allocation5 + $0xec0] ss:$16 sps:$4 sm:$0xff]   ;;  %v7451_v31 = vld [vmem:[#allocation5 + $0xca4] ss:$16 sps:$4 sm:$0xff]  }
  0xd7   :  { %5043 = vmatpush1.bf16.msra.mxu0 %v7371_v50  ;;  %v8600_v50 = vld [vmem:[#allocation2 + $0x98] sm:$0xff] }
  0xd8   :  { %5086 = vmatpush1.bf16.msra.mxu1 %v7374_v51  ;;  %5044 = vmatprep.subr.bf16.mxu0 %v7379_v52  ;;  %v7440_v51 = vld [vmem:[#allocation5 + $0xee0] ss:$16 sps:$4 sm:$0xff]   ;;  %v7445_v52 = vld [vmem:[#allocation5 + $0xcc4] ss:$16 sps:$4 sm:$0xff]   ;;  %v8608_v28 = vcombine.high %v8590_v47, %v8600_v50 }
  0xd9   :  { %5087 = vmatprep.subr.bf16.mxu1 %v7382_v54  ;;  %v7448_v54 = vld [vmem:[#allocation5 + $0xec4] ss:$16 sps:$4 sm:$0xff]  }
  0xdb   :  { %5045 = vmatpush1.bf16.msra.mxu0 %v7377_v56  ;;  %v8604_v56 = vcombine.high %v8586_v44, %v8588_v46 }
  0xdc   :  { %5088 = vmatpush1.bf16.msra.mxu1 %v7380_v57  ;;  %5046 = vmatprep.subr.bf16.mxu0 %v7385_v58  ;;  %v7454_v57 = vld [vmem:[#allocation5 + $0xea4] ss:$16 sps:$4 sm:$0xff]   ;;  %v7449_v58 = vld [vmem:[#allocation5 + $0xca0] ss:$16 sps:$4 sm:$0xff]  }
  0xdd   :  { %5089 = vmatprep.subr.bf16.mxu1 %v7388_v59  ;;  %v7452_v59 = vld [vmem:[#allocation5 + $0xea0] ss:$16 sps:$4 sm:$0xff]  }
  0xdf   :  { %5047 = vmatpush1.bf16.msra.mxu0 %v7383_v60  ;;  %v7457_v60 = vld [vmem:[#allocation5 + $0xc84] ss:$16 sps:$4 sm:$0xff]  }
  0xe0   :  { %5090 = vmatpush1.bf16.msra.mxu1 %v7386_v61  ;;  %5048 = vmatprep.subr.bf16.mxu0 %v7391_v62  ;;  %v7460_v61 = vld [vmem:[#allocation5 + $0xe84] ss:$16 sps:$4 sm:$0xff]   ;;  %v7455_v62 = vld [vmem:[#allocation5 + $0xc80] ss:$16 sps:$4 sm:$0xff]  }
  0xe1   :  { %5091 = vmatprep.subr.bf16.mxu1 %v7394_v63  ;;  %v7458_v63 = vld [vmem:[#allocation5 + $0xe80] ss:$16 sps:$4 sm:$0xff]  }
  0xe3   :  { %5049 = vmatpush2.bf16.msra.mxu0 %v7389_v0  ;;  %v7463_v0 = vld [vmem:[#allocation5 + $0xc64] ss:$16 sps:$4 sm:$0xff]  }
  0xe4   :  { %5092 = vmatpush2.bf16.msra.mxu1 %v7392_v1  ;;  %5050 = vmatprep.subr.bf16.mxu0 %v7397_v2  ;;  %v7466_v1 = vld [vmem:[#allocation5 + $0xe64] ss:$16 sps:$4 sm:$0xff]   ;;  %v7461_v2 = vld [vmem:[#allocation5 + $0xc60] ss:$16 sps:$4 sm:$0xff]  }
  0xe5   :  { %5093 = vmatprep.subr.bf16.mxu1 %v7400_v3  ;;  %v7464_v3 = vld [vmem:[#allocation5 + $0xe60] ss:$16 sps:$4 sm:$0xff]  }
  0xe7   :  { %5051 = vmatpush2.bf16.msra.mxu0 %v7395_v4  ;;  %v7469_v4 = vld [vmem:[#allocation5 + $0xc44] ss:$16 sps:$4 sm:$0xff]  }
  0xe8   :  { %5094 = vmatpush2.bf16.msra.mxu1 %v7398_v5  ;;  %5052 = vmatprep.subr.bf16.mxu0 %v7403_v6  ;;  %v7472_v5 = vld [vmem:[#allocation5 + $0xe44] ss:$16 sps:$4 sm:$0xff]   ;;  %v7467_v6 = vld [vmem:[#allocation5 + $0xc40] ss:$16 sps:$4 sm:$0xff]  }
  0xe9   :  { %5095 = vmatprep.subr.bf16.mxu1 %v7406_v7  ;;  %v7470_v7 = vld [vmem:[#allocation5 + $0xe40] ss:$16 sps:$4 sm:$0xff]  }
  0xeb   :  { %5053 = vmatpush2.bf16.msra.mxu0 %v7401_v10  ;;  %v7475_v10 = vld [vmem:[#allocation5 + $0xc24] ss:$16 sps:$4 sm:$0xff]  }
  0xec   :  { %5096 = vmatpush2.bf16.msra.mxu1 %v7404_v11  ;;  %5054 = vmatprep.subr.bf16.mxu0 %v7409_v12  ;;  %v7478_v11 = vld [vmem:[#allocation5 + $0xe24] ss:$16 sps:$4 sm:$0xff]   ;;  %v7473_v12 = vld [vmem:[#allocation5 + $0xc20] ss:$16 sps:$4 sm:$0xff]  }
  0xed   :  { %5097 = vmatprep.subr.bf16.mxu1 %v7412_v13  ;;  %v7476_v13 = vld [vmem:[#allocation5 + $0xe20] ss:$16 sps:$4 sm:$0xff]  }
  0xef   :  { %5055 = vmatpush2.bf16.msra.mxu0 %v7407_v14  ;;  %v7481_v14 = vld [vmem:[#allocation5 + $0xc04] ss:$16 sps:$4 sm:$0xff]  }
  0xf0   :  { %5098 = vmatpush2.bf16.msra.mxu1 %v7410_v15  ;;  %5056 = vmatprep.subr.bf16.mxu0 %v7415_v16  ;;  %v7484_v15 = vld [vmem:[#allocation5 + $0xe04] ss:$16 sps:$4 sm:$0xff]   ;;  %v7479_v16 = vld [vmem:[#allocation5 + $0xc00] ss:$16 sps:$4 sm:$0xff]  }
  0xf1   :  { %5099 = vmatprep.subr.bf16.mxu1 %v7418_v17  ;;  %v7482_v17 = vld [vmem:[#allocation5 + $0xe00] ss:$16 sps:$4 sm:$0xff]  }
  0xf3   :  { %5057 = vmatpush2.bf16.msra.mxu0 %v7413_v18  ;;  %v7487_v18 = vld [vmem:[#allocation5 + $0xde4] ss:$16 sps:$4 sm:$0xff]  }
  0xf4   :  { %5100 = vmatpush2.bf16.msra.mxu1 %v7416_v19  ;;  %5058 = vmatprep.subr.bf16.mxu0 %v7421_v22  ;;  %v7490_v19 = vld [vmem:[#allocation5 + $0xfe4] ss:$16 sps:$4 sm:$0xff]   ;;  %v7485_v22 = vld [vmem:[#allocation5 + $0xde0] ss:$16 sps:$4 sm:$0xff]  }
  0xf5   :  { %5101 = vmatprep.subr.bf16.mxu1 %v7424_v23  ;;  %v7488_v23 = vld [vmem:[#allocation5 + $0xfe0] ss:$16 sps:$4 sm:$0xff]  }
  0xf7   :  { %5059 = vmatpush2.bf16.msra.mxu0 %v7419_v24  ;;  %v7493_v24 = vld [vmem:[#allocation5 + $0xdc4] ss:$16 sps:$4 sm:$0xff]  }
  0xf8   :  { %5102 = vmatpush2.bf16.msra.mxu1 %v7422_v25  ;;  %5060 = vmatprep.subr.bf16.mxu0 %v7427_v26  ;;  %v7496_v25 = vld [vmem:[#allocation5 + $0xfc4] ss:$16 sps:$4 sm:$0xff]   ;;  %v7491_v26 = vld [vmem:[#allocation5 + $0xdc0] ss:$16 sps:$4 sm:$0xff]  }
  0xf9   :  { %5103 = vmatprep.subr.bf16.mxu1 %v7430_v27  ;;  %v7494_v27 = vld [vmem:[#allocation5 + $0xfc0] ss:$16 sps:$4 sm:$0xff]  }
  0xfb   :  { %5061 = vmatpush2.bf16.msra.mxu0 %v7425_v32  ;;  %v7499_v32 = vld [vmem:[#allocation5 + $0xda4] ss:$16 sps:$4 sm:$0xff]  }
  0xfc   :  { %5104 = vmatpush2.bf16.msra.mxu1 %v7428_v34  ;;  %5062 = vmatprep.subr.bf16.mxu0 %v7433_v36  ;;  %v7502_v34 = vld [vmem:[#allocation5 + $0xfa4] ss:$16 sps:$4 sm:$0xff]   ;;  %v7497_v36 = vld [vmem:[#allocation5 + $0xda0] ss:$16 sps:$4 sm:$0xff]  }
  0xfd   :  { %5105 = vmatprep.subr.bf16.mxu1 %v7436_v37  ;;  %v7500_v37 = vld [vmem:[#allocation5 + $0xfa0] ss:$16 sps:$4 sm:$0xff]  }
  0xff   :  { %5063 = vmatpush2.bf16.msra.mxu0 %v7431_v38  ;;  %v7505_v38 = vld [vmem:[#allocation5 + $0xd84] ss:$16 sps:$4 sm:$0xff]  }
 0x100   :  { %5106 = vmatpush2.bf16.msra.mxu1 %v7434_v39  ;;  %5118 = vmatprep.subr.bf16.mxu0 %v7439_v40  ;;  %v7508_v39 = vld [vmem:[#allocation5 + $0xf84] ss:$16 sps:$4 sm:$0xff]   ;;  %v7503_v40 = vld [vmem:[#allocation5 + $0xd80] ss:$16 sps:$4 sm:$0xff]  }
 0x101   :  { %5161 = vmatprep.subr.bf16.mxu1 %v7442_v42  ;;  %v7506_v42 = vld [vmem:[#allocation5 + $0xf80] ss:$16 sps:$4 sm:$0xff]  }
 0x102   :  { %5065 = vmatmul.mubr.bf16.vlgmr.msra.gmra.mxu0 %v8594_v48 }
 0x103   :  { %5108 = vmatmul.mubr.bf16.vlgmr.msra.gmra.mxu1 %v8598_v49  ;;  %5119 = vmatpush1.bf16.msra.mxu0 %v7437_v45  ;;  %v7511_v45 = vld [vmem:[#allocation5 + $0xd64] ss:$16 sps:$4 sm:$0xff]  }
 0x104   :  { %5162 = vmatpush1.bf16.msra.mxu1 %v7440_v51  ;;  %5120 = vmatprep.subr.bf16.mxu0 %v7445_v52  ;;  %v7514_v51 = vld [vmem:[#allocation5 + $0xf64] ss:$16 sps:$4 sm:$0xff]   ;;  %v7509_v52 = vld [vmem:[#allocation5 + $0xd60] ss:$16 sps:$4 sm:$0xff]  }
 0x105   :  { %5163 = vmatprep.subr.bf16.mxu1 %v7448_v54  ;;  %5150 = vmatprep.mubr.bf16.mxu0 %v8604_v56  ;;  %v7512_v54 = vld [vmem:[#allocation5 + $0xf60] ss:$16 sps:$4 sm:$0xff]  }
 0x106   :  { %5193 = vmatprep.mubr.bf16.mxu1 %v8608_v28 }
 0x107   :  { %5121 = vmatpush1.bf16.msra.mxu0 %v7443_v29  ;;  %v7517_v29 = vld [vmem:[#allocation5 + $0xd44] ss:$16 sps:$4 sm:$0xff]  }
 0x108   :  { %5164 = vmatpush1.bf16.msra.mxu1 %v7446_v30  ;;  %5122 = vmatprep.subr.bf16.mxu0 %v7451_v31  ;;  %v7520_v30 = vld [vmem:[#allocation5 + $0xf44] ss:$16 sps:$4 sm:$0xff]   ;;  %v7515_v31 = vld [vmem:[#allocation5 + $0xd40] ss:$16 sps:$4 sm:$0xff]  }
 0x109   :  { %5165 = vmatprep.subr.bf16.mxu1 %v7454_v57  ;;  %v7518_v57 = vld [vmem:[#allocation5 + $0xf40] ss:$16 sps:$4 sm:$0xff]  }
 0x10b   :  { %5123 = vmatpush1.bf16.msra.mxu0 %v7449_v58  ;;  %v7523_v58 = vld [vmem:[#allocation5 + $0xd24] ss:$16 sps:$4 sm:$0xff]  }
 0x10c   :  { %5166 = vmatpush1.bf16.msra.mxu1 %v7452_v59  ;;  %5124 = vmatprep.subr.bf16.mxu0 %v7457_v60  ;;  %v7526_v59 = vld [vmem:[#allocation5 + $0xf24] ss:$16 sps:$4 sm:$0xff]   ;;  %v7521_v60 = vld [vmem:[#allocation5 + $0xd20] ss:$16 sps:$4 sm:$0xff]  }
 0x10d   :  { %5167 = vmatprep.subr.bf16.mxu1 %v7460_v61  ;;  %v7524_v61 = vld [vmem:[#allocation5 + $0xf20] ss:$16 sps:$4 sm:$0xff]  }
 0x10f   :  { %5125 = vmatpush1.bf16.msra.mxu0 %v7455_v62  ;;  %v7529_v62 = vld [vmem:[#allocation5 + $0xd04] ss:$16 sps:$4 sm:$0xff]  }
 0x110   :  { %5168 = vmatpush1.bf16.msra.mxu1 %v7458_v63  ;;  %5126 = vmatprep.subr.bf16.mxu0 %v7463_v0  ;;  %v7532_v63 = vld [vmem:[#allocation5 + $0xf04] ss:$16 sps:$4 sm:$0xff]   ;;  %v7527_v0 = vld [vmem:[#allocation5 + $0xd00] ss:$16 sps:$4 sm:$0xff]  }
 0x111   :  { %5169 = vmatprep.subr.bf16.mxu1 %v7466_v1  ;;  %v7530_v1 = vld [vmem:[#allocation5 + $0xf00] ss:$16 sps:$4 sm:$0xff]  }
 0x113   :  { %5127 = vmatpush1.bf16.msra.mxu0 %v7461_v2  ;;  %v7535_v2 = vld [vmem:[#allocation5 + $0x10e4] ss:$16 sps:$4 sm:$0xff]  }
 0x114   :  { %5170 = vmatpush1.bf16.msra.mxu1 %v7464_v3  ;;  %5128 = vmatprep.subr.bf16.mxu0 %v7469_v4  ;;  %v7538_v3 = vld [vmem:[#allocation5 + $0x12e4] ss:$16 sps:$4 sm:$0xff]  }
 0x115   :  { %5171 = vmatprep.subr.bf16.mxu1 %v7472_v5  ;;  %v8614_v4 = vld [vmem:[#allocation2 + $0x40] sm:$0xff] }
 0x116   :  { %v7533_v5 = vld [vmem:[#allocation5 + $0x10e0] ss:$16 sps:$4 sm:$0xff]  }
 0x117   :  { %5129 = vmatpush1.bf16.msra.mxu0 %v7467_v6  ;;  %v8616_v6 = vld [vmem:[#allocation2 + $0xa0] sm:$0xff] }
 0x118   :  { %5172 = vmatpush1.bf16.msra.mxu1 %v7470_v7  ;;  %5130 = vmatprep.subr.bf16.mxu0 %v7475_v10  ;;  %v8618_v7 = vld [vmem:[#allocation2 + $0x48] sm:$0xff]  ;;  %v8622_v10 = vcombine.low %v8586_v44, %v8588_v46  ;;  %v7539_v46 = vld [vmem:[#allocation5 + $0x10c0] ss:$16 sps:$4 sm:$0xff]  }
 0x119   :  { %5173 = vmatprep.subr.bf16.mxu1 %v7478_v11  ;;  %v8626_v11 = vcombine.low %v8590_v47, %v8600_v50  ;;  %v7542_v47 = vld [vmem:[#allocation5 + $0x12c0] ss:$16 sps:$4 sm:$0xff]   ;;  %v7547_v50 = vld [vmem:[#allocation5 + $0x10a4] ss:$16 sps:$4 sm:$0xff]  }
 0x11b   :  { %5131 = vmatpush1.bf16.msra.mxu0 %v7473_v12  ;;  %v8628_v12 = vld [vmem:[#allocation2 + $0xa8] sm:$0xff] }
 0x11c   :  { %5174 = vmatpush1.bf16.msra.mxu1 %v7476_v13  ;;  %5132 = vmatprep.subr.bf16.mxu0 %v7481_v14  ;;  %v7536_v13 = vld [vmem:[#allocation5 + $0x12e0] ss:$16 sps:$4 sm:$0xff]   ;;  %v7541_v14 = vld [vmem:[#allocation5 + $0x10c4] ss:$16 sps:$4 sm:$0xff]   ;;  %v8636_v44 = vcombine.high %v8618_v7, %v8628_v12 }
 0x11d   :  { %5175 = vmatprep.subr.bf16.mxu1 %v7484_v15  ;;  %v7544_v15 = vld [vmem:[#allocation5 + $0x12c4] ss:$16 sps:$4 sm:$0xff]  }
 0x11f   :  { %5133 = vmatpush1.bf16.msra.mxu0 %v7479_v16  ;;  %v8632_v16 = vcombine.high %v8614_v4, %v8616_v6 }
 0x120   :  { %5176 = vmatpush1.bf16.msra.mxu1 %v7482_v17  ;;  %5134 = vmatprep.subr.bf16.mxu0 %v7487_v18  ;;  %v7550_v17 = vld [vmem:[#allocation5 + $0x12a4] ss:$16 sps:$4 sm:$0xff]   ;;  %v7545_v18 = vld [vmem:[#allocation5 + $0x10a0] ss:$16 sps:$4 sm:$0xff]  }
 0x121   :  { %5177 = vmatprep.subr.bf16.mxu1 %v7490_v19  ;;  %v7548_v19 = vld [vmem:[#allocation5 + $0x12a0] ss:$16 sps:$4 sm:$0xff]  }
 0x123   :  { %5135 = vmatpush2.bf16.msra.mxu0 %v7485_v22  ;;  %v7553_v22 = vld [vmem:[#allocation5 + $0x1084] ss:$16 sps:$4 sm:$0xff]  }
 0x124   :  { %5178 = vmatpush2.bf16.msra.mxu1 %v7488_v23  ;;  %5136 = vmatprep.subr.bf16.mxu0 %v7493_v24  ;;  %v7556_v23 = vld [vmem:[#allocation5 + $0x1284] ss:$16 sps:$4 sm:$0xff]   ;;  %v7551_v24 = vld [vmem:[#allocation5 + $0x1080] ss:$16 sps:$4 sm:$0xff]  }
 0x125   :  { %5179 = vmatprep.subr.bf16.mxu1 %v7496_v25  ;;  %v7554_v25 = vld [vmem:[#allocation5 + $0x1280] ss:$16 sps:$4 sm:$0xff]  }
 0x127   :  { %5137 = vmatpush2.bf16.msra.mxu0 %v7491_v26  ;;  %v7559_v26 = vld [vmem:[#allocation5 + $0x1064] ss:$16 sps:$4 sm:$0xff]  }
 0x128   :  { %5180 = vmatpush2.bf16.msra.mxu1 %v7494_v27  ;;  %5138 = vmatprep.subr.bf16.mxu0 %v7499_v32  ;;  %v7562_v27 = vld [vmem:[#allocation5 + $0x1264] ss:$16 sps:$4 sm:$0xff]   ;;  %v7557_v32 = vld [vmem:[#allocation5 + $0x1060] ss:$16 sps:$4 sm:$0xff]  }
 0x129   :  { %5181 = vmatprep.subr.bf16.mxu1 %v7502_v34  ;;  %v7560_v34 = vld [vmem:[#allocation5 + $0x1260] ss:$16 sps:$4 sm:$0xff]  }
 0x12b   :  { %5139 = vmatpush2.bf16.msra.mxu0 %v7497_v36  ;;  %v7565_v36 = vld [vmem:[#allocation5 + $0x1044] ss:$16 sps:$4 sm:$0xff]  }
 0x12c   :  { %5182 = vmatpush2.bf16.msra.mxu1 %v7500_v37  ;;  %5140 = vmatprep.subr.bf16.mxu0 %v7505_v38  ;;  %v7568_v37 = vld [vmem:[#allocation5 + $0x1244] ss:$16 sps:$4 sm:$0xff]   ;;  %v7563_v38 = vld [vmem:[#allocation5 + $0x1040] ss:$16 sps:$4 sm:$0xff]  }
 0x12d   :  { %5183 = vmatprep.subr.bf16.mxu1 %v7508_v39  ;;  %v7566_v39 = vld [vmem:[#allocation5 + $0x1240] ss:$16 sps:$4 sm:$0xff]  }
 0x12f   :  { %5141 = vmatpush2.bf16.msra.mxu0 %v7503_v40  ;;  %v7571_v40 = vld [vmem:[#allocation5 + $0x1024] ss:$16 sps:$4 sm:$0xff]  }
 0x130   :  { %5184 = vmatpush2.bf16.msra.mxu1 %v7506_v42  ;;  %5142 = vmatprep.subr.bf16.mxu0 %v7511_v45  ;;  %v7574_v42 = vld [vmem:[#allocation5 + $0x1224] ss:$16 sps:$4 sm:$0xff]   ;;  %v7569_v45 = vld [vmem:[#allocation5 + $0x1020] ss:$16 sps:$4 sm:$0xff]  }
 0x131   :  { %5185 = vmatprep.subr.bf16.mxu1 %v7514_v51  ;;  %v7572_v51 = vld [vmem:[#allocation5 + $0x1220] ss:$16 sps:$4 sm:$0xff]  }
 0x133   :  { %5143 = vmatpush2.bf16.msra.mxu0 %v7509_v52  ;;  %v7577_v52 = vld [vmem:[#allocation5 + $0x1004] ss:$16 sps:$4 sm:$0xff]  }
 0x134   :  { %5186 = vmatpush2.bf16.msra.mxu1 %v7512_v54  ;;  %5144 = vmatprep.subr.bf16.mxu0 %v7517_v29  ;;  %v7580_v54 = vld [vmem:[#allocation5 + $0x1204] ss:$16 sps:$4 sm:$0xff]   ;;  %v7575_v29 = vld [vmem:[#allocation5 + $0x1000] ss:$16 sps:$4 sm:$0xff]  }
 0x135   :  { %5187 = vmatprep.subr.bf16.mxu1 %v7520_v30  ;;  %v7578_v30 = vld [vmem:[#allocation5 + $0x1200] ss:$16 sps:$4 sm:$0xff]  }
 0x137   :  { %5145 = vmatpush2.bf16.msra.mxu0 %v7515_v31  ;;  %v7583_v31 = vld [vmem:[#allocation5 + $0x11e4] ss:$16 sps:$4 sm:$0xff]  }
 0x138   :  { %5188 = vmatpush2.bf16.msra.mxu1 %v7518_v57  ;;  %5146 = vmatprep.subr.bf16.mxu0 %v7523_v58  ;;  %v7586_v57 = vld [vmem:[#allocation5 + $0x13e4] ss:$16 sps:$4 sm:$0xff]   ;;  %v7581_v58 = vld [vmem:[#allocation5 + $0x11e0] ss:$16 sps:$4 sm:$0xff]  }
 0x139   :  { %5189 = vmatprep.subr.bf16.mxu1 %v7526_v59  ;;  %v7584_v59 = vld [vmem:[#allocation5 + $0x13e0] ss:$16 sps:$4 sm:$0xff]  }
 0x13b   :  { %5147 = vmatpush2.bf16.msra.mxu0 %v7521_v60  ;;  %v7589_v60 = vld [vmem:[#allocation5 + $0x11c4] ss:$16 sps:$4 sm:$0xff]  }
 0x13c   :  { %5190 = vmatpush2.bf16.msra.mxu1 %v7524_v61  ;;  %5148 = vmatprep.subr.bf16.mxu0 %v7529_v62  ;;  %v7592_v61 = vld [vmem:[#allocation5 + $0x13c4] ss:$16 sps:$4 sm:$0xff]   ;;  %v7587_v62 = vld [vmem:[#allocation5 + $0x11c0] ss:$16 sps:$4 sm:$0xff]  }
 0x13d   :  { %5191 = vmatprep.subr.bf16.mxu1 %v7532_v63  ;;  %v7590_v63 = vld [vmem:[#allocation5 + $0x13c0] ss:$16 sps:$4 sm:$0xff]  }
 0x13f   :  { %5149 = vmatpush2.bf16.msra.mxu0 %v7527_v0  ;;  %v7595_v0 = vld [vmem:[#allocation5 + $0x11a4] ss:$16 sps:$4 sm:$0xff]  }
 0x140   :  { %5192 = vmatpush2.bf16.msra.mxu1 %v7530_v1  ;;  %5204 = vmatprep.subr.bf16.mxu0 %v7535_v2  ;;  %v7598_v1 = vld [vmem:[#allocation5 + $0x13a4] ss:$16 sps:$4 sm:$0xff]   ;;  %v7593_v2 = vld [vmem:[#allocation5 + $0x11a0] ss:$16 sps:$4 sm:$0xff]  }
 0x141   :  { %5247 = vmatprep.subr.bf16.mxu1 %v7538_v3  ;;  %v7596_v3 = vld [vmem:[#allocation5 + $0x13a0] ss:$16 sps:$4 sm:$0xff]  }
 0x142   :  { %5151 = vmatmul.mubr.bf16.vlgmr.msra.gmra.mxu0 %v8622_v10 }
 0x143   :  { %5194 = vmatmul.mubr.bf16.vlgmr.msra.gmra.mxu1 %v8626_v11  ;;  %5205 = vmatpush1.bf16.msra.mxu0 %v7533_v5  ;;  %v7601_v5 = vld [vmem:[#allocation5 + $0x1184] ss:$16 sps:$4 sm:$0xff]  }
 0x144   :  { %5248 = vmatpush1.bf16.msra.mxu1 %v7536_v13  ;;  %5206 = vmatprep.subr.bf16.mxu0 %v7541_v14  ;;  %v7604_v13 = vld [vmem:[#allocation5 + $0x1384] ss:$16 sps:$4 sm:$0xff]   ;;  %v7599_v14 = vld [vmem:[#allocation5 + $0x1180] ss:$16 sps:$4 sm:$0xff]  }
 0x145   :  { %5249 = vmatprep.subr.bf16.mxu1 %v7544_v15  ;;  %5236 = vmatprep.mubr.bf16.mxu0 %v8632_v16  ;;  %v7602_v15 = vld [vmem:[#allocation5 + $0x1380] ss:$16 sps:$4 sm:$0xff]  }
 0x146   :  { %5279 = vmatprep.mubr.bf16.mxu1 %v8636_v44 }
 0x147   :  { %5207 = vmatpush1.bf16.msra.mxu0 %v7539_v46  ;;  %v7607_v46 = vld [vmem:[#allocation5 + $0x1164] ss:$16 sps:$4 sm:$0xff]  }
 0x148   :  { %5250 = vmatpush1.bf16.msra.mxu1 %v7542_v47  ;;  %5208 = vmatprep.subr.bf16.mxu0 %v7547_v50  ;;  %v7610_v47 = vld [vmem:[#allocation5 + $0x1364] ss:$16 sps:$4 sm:$0xff]   ;;  %v7605_v50 = vld [vmem:[#allocation5 + $0x1160] ss:$16 sps:$4 sm:$0xff]  }
 0x149   :  { %5251 = vmatprep.subr.bf16.mxu1 %v7550_v17  ;;  %v7608_v17 = vld [vmem:[#allocation5 + $0x1360] ss:$16 sps:$4 sm:$0xff]  }
 0x14b   :  { %5209 = vmatpush1.bf16.msra.mxu0 %v7545_v18  ;;  %v7613_v18 = vld [vmem:[#allocation5 + $0x1144] ss:$16 sps:$4 sm:$0xff]  }
 0x14c   :  { %5252 = vmatpush1.bf16.msra.mxu1 %v7548_v19  ;;  %5210 = vmatprep.subr.bf16.mxu0 %v7553_v22  ;;  %v7616_v19 = vld [vmem:[#allocation5 + $0x1344] ss:$16 sps:$4 sm:$0xff]   ;;  %v7611_v22 = vld [vmem:[#allocation5 + $0x1140] ss:$16 sps:$4 sm:$0xff]  }
 0x14d   :  { %5253 = vmatprep.subr.bf16.mxu1 %v7556_v23  ;;  %v7614_v23 = vld [vmem:[#allocation5 + $0x1340] ss:$16 sps:$4 sm:$0xff]  }
 0x14f   :  { %5211 = vmatpush1.bf16.msra.mxu0 %v7551_v24  ;;  %v7619_v24 = vld [vmem:[#allocation5 + $0x1124] ss:$16 sps:$4 sm:$0xff]  }
 0x150   :  { %5254 = vmatpush1.bf16.msra.mxu1 %v7554_v25  ;;  %5212 = vmatprep.subr.bf16.mxu0 %v7559_v26  ;;  %v7622_v25 = vld [vmem:[#allocation5 + $0x1324] ss:$16 sps:$4 sm:$0xff]   ;;  %v7617_v26 = vld [vmem:[#allocation5 + $0x1120] ss:$16 sps:$4 sm:$0xff]  }
 0x151   :  { %5255 = vmatprep.subr.bf16.mxu1 %v7562_v27  ;;  %v7620_v27 = vld [vmem:[#allocation5 + $0x1320] ss:$16 sps:$4 sm:$0xff]  }
 0x153   :  { %5213 = vmatpush1.bf16.msra.mxu0 %v7557_v32  ;;  %v7625_v32 = vld [vmem:[#allocation5 + $0x1104] ss:$16 sps:$4 sm:$0xff]  }
 0x154   :  { %5256 = vmatpush1.bf16.msra.mxu1 %v7560_v34  ;;  %5214 = vmatprep.subr.bf16.mxu0 %v7565_v36  ;;  %v7628_v34 = vld [vmem:[#allocation5 + $0x1304] ss:$16 sps:$4 sm:$0xff]   ;;  %v7623_v36 = vld [vmem:[#allocation5 + $0x1100] ss:$16 sps:$4 sm:$0xff]  }
 0x155   :  { %5257 = vmatprep.subr.bf16.mxu1 %v7568_v37  ;;  %v7626_v37 = vld [vmem:[#allocation5 + $0x1300] ss:$16 sps:$4 sm:$0xff]  }
 0x157   :  { %5215 = vmatpush1.bf16.msra.mxu0 %v7563_v38  ;;  %v7631_v38 = vld [vmem:[#allocation5 + $0x14e4] ss:$16 sps:$4 sm:$0xff]  }
 0x158   :  { %5258 = vmatpush1.bf16.msra.mxu1 %v7566_v39  ;;  %5216 = vmatprep.subr.bf16.mxu0 %v7571_v40  ;;  %v7634_v39 = vld [vmem:[#allocation5 + $0x16e4] ss:$16 sps:$4 sm:$0xff]  }
 0x159   :  { %5259 = vmatprep.subr.bf16.mxu1 %v7574_v42  ;;  %v8642_v40 = vld [vmem:[#allocation2 + $0x50] sm:$0xff] }
 0x15a   :  { %v8644_v42 = vld [vmem:[#allocation2 + $0xb0] sm:$0xff] }
 0x15b   :  { %5217 = vmatpush1.bf16.msra.mxu0 %v7569_v45  ;;  %v8646_v45 = vld [vmem:[#allocation2 + $0x58] sm:$0xff] }
 0x15c   :  { %5260 = vmatpush1.bf16.msra.mxu1 %v7572_v51  ;;  %5218 = vmatprep.subr.bf16.mxu0 %v7577_v52  ;;  %v8648_v51 = vld [vmem:[#allocation2 + $0xb8] sm:$0xff]  ;;  %v7629_v52 = vld [vmem:[#allocation5 + $0x14e0] ss:$16 sps:$4 sm:$0xff]  }
 0x15d   :  { %5261 = vmatprep.subr.bf16.mxu1 %v7580_v54  ;;  %v7632_v54 = vld [vmem:[#allocation5 + $0x16e0] ss:$16 sps:$4 sm:$0xff]  }
 0x15f   :  { %5219 = vmatpush1.bf16.msra.mxu0 %v7575_v29  ;;  %v8652_v29 = vcombine.low %v8614_v4, %v8616_v6  ;;  %v8664_v4 = vcombine.high %v8646_v45, %v8648_v51  ;;  %v7643_v6 = vld [vmem:[#allocation5 + $0x14a4] ss:$16 sps:$4 sm:$0xff]  }
 0x160   :  { %5262 = vmatpush1.bf16.msra.mxu1 %v7578_v30  ;;  %5220 = vmatprep.subr.bf16.mxu0 %v7583_v31  ;;  %v8656_v30 = vcombine.low %v8618_v7, %v8628_v12  ;;  %v7637_v31 = vld [vmem:[#allocation5 + $0x14c4] ss:$16 sps:$4 sm:$0xff]   ;;  %v7641_v12 = vld [vmem:[#allocation5 + $0x14a0] ss:$16 sps:$4 sm:$0xff]  }
 0x161   :  { %5263 = vmatprep.subr.bf16.mxu1 %v7586_v57  ;;  %v7640_v57 = vld [vmem:[#allocation5 + $0x16c4] ss:$16 sps:$4 sm:$0xff]  }
 0x162   :  { %v7646_v7 = vld [vmem:[#allocation5 + $0x16a4] ss:$16 sps:$4 sm:$0xff]  }
 0x163   :  { %5221 = vmatpush2.bf16.msra.mxu0 %v7581_v58  ;;  %v7635_v58 = vld [vmem:[#allocation5 + $0x14c0] ss:$16 sps:$4 sm:$0xff]  }
 0x164   :  { %5264 = vmatpush2.bf16.msra.mxu1 %v7584_v59  ;;  %5222 = vmatprep.subr.bf16.mxu0 %v7589_v60  ;;  %v7638_v59 = vld [vmem:[#allocation5 + $0x16c0] ss:$16 sps:$4 sm:$0xff]   ;;  %v8660_v60 = vcombine.high %v8642_v40, %v8644_v42 }
 0x165   :  { %5265 = vmatprep.subr.bf16.mxu1 %v7592_v61  ;;  %v7644_v61 = vld [vmem:[#allocation5 + $0x16a0] ss:$16 sps:$4 sm:$0xff]  }
 0x167   :  { %5223 = vmatpush2.bf16.msra.mxu0 %v7587_v62  ;;  %v7649_v62 = vld [vmem:[#allocation5 + $0x1484] ss:$16 sps:$4 sm:$0xff]  }
 0x168   :  { %5266 = vmatpush2.bf16.msra.mxu1 %v7590_v63  ;;  %5224 = vmatprep.subr.bf16.mxu0 %v7595_v0  ;;  %v7652_v63 = vld [vmem:[#allocation5 + $0x1684] ss:$16 sps:$4 sm:$0xff]   ;;  %v7647_v0 = vld [vmem:[#allocation5 + $0x1480] ss:$16 sps:$4 sm:$0xff]  }
 0x169   :  { %5267 = vmatprep.subr.bf16.mxu1 %v7598_v1  ;;  %v7650_v1 = vld [vmem:[#allocation5 + $0x1680] ss:$16 sps:$4 sm:$0xff]  }
 0x16b   :  { %5225 = vmatpush2.bf16.msra.mxu0 %v7593_v2  ;;  %v7655_v2 = vld [vmem:[#allocation5 + $0x1464] ss:$16 sps:$4 sm:$0xff]  }
 0x16c   :  { %5268 = vmatpush2.bf16.msra.mxu1 %v7596_v3  ;;  %5226 = vmatprep.subr.bf16.mxu0 %v7601_v5  ;;  %v7658_v3 = vld [vmem:[#allocation5 + $0x1664] ss:$16 sps:$4 sm:$0xff]   ;;  %v7653_v5 = vld [vmem:[#allocation5 + $0x1460] ss:$16 sps:$4 sm:$0xff]  }
 0x16d   :  { %5269 = vmatprep.subr.bf16.mxu1 %v7604_v13  ;;  %v7656_v13 = vld [vmem:[#allocation5 + $0x1660] ss:$16 sps:$4 sm:$0xff]  }
 0x16f   :  { %5227 = vmatpush2.bf16.msra.mxu0 %v7599_v14  ;;  %v7661_v14 = vld [vmem:[#allocation5 + $0x1444] ss:$16 sps:$4 sm:$0xff]  }
 0x170   :  { %5270 = vmatpush2.bf16.msra.mxu1 %v7602_v15  ;;  %5228 = vmatprep.subr.bf16.mxu0 %v7607_v46  ;;  %v7664_v15 = vld [vmem:[#allocation5 + $0x1644] ss:$16 sps:$4 sm:$0xff]   ;;  %v7659_v46 = vld [vmem:[#allocation5 + $0x1440] ss:$16 sps:$4 sm:$0xff]  }
 0x171   :  { %5271 = vmatprep.subr.bf16.mxu1 %v7610_v47  ;;  %v7662_v47 = vld [vmem:[#allocation5 + $0x1640] ss:$16 sps:$4 sm:$0xff]  }
 0x173   :  { %5229 = vmatpush2.bf16.msra.mxu0 %v7605_v50  ;;  %v7667_v50 = vld [vmem:[#allocation5 + $0x1424] ss:$16 sps:$4 sm:$0xff]  }
 0x174   :  { %5272 = vmatpush2.bf16.msra.mxu1 %v7608_v17  ;;  %5230 = vmatprep.subr.bf16.mxu0 %v7613_v18  ;;  %v7670_v17 = vld [vmem:[#allocation5 + $0x1624] ss:$16 sps:$4 sm:$0xff]   ;;  %v7665_v18 = vld [vmem:[#allocation5 + $0x1420] ss:$16 sps:$4 sm:$0xff]  }
 0x175   :  { %5273 = vmatprep.subr.bf16.mxu1 %v7616_v19  ;;  %v7668_v19 = vld [vmem:[#allocation5 + $0x1620] ss:$16 sps:$4 sm:$0xff]  }
 0x177   :  { %5231 = vmatpush2.bf16.msra.mxu0 %v7611_v22  ;;  %v7673_v22 = vld [vmem:[#allocation5 + $0x1404] ss:$16 sps:$4 sm:$0xff]  }
 0x178   :  { %5274 = vmatpush2.bf16.msra.mxu1 %v7614_v23  ;;  %5232 = vmatprep.subr.bf16.mxu0 %v7619_v24  ;;  %v7676_v23 = vld [vmem:[#allocation5 + $0x1604] ss:$16 sps:$4 sm:$0xff]   ;;  %v7671_v24 = vld [vmem:[#allocation5 + $0x1400] ss:$16 sps:$4 sm:$0xff]  }
 0x179   :  { %5275 = vmatprep.subr.bf16.mxu1 %v7622_v25  ;;  %v7674_v25 = vld [vmem:[#allocation5 + $0x1600] ss:$16 sps:$4 sm:$0xff]  }
 0x17b   :  { %5233 = vmatpush2.bf16.msra.mxu0 %v7617_v26  ;;  %v7679_v26 = vld [vmem:[#allocation5 + $0x15e4] ss:$16 sps:$4 sm:$0xff]  }
 0x17c   :  { %5276 = vmatpush2.bf16.msra.mxu1 %v7620_v27  ;;  %5234 = vmatprep.subr.bf16.mxu0 %v7625_v32  ;;  %v7682_v27 = vld [vmem:[#allocation5 + $0x17e4] ss:$16 sps:$4 sm:$0xff]   ;;  %v7677_v32 = vld [vmem:[#allocation5 + $0x15e0] ss:$16 sps:$4 sm:$0xff]  }
 0x17d   :  { %5277 = vmatprep.subr.bf16.mxu1 %v7628_v34  ;;  %v7680_v34 = vld [vmem:[#allocation5 + $0x17e0] ss:$16 sps:$4 sm:$0xff]  }
 0x17f   :  { %5235 = vmatpush2.bf16.msra.mxu0 %v7623_v36  ;;  %v7685_v36 = vld [vmem:[#allocation5 + $0x15c4] ss:$16 sps:$4 sm:$0xff]  }
 0x180   :  { %5278 = vmatpush2.bf16.msra.mxu1 %v7626_v37  ;;  %5290 = vmatprep.subr.bf16.mxu0 %v7631_v38  ;;  %v7688_v37 = vld [vmem:[#allocation5 + $0x17c4] ss:$16 sps:$4 sm:$0xff]   ;;  %v7683_v38 = vld [vmem:[#allocation5 + $0x15c0] ss:$16 sps:$4 sm:$0xff]  }
 0x181   :  { %5333 = vmatprep.subr.bf16.mxu1 %v7634_v39  ;;  %v7686_v39 = vld [vmem:[#allocation5 + $0x17c0] ss:$16 sps:$4 sm:$0xff]  }
 0x182   :  { %5237 = vmatmul.mubr.bf16.vlgmr.msra.gmra.mxu0 %v8652_v29 }
 0x183   :  { %5280 = vmatmul.mubr.bf16.vlgmr.msra.gmra.mxu1 %v8656_v30  ;;  %5291 = vmatpush1.bf16.msra.mxu0 %v7629_v52  ;;  %v7691_v52 = vld [vmem:[#allocation5 + $0x15a4] ss:$16 sps:$4 sm:$0xff]  }
 0x184   :  { %5334 = vmatpush1.bf16.msra.mxu1 %v7632_v54  ;;  %5292 = vmatprep.subr.bf16.mxu0 %v7637_v31  ;;  %v7694_v54 = vld [vmem:[#allocation5 + $0x17a4] ss:$16 sps:$4 sm:$0xff]   ;;  %v7689_v31 = vld [vmem:[#allocation5 + $0x15a0] ss:$16 sps:$4 sm:$0xff]  }
 0x185   :  { %5335 = vmatprep.subr.bf16.mxu1 %v7640_v57  ;;  %5322 = vmatprep.mubr.bf16.mxu0 %v8660_v60  ;;  %v7692_v57 = vld [vmem:[#allocation5 + $0x17a0] ss:$16 sps:$4 sm:$0xff]  }
 0x186   :  { %5365 = vmatprep.mubr.bf16.mxu1 %v8664_v4 }
 0x187   :  { %5293 = vmatpush1.bf16.msra.mxu0 %v7635_v58  ;;  %v7697_v58 = vld [vmem:[#allocation5 + $0x1584] ss:$16 sps:$4 sm:$0xff]  }
 0x188   :  { %5336 = vmatpush1.bf16.msra.mxu1 %v7638_v59  ;;  %5294 = vmatprep.subr.bf16.mxu0 %v7643_v6  ;;  %v7700_v59 = vld [vmem:[#allocation5 + $0x1784] ss:$16 sps:$4 sm:$0xff]   ;;  %v7695_v6 = vld [vmem:[#allocation5 + $0x1580] ss:$16 sps:$4 sm:$0xff]  }
 0x189   :  { %5337 = vmatprep.subr.bf16.mxu1 %v7646_v7  ;;  %v7698_v7 = vld [vmem:[#allocation5 + $0x1780] ss:$16 sps:$4 sm:$0xff]  }
 0x18b   :  { %5295 = vmatpush1.bf16.msra.mxu0 %v7641_v12  ;;  %v7703_v12 = vld [vmem:[#allocation5 + $0x1564] ss:$16 sps:$4 sm:$0xff]  }
 0x18c   :  { %5338 = vmatpush1.bf16.msra.mxu1 %v7644_v61  ;;  %5296 = vmatprep.subr.bf16.mxu0 %v7649_v62  ;;  %v7706_v61 = vld [vmem:[#allocation5 + $0x1764] ss:$16 sps:$4 sm:$0xff]   ;;  %v7701_v62 = vld [vmem:[#allocation5 + $0x1560] ss:$16 sps:$4 sm:$0xff]  }
 0x18d   :  { %5339 = vmatprep.subr.bf16.mxu1 %v7652_v63  ;;  %v7704_v63 = vld [vmem:[#allocation5 + $0x1760] ss:$16 sps:$4 sm:$0xff]  }
 0x18f   :  { %5297 = vmatpush1.bf16.msra.mxu0 %v7647_v0  ;;  %v7709_v0 = vld [vmem:[#allocation5 + $0x1544] ss:$16 sps:$4 sm:$0xff]  }
 0x190   :  { %5340 = vmatpush1.bf16.msra.mxu1 %v7650_v1  ;;  %5298 = vmatprep.subr.bf16.mxu0 %v7655_v2  ;;  %v7712_v1 = vld [vmem:[#allocation5 + $0x1744] ss:$16 sps:$4 sm:$0xff]   ;;  %v7707_v2 = vld [vmem:[#allocation5 + $0x1540] ss:$16 sps:$4 sm:$0xff]  }
 0x191   :  { %5341 = vmatprep.subr.bf16.mxu1 %v7658_v3  ;;  %v7710_v3 = vld [vmem:[#allocation5 + $0x1740] ss:$16 sps:$4 sm:$0xff]  }
 0x193   :  { %5299 = vmatpush1.bf16.msra.mxu0 %v7653_v5  ;;  %v7715_v5 = vld [vmem:[#allocation5 + $0x1524] ss:$16 sps:$4 sm:$0xff]  }
 0x194   :  { %5342 = vmatpush1.bf16.msra.mxu1 %v7656_v13  ;;  %5300 = vmatprep.subr.bf16.mxu0 %v7661_v14  ;;  %v7718_v13 = vld [vmem:[#allocation5 + $0x1724] ss:$16 sps:$4 sm:$0xff]   ;;  %v7713_v14 = vld [vmem:[#allocation5 + $0x1520] ss:$16 sps:$4 sm:$0xff]  }
 0x195   :  { %5343 = vmatprep.subr.bf16.mxu1 %v7664_v15  ;;  %v7716_v15 = vld [vmem:[#allocation5 + $0x1720] ss:$16 sps:$4 sm:$0xff]  }
 0x197   :  { %5301 = vmatpush1.bf16.msra.mxu0 %v7659_v46  ;;  %v7721_v46 = vld [vmem:[#allocation5 + $0x1504] ss:$16 sps:$4 sm:$0xff]  }
 0x198   :  { %5344 = vmatpush1.bf16.msra.mxu1 %v7662_v47  ;;  %5302 = vmatprep.subr.bf16.mxu0 %v7667_v50  ;;  %v7724_v47 = vld [vmem:[#allocation5 + $0x1704] ss:$16 sps:$4 sm:$0xff]   ;;  %v7719_v50 = vld [vmem:[#allocation5 + $0x1500] ss:$16 sps:$4 sm:$0xff]  }
 0x199   :  { %5345 = vmatprep.subr.bf16.mxu1 %v7670_v17  ;;  %v7722_v17 = vld [vmem:[#allocation5 + $0x1700] ss:$16 sps:$4 sm:$0xff]  }
 0x19b   :  { %5303 = vmatpush1.bf16.msra.mxu0 %v7665_v18  ;;  %v7727_v18 = vld [vmem:[#allocation5 + $0xec] ss:$16 sps:$4 sm:$0xff]  }
 0x19c   :  { %5346 = vmatpush1.bf16.msra.mxu1 %v7668_v19  ;;  %5304 = vmatprep.subr.bf16.mxu0 %v7673_v22  ;;  %v7730_v19 = vld [vmem:[#allocation5 + $0x2ec] ss:$16 sps:$4 sm:$0xff]   ;;  %v7725_v22 = vld [vmem:[#allocation5 + $0xe8] ss:$16 sps:$4 sm:$0xff]  }
 0x19d   :  { %5347 = vmatprep.subr.bf16.mxu1 %v7676_v23  ;;  %v7728_v23 = vld [vmem:[#allocation5 + $0x2e8] ss:$16 sps:$4 sm:$0xff]  }
 0x19f   :  { %5305 = vmatpush1.bf16.msra.mxu0 %v7671_v24  ;;  %v8672_v24 = vcombine.low %v8642_v40, %v8644_v42  ;;  %v7739_v40 = vld [vmem:[#allocation5 + $0xac] ss:$16 sps:$4 sm:$0xff]  }
 0x1a0   :  { %5348 = vmatpush1.bf16.msra.mxu1 %v7674_v25  ;;  %5306 = vmatprep.subr.bf16.mxu0 %v7679_v26  ;;  %v8676_v25 = vcombine.low %v8646_v45, %v8648_v51  ;;  %v7733_v26 = vld [vmem:[#allocation5 + $0xcc] ss:$16 sps:$4 sm:$0xff]   ;;  %v7737_v45 = vld [vmem:[#allocation5 + $0xa8] ss:$16 sps:$4 sm:$0xff]  }
 0x1a1   :  { %5349 = vmatprep.subr.bf16.mxu1 %v7682_v27  ;;  %v7736_v27 = vld [vmem:[#allocation5 + $0x2cc] ss:$16 sps:$4 sm:$0xff]   ;;  %v7740_v51 = vld [vmem:[#allocation5 + $0x2a8] ss:$16 sps:$4 sm:$0xff]  }
 0x1a2   :  { %v7742_v42 = vld [vmem:[#allocation5 + $0x2ac] ss:$16 sps:$4 sm:$0xff]  }
 0x1a3   :  { %5307 = vmatpush2.bf16.msra.mxu0 %v7677_v32  ;;  %v7731_v32 = vld [vmem:[#allocation5 + $0xc8] ss:$16 sps:$4 sm:$0xff]  }
 0x1a4   :  { %5350 = vmatpush2.bf16.msra.mxu1 %v7680_v34  ;;  %5308 = vmatprep.subr.bf16.mxu0 %v7685_v36  ;;  %v7734_v34 = vld [vmem:[#allocation5 + $0x2c8] ss:$16 sps:$4 sm:$0xff]   ;;  %v7745_v36 = vld [vmem:[#allocation5 + $0x8c] ss:$16 sps:$4 sm:$0xff]  }
 0x1a5   :  { %5351 = vmatprep.subr.bf16.mxu1 %v7688_v37  ;;  %v7748_v37 = vld [vmem:[#allocation5 + $0x28c] ss:$16 sps:$4 sm:$0xff]  }
 0x1a7   :  { %5309 = vmatpush2.bf16.msra.mxu0 %v7683_v38  ;;  %v7743_v38 = vld [vmem:[#allocation5 + $0x88] ss:$16 sps:$4 sm:$0xff]  }
 0x1a8   :  { %5352 = vmatpush2.bf16.msra.mxu1 %v7686_v39  ;;  %5310 = vmatprep.subr.bf16.mxu0 %v7691_v52  ;;  %v7746_v39 = vld [vmem:[#allocation5 + $0x288] ss:$16 sps:$4 sm:$0xff]   ;;  %v7751_v52 = vld [vmem:[#allocation5 + $0x6c] ss:$16 sps:$4 sm:$0xff]  }
 0x1a9   :  { %5353 = vmatprep.subr.bf16.mxu1 %v7694_v54  ;;  %v7754_v54 = vld [vmem:[#allocation5 + $0x26c] ss:$16 sps:$4 sm:$0xff]  }
 0x1ab   :  { %5311 = vmatpush2.bf16.msra.mxu0 %v7689_v31  ;;  %v7749_v31 = vld [vmem:[#allocation5 + $0x68] ss:$16 sps:$4 sm:$0xff]  }
 0x1ac   :  { %5354 = vmatpush2.bf16.msra.mxu1 %v7692_v57  ;;  %5312 = vmatprep.subr.bf16.mxu0 %v7697_v58  ;;  %v7760_v57 = vld [vmem:[#allocation5 + $0x24c] ss:$16 sps:$4 sm:$0xff]   ;;  %v7755_v58 = vld [vmem:[#allocation5 + $0x48] ss:$16 sps:$4 sm:$0xff]  }
 0x1ad   :  { %5355 = vmatprep.subr.bf16.mxu1 %v7700_v59  ;;  %v7758_v59 = vld [vmem:[#allocation5 + $0x248] ss:$16 sps:$4 sm:$0xff]  }
 0x1af   :  { %5313 = vmatpush2.bf16.msra.mxu0 %v7695_v6  ;;  %v7763_v6 = vld [vmem:[#allocation5 + $0x2c] ss:$16 sps:$4 sm:$0xff]  }
 0x1b0   :  { %5356 = vmatpush2.bf16.msra.mxu1 %v7698_v7  ;;  %5314 = vmatprep.subr.bf16.mxu0 %v7703_v12  ;;  %v7766_v7 = vld [vmem:[#allocation5 + $0x22c] ss:$16 sps:$4 sm:$0xff]   ;;  %v7761_v12 = vld [vmem:[#allocation5 + $0x28] ss:$16 sps:$4 sm:$0xff]  }
 0x1b1   :  { %5357 = vmatprep.subr.bf16.mxu1 %v7706_v61  ;;  %v7764_v61 = vld [vmem:[#allocation5 + $0x228] ss:$16 sps:$4 sm:$0xff]  }
 0x1b3   :  { %5315 = vmatpush2.bf16.msra.mxu0 %v7701_v62  ;;  %v7769_v62 = vld [vmem:[#allocation5 + $0xc] ss:$16 sps:$4 sm:$0xff]  }
 0x1b4   :  { %5358 = vmatpush2.bf16.msra.mxu1 %v7704_v63  ;;  %5316 = vmatprep.subr.bf16.mxu0 %v7709_v0  ;;  %v7772_v63 = vld [vmem:[#allocation5 + $0x20c] ss:$16 sps:$4 sm:$0xff]   ;;  %v7767_v0 = vld [vmem:[#allocation5 + $0x8] ss:$16 sps:$4 sm:$0xff]  }
 0x1b5   :  { %5359 = vmatprep.subr.bf16.mxu1 %v7712_v1  ;;  %v7770_v1 = vld [vmem:[#allocation5 + $0x208] ss:$16 sps:$4 sm:$0xff]  }
 0x1b7   :  { %5317 = vmatpush2.bf16.msra.mxu0 %v7707_v2  ;;  %v7775_v2 = vld [vmem:[#allocation5 + $0x1ec] ss:$16 sps:$4 sm:$0xff]  }
 0x1b8   :  { %5360 = vmatpush2.bf16.msra.mxu1 %v7710_v3  ;;  %5318 = vmatprep.subr.bf16.mxu0 %v7715_v5  ;;  %v7778_v3 = vld [vmem:[#allocation5 + $0x3ec] ss:$16 sps:$4 sm:$0xff]   ;;  %v7773_v5 = vld [vmem:[#allocation5 + $0x1e8] ss:$16 sps:$4 sm:$0xff]  }
 0x1b9   :  { %5361 = vmatprep.subr.bf16.mxu1 %v7718_v13  ;;  %v7776_v13 = vld [vmem:[#allocation5 + $0x3e8] ss:$16 sps:$4 sm:$0xff]  }
 0x1bb   :  { %5319 = vmatpush2.bf16.msra.mxu0 %v7713_v14  ;;  %v7781_v14 = vld [vmem:[#allocation5 + $0x1cc] ss:$16 sps:$4 sm:$0xff]  }
 0x1bc   :  { %5362 = vmatpush2.bf16.msra.mxu1 %v7716_v15  ;;  %5320 = vmatprep.subr.bf16.mxu0 %v7721_v46  ;;  %v7784_v15 = vld [vmem:[#allocation5 + $0x3cc] ss:$16 sps:$4 sm:$0xff]   ;;  %v7779_v46 = vld [vmem:[#allocation5 + $0x1c8] ss:$16 sps:$4 sm:$0xff]  }
 0x1bd   :  { %5363 = vmatprep.subr.bf16.mxu1 %v7724_v47  ;;  %v7782_v47 = vld [vmem:[#allocation5 + $0x3c8] ss:$16 sps:$4 sm:$0xff]  }
 0x1bf   :  { %5321 = vmatpush2.bf16.msra.mxu0 %v7719_v50  ;;  %v7787_v50 = vld [vmem:[#allocation5 + $0x1ac] ss:$16 sps:$4 sm:$0xff]  }
 0x1c0   :  { %5364 = vmatpush2.bf16.msra.mxu1 %v7722_v17  ;;  %5376 = vmatprep.subr.bf16.mxu0 %v7727_v18  ;;  %v7790_v17 = vld [vmem:[#allocation5 + $0x3ac] ss:$16 sps:$4 sm:$0xff]   ;;  %v7785_v18 = vld [vmem:[#allocation5 + $0x1a8] ss:$16 sps:$4 sm:$0xff]  }
 0x1c1   :  { %5419 = vmatprep.subr.bf16.mxu1 %v7730_v19  ;;  %v7788_v19 = vld [vmem:[#allocation5 + $0x3a8] ss:$16 sps:$4 sm:$0xff]  }
 0x1c2   :  { %5323 = vmatmul.mubr.bf16.vlgmr.msra.gmra.mxu0 %v8672_v24 }
 0x1c3   :  { %5366 = vmatmul.mubr.bf16.vlgmr.msra.gmra.mxu1 %v8676_v25  ;;  %5377 = vmatpush1.bf16.msra.mxu0 %v7725_v22  ;;  %v7793_v22 = vld [vmem:[#allocation5 + $0x18c] ss:$16 sps:$4 sm:$0xff]  }
 0x1c4   :  { %5420 = vmatpush1.bf16.msra.mxu1 %v7728_v23  ;;  %5378 = vmatprep.subr.bf16.mxu0 %v7733_v26  ;;  %v7796_v23 = vld [vmem:[#allocation5 + $0x38c] ss:$16 sps:$4 sm:$0xff]   ;;  %v7791_v26 = vld [vmem:[#allocation5 + $0x188] ss:$16 sps:$4 sm:$0xff]  }
 0x1c5   :  { %5421 = vmatprep.subr.bf16.mxu1 %v7736_v27  ;;  %5408 = vmatprep.mubr.bf16.mxu0 %v8528_v53  ;;  %v7752_v53 = vld [vmem:[#allocation5 + $0x268] ss:$16 sps:$4 sm:$0xff]  }
 0x1c6   :  { %5451 = vmatprep.mubr.bf16.mxu1 %v8530_v55  ;;  %v7757_v55 = vld [vmem:[#allocation5 + $0x4c] ss:$16 sps:$4 sm:$0xff]   ;;  %v7794_v27 = vld [vmem:[#allocation5 + $0x388] ss:$16 sps:$4 sm:$0xff]  }
 0x1c7   :  { %5379 = vmatpush1.bf16.msra.mxu0 %v7731_v32  ;;  %v7799_v32 = vld [vmem:[#allocation5 + $0x16c] ss:$16 sps:$4 sm:$0xff]  }
 0x1c8   :  { %5422 = vmatpush1.bf16.msra.mxu1 %v7734_v34  ;;  %5380 = vmatprep.subr.bf16.mxu0 %v7739_v40  ;;  %v7802_v34 = vld [vmem:[#allocation5 + $0x36c] ss:$16 sps:$4 sm:$0xff]   ;;  %v7797_v40 = vld [vmem:[#allocation5 + $0x168] ss:$16 sps:$4 sm:$0xff]  }
 0x1c9   :  { %5423 = vmatprep.subr.bf16.mxu1 %v7742_v42  ;;  %v7800_v42 = vld [vmem:[#allocation5 + $0x368] ss:$16 sps:$4 sm:$0xff]  }
 0x1cb   :  { %5381 = vmatpush1.bf16.msra.mxu0 %v7737_v45  ;;  %v7805_v45 = vld [vmem:[#allocation5 + $0x14c] ss:$16 sps:$4 sm:$0xff]  }
 0x1cc   :  { %5424 = vmatpush1.bf16.msra.mxu1 %v7740_v51  ;;  %5382 = vmatprep.subr.bf16.mxu0 %v7745_v36  ;;  %v7808_v51 = vld [vmem:[#allocation5 + $0x34c] ss:$16 sps:$4 sm:$0xff]   ;;  %v7803_v36 = vld [vmem:[#allocation5 + $0x148] ss:$16 sps:$4 sm:$0xff]  }
 0x1cd   :  { %5425 = vmatprep.subr.bf16.mxu1 %v7748_v37  ;;  %v7806_v37 = vld [vmem:[#allocation5 + $0x348] ss:$16 sps:$4 sm:$0xff]  }
 0x1cf   :  { %5383 = vmatpush1.bf16.msra.mxu0 %v7743_v38  ;;  %v7811_v38 = vld [vmem:[#allocation5 + $0x12c] ss:$16 sps:$4 sm:$0xff]  }
 0x1d0   :  { %5426 = vmatpush1.bf16.msra.mxu1 %v7746_v39  ;;  %5384 = vmatprep.subr.bf16.mxu0 %v7751_v52  ;;  %v7814_v39 = vld [vmem:[#allocation5 + $0x32c] ss:$16 sps:$4 sm:$0xff]   ;;  %v7809_v52 = vld [vmem:[#allocation5 + $0x128] ss:$16 sps:$4 sm:$0xff]  }
 0x1d1   :  { %5427 = vmatprep.subr.bf16.mxu1 %v7754_v54  ;;  %v7812_v54 = vld [vmem:[#allocation5 + $0x328] ss:$16 sps:$4 sm:$0xff]  }
 0x1d3   :  { %5385 = vmatpush1.bf16.msra.mxu0 %v7749_v31  ;;  %v7817_v31 = vld [vmem:[#allocation5 + $0x10c] ss:$16 sps:$4 sm:$0xff]  }
 0x1d4   :  { %5428 = vmatpush1.bf16.msra.mxu1 %v7752_v53  ;;  %5386 = vmatprep.subr.bf16.mxu0 %v7757_v55  ;;  %v7820_v53 = vld [vmem:[#allocation5 + $0x30c] ss:$16 sps:$4 sm:$0xff]   ;;  %v7815_v55 = vld [vmem:[#allocation5 + $0x108] ss:$16 sps:$4 sm:$0xff]  }
 0x1d5   :  { %5429 = vmatprep.subr.bf16.mxu1 %v7760_v57  ;;  %v7818_v57 = vld [vmem:[#allocation5 + $0x308] ss:$16 sps:$4 sm:$0xff]  }
 0x1d7   :  { %5387 = vmatpush1.bf16.msra.mxu0 %v7755_v58  ;;  %v7823_v58 = vld [vmem:[#allocation5 + $0x4ec] ss:$16 sps:$4 sm:$0xff]  }
 0x1d8   :  { %5430 = vmatpush1.bf16.msra.mxu1 %v7758_v59  ;;  %5388 = vmatprep.subr.bf16.mxu0 %v7763_v6  ;;  %v7826_v59 = vld [vmem:[#allocation5 + $0x6ec] ss:$16 sps:$4 sm:$0xff]   ;;  %v7821_v6 = vld [vmem:[#allocation5 + $0x4e8] ss:$16 sps:$4 sm:$0xff]  }
 0x1d9   :  { %5431 = vmatprep.subr.bf16.mxu1 %v7766_v7  ;;  %v7824_v7 = vld [vmem:[#allocation5 + $0x6e8] ss:$16 sps:$4 sm:$0xff]  }
 0x1db   :  { %5389 = vmatpush1.bf16.msra.mxu0 %v7761_v12  ;;  %v7829_v12 = vld [vmem:[#allocation5 + $0x4cc] ss:$16 sps:$4 sm:$0xff]  }
 0x1dc   :  { %5432 = vmatpush1.bf16.msra.mxu1 %v7764_v61  ;;  %5390 = vmatprep.subr.bf16.mxu0 %v7769_v62  ;;  %v7832_v61 = vld [vmem:[#allocation5 + $0x6cc] ss:$16 sps:$4 sm:$0xff]   ;;  %v7827_v62 = vld [vmem:[#allocation5 + $0x4c8] ss:$16 sps:$4 sm:$0xff]  }
 0x1dd   :  { %5433 = vmatprep.subr.bf16.mxu1 %v7772_v63  ;;  %v7830_v63 = vld [vmem:[#allocation5 + $0x6c8] ss:$16 sps:$4 sm:$0xff]  }
 0x1df   :  { %5391 = vmatpush1.bf16.msra.mxu0 %v7767_v0  ;;  %v7835_v0 = vld [vmem:[#allocation5 + $0x4ac] ss:$16 sps:$4 sm:$0xff]  }
 0x1e0   :  { %5434 = vmatpush1.bf16.msra.mxu1 %v7770_v1  ;;  %5392 = vmatprep.subr.bf16.mxu0 %v7775_v2  ;;  %v7838_v1 = vld [vmem:[#allocation5 + $0x6ac] ss:$16 sps:$4 sm:$0xff]   ;;  %v7833_v2 = vld [vmem:[#allocation5 + $0x4a8] ss:$16 sps:$4 sm:$0xff]  }
 0x1e1   :  { %5435 = vmatprep.subr.bf16.mxu1 %v7778_v3  ;;  %v7836_v3 = vld [vmem:[#allocation5 + $0x6a8] ss:$16 sps:$4 sm:$0xff]  }
 0x1e3   :  { %5393 = vmatpush2.bf16.msra.mxu0 %v7773_v5  ;;  %v7841_v5 = vld [vmem:[#allocation5 + $0x48c] ss:$16 sps:$4 sm:$0xff]  }
 0x1e4   :  { %5436 = vmatpush2.bf16.msra.mxu1 %v7776_v13  ;;  %5394 = vmatprep.subr.bf16.mxu0 %v7781_v14  ;;  %v7839_v13 = vld [vmem:[#allocation5 + $0x488] ss:$16 sps:$4 sm:$0xff]   ;;  %v7847_v14 = vld [vmem:[#allocation5 + $0x46c] ss:$16 sps:$4 sm:$0xff]  }
 0x1e5   :  { %5437 = vmatprep.subr.bf16.mxu1 %v7784_v15  ;;  %v7850_v15 = vld [vmem:[#allocation5 + $0x66c] ss:$16 sps:$4 sm:$0xff]  }
 0x1e7   :  { %5395 = vmatpush2.bf16.msra.mxu0 %v7779_v46  ;;  %v7845_v46 = vld [vmem:[#allocation5 + $0x468] ss:$16 sps:$4 sm:$0xff]  }
 0x1e8   :  { %5438 = vmatpush2.bf16.msra.mxu1 %v7782_v47  ;;  %5396 = vmatprep.subr.bf16.mxu0 %v7787_v50  ;;  %v7856_v47 = vld [vmem:[#allocation5 + $0x64c] ss:$16 sps:$4 sm:$0xff]   ;;  %v7851_v50 = vld [vmem:[#allocation5 + $0x448] ss:$16 sps:$4 sm:$0xff]  }
 0x1e9   :  { %5439 = vmatprep.subr.bf16.mxu1 %v7790_v17  ;;  %v7854_v17 = vld [vmem:[#allocation5 + $0x648] ss:$16 sps:$4 sm:$0xff]  }
 0x1eb   :  { %5397 = vmatpush2.bf16.msra.mxu0 %v7785_v18  ;;  %v7859_v18 = vld [vmem:[#allocation5 + $0x42c] ss:$16 sps:$4 sm:$0xff]  }
 0x1ec   :  { %5440 = vmatpush2.bf16.msra.mxu1 %v7788_v19  ;;  %5398 = vmatprep.subr.bf16.mxu0 %v7793_v22  ;;  %v7862_v19 = vld [vmem:[#allocation5 + $0x62c] ss:$16 sps:$4 sm:$0xff]   ;;  %v7857_v22 = vld [vmem:[#allocation5 + $0x428] ss:$16 sps:$4 sm:$0xff]  }
 0x1ed   :  { %5441 = vmatprep.subr.bf16.mxu1 %v7796_v23  ;;  %v7860_v23 = vld [vmem:[#allocation5 + $0x628] ss:$16 sps:$4 sm:$0xff]  }
 0x1ef   :  { %5399 = vmatpush2.bf16.msra.mxu0 %v7791_v26  ;;  %v7865_v26 = vld [vmem:[#allocation5 + $0x40c] ss:$16 sps:$4 sm:$0xff]  }
 0x1f0   :  { %5442 = vmatpush2.bf16.msra.mxu1 %v7794_v27  ;;  %5400 = vmatprep.subr.bf16.mxu0 %v7799_v32  ;;  %v7868_v27 = vld [vmem:[#allocation5 + $0x60c] ss:$16 sps:$4 sm:$0xff]   ;;  %v7863_v32 = vld [vmem:[#allocation5 + $0x408] ss:$16 sps:$4 sm:$0xff]  }
 0x1f1   :  { %5443 = vmatprep.subr.bf16.mxu1 %v7802_v34  ;;  %v7866_v34 = vld [vmem:[#allocation5 + $0x608] ss:$16 sps:$4 sm:$0xff]  }
 0x1f3   :  { %5401 = vmatpush2.bf16.msra.mxu0 %v7797_v40  ;;  %v7871_v40 = vld [vmem:[#allocation5 + $0x5ec] ss:$16 sps:$4 sm:$0xff]  }
 0x1f4   :  { %5444 = vmatpush2.bf16.msra.mxu1 %v7800_v42  ;;  %5402 = vmatprep.subr.bf16.mxu0 %v7805_v45  ;;  %v7874_v42 = vld [vmem:[#allocation5 + $0x7ec] ss:$16 sps:$4 sm:$0xff]   ;;  %v7869_v45 = vld [vmem:[#allocation5 + $0x5e8] ss:$16 sps:$4 sm:$0xff]  }
 0x1f5   :  { %5445 = vmatprep.subr.bf16.mxu1 %v7808_v51  ;;  %v7872_v51 = vld [vmem:[#allocation5 + $0x7e8] ss:$16 sps:$4 sm:$0xff]  }
 0x1f7   :  { %5403 = vmatpush2.bf16.msra.mxu0 %v7803_v36  ;;  %v7877_v36 = vld [vmem:[#allocation5 + $0x5cc] ss:$16 sps:$4 sm:$0xff]  }
 0x1f8   :  { %5446 = vmatpush2.bf16.msra.mxu1 %v7806_v37  ;;  %5404 = vmatprep.subr.bf16.mxu0 %v7811_v38  ;;  %v7880_v37 = vld [vmem:[#allocation5 + $0x7cc] ss:$16 sps:$4 sm:$0xff]   ;;  %v7875_v38 = vld [vmem:[#allocation5 + $0x5c8] ss:$16 sps:$4 sm:$0xff]  }
 0x1f9   :  { %5447 = vmatprep.subr.bf16.mxu1 %v7814_v39  ;;  %v7878_v39 = vld [vmem:[#allocation5 + $0x7c8] ss:$16 sps:$4 sm:$0xff]  }
 0x1fb   :  { %5405 = vmatpush2.bf16.msra.mxu0 %v7809_v52  ;;  %v7883_v52 = vld [vmem:[#allocation5 + $0x5ac] ss:$16 sps:$4 sm:$0xff]  }
 0x1fc   :  { %5448 = vmatpush2.bf16.msra.mxu1 %v7812_v54  ;;  %5406 = vmatprep.subr.bf16.mxu0 %v7817_v31  ;;  %v7886_v54 = vld [vmem:[#allocation5 + $0x7ac] ss:$16 sps:$4 sm:$0xff]   ;;  %v7881_v31 = vld [vmem:[#allocation5 + $0x5a8] ss:$16 sps:$4 sm:$0xff]  }
 0x1fd   :  { %5449 = vmatprep.subr.bf16.mxu1 %v7820_v53  ;;  %v7884_v53 = vld [vmem:[#allocation5 + $0x7a8] ss:$16 sps:$4 sm:$0xff]  }
 0x1ff   :  { %5407 = vmatpush2.bf16.msra.mxu0 %v7815_v55  ;;  %v7889_v55 = vld [vmem:[#allocation5 + $0x58c] ss:$16 sps:$4 sm:$0xff]  }
 0x200   :  { %5450 = vmatpush2.bf16.msra.mxu1 %v7818_v57  ;;  %5462 = vmatprep.subr.bf16.mxu0 %v7823_v58  ;;  %v7892_v57 = vld [vmem:[#allocation5 + $0x78c] ss:$16 sps:$4 sm:$0xff]   ;;  %v7887_v58 = vld [vmem:[#allocation5 + $0x588] ss:$16 sps:$4 sm:$0xff]  }
 0x201   :  { %5505 = vmatprep.subr.bf16.mxu1 %v7826_v59  ;;  %v7890_v59 = vld [vmem:[#allocation5 + $0x788] ss:$16 sps:$4 sm:$0xff]  }
 0x202   :  { %5409 = vmatmul.mubr.bf16.vlgmr.msra.gmra.mxu0 %v8534_v8  ;;  %v7844_v8 = vld [vmem:[#allocation5 + $0x68c] ss:$16 sps:$4 sm:$0xff]  }
 0x203   :  { %5452 = vmatmul.mubr.bf16.vlgmr.msra.gmra.mxu1 %v8536_v9  ;;  %5463 = vmatpush1.bf16.msra.mxu0 %v7821_v6  ;;  %v7842_v9 = vld [vmem:[#allocation5 + $0x688] ss:$16 sps:$4 sm:$0xff]   ;;  %v7895_v6 = vld [vmem:[#allocation5 + $0x56c] ss:$16 sps:$4 sm:$0xff]  }
 0x204   :  { %5506 = vmatpush1.bf16.msra.mxu1 %v7824_v7  ;;  %5464 = vmatprep.subr.bf16.mxu0 %v7829_v12  ;;  %v7898_v7 = vld [vmem:[#allocation5 + $0x76c] ss:$16 sps:$4 sm:$0xff]   ;;  %v7893_v12 = vld [vmem:[#allocation5 + $0x568] ss:$16 sps:$4 sm:$0xff]  }
 0x205   :  { %5507 = vmatprep.subr.bf16.mxu1 %v7832_v61  ;;  %5494 = vmatprep.mubr.bf16.mxu0 %v8550_v41  ;;  %v7848_v41 = vld [vmem:[#allocation5 + $0x668] ss:$16 sps:$4 sm:$0xff]  }
 0x206   :  { %5537 = vmatprep.mubr.bf16.mxu1 %v8554_v43  ;;  %v7853_v43 = vld [vmem:[#allocation5 + $0x44c] ss:$16 sps:$4 sm:$0xff]   ;;  %v7896_v61 = vld [vmem:[#allocation5 + $0x768] ss:$16 sps:$4 sm:$0xff]  }
 0x207   :  { %5465 = vmatpush1.bf16.msra.mxu0 %v7827_v62  ;;  %v7901_v62 = vld [vmem:[#allocation5 + $0x54c] ss:$16 sps:$4 sm:$0xff]  }
 0x208   :  { %5508 = vmatpush1.bf16.msra.mxu1 %v7830_v63  ;;  %5466 = vmatprep.subr.bf16.mxu0 %v7835_v0  ;;  %v7904_v63 = vld [vmem:[#allocation5 + $0x74c] ss:$16 sps:$4 sm:$0xff]   ;;  %v7899_v0 = vld [vmem:[#allocation5 + $0x548] ss:$16 sps:$4 sm:$0xff]  }
 0x209   :  { %5509 = vmatprep.subr.bf16.mxu1 %v7838_v1  ;;  %v7902_v1 = vld [vmem:[#allocation5 + $0x748] ss:$16 sps:$4 sm:$0xff]  }
 0x20b   :  { %5467 = vmatpush1.bf16.msra.mxu0 %v7833_v2  ;;  %v7907_v2 = vld [vmem:[#allocation5 + $0x52c] ss:$16 sps:$4 sm:$0xff]  }
 0x20c   :  { %5510 = vmatpush1.bf16.msra.mxu1 %v7836_v3  ;;  %5468 = vmatprep.subr.bf16.mxu0 %v7841_v5  ;;  %v7910_v3 = vld [vmem:[#allocation5 + $0x72c] ss:$16 sps:$4 sm:$0xff]   ;;  %v7905_v5 = vld [vmem:[#allocation5 + $0x528] ss:$16 sps:$4 sm:$0xff]  }
 0x20d   :  { %5511 = vmatprep.subr.bf16.mxu1 %v7844_v8  ;;  %v7908_v8 = vld [vmem:[#allocation5 + $0x728] ss:$16 sps:$4 sm:$0xff]  }
 0x20f   :  { %5469 = vmatpush1.bf16.msra.mxu0 %v7839_v13  ;;  %v7913_v13 = vld [vmem:[#allocation5 + $0x50c] ss:$16 sps:$4 sm:$0xff]  }
 0x210   :  { %5512 = vmatpush1.bf16.msra.mxu1 %v7842_v9  ;;  %5470 = vmatprep.subr.bf16.mxu0 %v7847_v14  ;;  %v7916_v9 = vld [vmem:[#allocation5 + $0x70c] ss:$16 sps:$4 sm:$0xff]   ;;  %v7911_v14 = vld [vmem:[#allocation5 + $0x508] ss:$16 sps:$4 sm:$0xff]  }
 0x211   :  { %5513 = vmatprep.subr.bf16.mxu1 %v7850_v15  ;;  %v7914_v15 = vld [vmem:[#allocation5 + $0x708] ss:$16 sps:$4 sm:$0xff]  }
 0x213   :  { %5471 = vmatpush1.bf16.msra.mxu0 %v7845_v46  ;;  %v7919_v46 = vld [vmem:[#allocation5 + $0x8ec] ss:$16 sps:$4 sm:$0xff]  }
 0x214   :  { %5514 = vmatpush1.bf16.msra.mxu1 %v7848_v41  ;;  %5472 = vmatprep.subr.bf16.mxu0 %v7853_v43  ;;  %v7922_v41 = vld [vmem:[#allocation5 + $0xaec] ss:$16 sps:$4 sm:$0xff]   ;;  %v7917_v43 = vld [vmem:[#allocation5 + $0x8e8] ss:$16 sps:$4 sm:$0xff]  }
 0x215   :  { %5515 = vmatprep.subr.bf16.mxu1 %v7856_v47  ;;  %v7920_v47 = vld [vmem:[#allocation5 + $0xae8] ss:$16 sps:$4 sm:$0xff]  }
 0x217   :  { %5473 = vmatpush1.bf16.msra.mxu0 %v7851_v50  ;;  %v7925_v50 = vld [vmem:[#allocation5 + $0x8cc] ss:$16 sps:$4 sm:$0xff]  }
 0x218   :  { %5516 = vmatpush1.bf16.msra.mxu1 %v7854_v17  ;;  %5474 = vmatprep.subr.bf16.mxu0 %v7859_v18  ;;  %v7928_v17 = vld [vmem:[#allocation5 + $0xacc] ss:$16 sps:$4 sm:$0xff]   ;;  %v7923_v18 = vld [vmem:[#allocation5 + $0x8c8] ss:$16 sps:$4 sm:$0xff]  }
 0x219   :  { %5517 = vmatprep.subr.bf16.mxu1 %v7862_v19  ;;  %v7926_v19 = vld [vmem:[#allocation5 + $0xac8] ss:$16 sps:$4 sm:$0xff]  }
 0x21b   :  { %5475 = vmatpush1.bf16.msra.mxu0 %v7857_v22  ;;  %v7931_v22 = vld [vmem:[#allocation5 + $0x8ac] ss:$16 sps:$4 sm:$0xff]  }
 0x21c   :  { %5518 = vmatpush1.bf16.msra.mxu1 %v7860_v23  ;;  %5476 = vmatprep.subr.bf16.mxu0 %v7865_v26  ;;  %v7934_v23 = vld [vmem:[#allocation5 + $0xaac] ss:$16 sps:$4 sm:$0xff]   ;;  %v7929_v26 = vld [vmem:[#allocation5 + $0x8a8] ss:$16 sps:$4 sm:$0xff]  }
 0x21d   :  { %5519 = vmatprep.subr.bf16.mxu1 %v7868_v27  ;;  %v7932_v27 = vld [vmem:[#allocation5 + $0xaa8] ss:$16 sps:$4 sm:$0xff]  }
 0x21f   :  { %5477 = vmatpush1.bf16.msra.mxu0 %v7863_v32  ;;  %v7935_v32 = vld [vmem:[#allocation5 + $0x888] ss:$16 sps:$4 sm:$0xff]  }
 0x220   :  { %5520 = vmatpush1.bf16.msra.mxu1 %v7866_v34  ;;  %5478 = vmatprep.subr.bf16.mxu0 %v7871_v40  ;;  %v7938_v34 = vld [vmem:[#allocation5 + $0xa88] ss:$16 sps:$4 sm:$0xff]   ;;  %v7943_v40 = vld [vmem:[#allocation5 + $0x86c] ss:$16 sps:$4 sm:$0xff]  }
 0x221   :  { %5521 = vmatprep.subr.bf16.mxu1 %v7874_v42  ;;  %v7946_v42 = vld [vmem:[#allocation5 + $0xa6c] ss:$16 sps:$4 sm:$0xff]  }
 0x223   :  { %5479 = vmatpush2.bf16.msra.mxu0 %v7869_v45  ;;  %v7949_v45 = vld [vmem:[#allocation5 + $0x84c] ss:$16 sps:$4 sm:$0xff]  }
 0x224   :  { %5522 = vmatpush2.bf16.msra.mxu1 %v7872_v51  ;;  %5480 = vmatprep.subr.bf16.mxu0 %v7877_v36  ;;  %v7952_v51 = vld [vmem:[#allocation5 + $0xa4c] ss:$16 sps:$4 sm:$0xff]   ;;  %v7947_v36 = vld [vmem:[#allocation5 + $0x848] ss:$16 sps:$4 sm:$0xff]  }
 0x225   :  { %5523 = vmatprep.subr.bf16.mxu1 %v7880_v37  ;;  %v7950_v37 = vld [vmem:[#allocation5 + $0xa48] ss:$16 sps:$4 sm:$0xff]  }
 0x227   :  { %5481 = vmatpush2.bf16.msra.mxu0 %v7875_v38  ;;  %v7955_v38 = vld [vmem:[#allocation5 + $0x82c] ss:$16 sps:$4 sm:$0xff]  }
 0x228   :  { %5524 = vmatpush2.bf16.msra.mxu1 %v7878_v39  ;;  %5482 = vmatprep.subr.bf16.mxu0 %v7883_v52  ;;  %v7958_v39 = vld [vmem:[#allocation5 + $0xa2c] ss:$16 sps:$4 sm:$0xff]   ;;  %v7953_v52 = vld [vmem:[#allocation5 + $0x828] ss:$16 sps:$4 sm:$0xff]  }
 0x229   :  { %5525 = vmatprep.subr.bf16.mxu1 %v7886_v54  ;;  %v7956_v54 = vld [vmem:[#allocation5 + $0xa28] ss:$16 sps:$4 sm:$0xff]  }
 0x22b   :  { %5483 = vmatpush2.bf16.msra.mxu0 %v7881_v31  ;;  %v7961_v31 = vld [vmem:[#allocation5 + $0x80c] ss:$16 sps:$4 sm:$0xff]  }
 0x22c   :  { %5526 = vmatpush2.bf16.msra.mxu1 %v7884_v53  ;;  %5484 = vmatprep.subr.bf16.mxu0 %v7889_v55  ;;  %v7964_v53 = vld [vmem:[#allocation5 + $0xa0c] ss:$16 sps:$4 sm:$0xff]   ;;  %v7959_v55 = vld [vmem:[#allocation5 + $0x808] ss:$16 sps:$4 sm:$0xff]  }
 0x22d   :  { %5527 = vmatprep.subr.bf16.mxu1 %v7892_v57  ;;  %v7962_v57 = vld [vmem:[#allocation5 + $0xa08] ss:$16 sps:$4 sm:$0xff]  }
 0x22f   :  { %5485 = vmatpush2.bf16.msra.mxu0 %v7887_v58  ;;  %v7967_v58 = vld [vmem:[#allocation5 + $0x9ec] ss:$16 sps:$4 sm:$0xff]  }
 0x230   :  { %5528 = vmatpush2.bf16.msra.mxu1 %v7890_v59  ;;  %5486 = vmatprep.subr.bf16.mxu0 %v7895_v6  ;;  %v7970_v59 = vld [vmem:[#allocation5 + $0xbec] ss:$16 sps:$4 sm:$0xff]   ;;  %v7965_v6 = vld [vmem:[#allocation5 + $0x9e8] ss:$16 sps:$4 sm:$0xff]  }
 0x231   :  { %5529 = vmatprep.subr.bf16.mxu1 %v7898_v7  ;;  %v7968_v7 = vld [vmem:[#allocation5 + $0xbe8] ss:$16 sps:$4 sm:$0xff]  }
 0x233   :  { %5487 = vmatpush2.bf16.msra.mxu0 %v7893_v12  ;;  %v7973_v12 = vld [vmem:[#allocation5 + $0x9cc] ss:$16 sps:$4 sm:$0xff]  }
 0x234   :  { %5530 = vmatpush2.bf16.msra.mxu1 %v7896_v61  ;;  %5488 = vmatprep.subr.bf16.mxu0 %v7901_v62  ;;  %v7976_v61 = vld [vmem:[#allocation5 + $0xbcc] ss:$16 sps:$4 sm:$0xff]   ;;  %v7971_v62 = vld [vmem:[#allocation5 + $0x9c8] ss:$16 sps:$4 sm:$0xff]  }
 0x235   :  { %5531 = vmatprep.subr.bf16.mxu1 %v7904_v63  ;;  %v7974_v63 = vld [vmem:[#allocation5 + $0xbc8] ss:$16 sps:$4 sm:$0xff]  }
 0x237   :  { %5489 = vmatpush2.bf16.msra.mxu0 %v7899_v0  ;;  %v7979_v0 = vld [vmem:[#allocation5 + $0x9ac] ss:$16 sps:$4 sm:$0xff]  }
 0x238   :  { %5532 = vmatpush2.bf16.msra.mxu1 %v7902_v1  ;;  %5490 = vmatprep.subr.bf16.mxu0 %v7907_v2  ;;  %v7982_v1 = vld [vmem:[#allocation5 + $0xbac] ss:$16 sps:$4 sm:$0xff]   ;;  %v7977_v2 = vld [vmem:[#allocation5 + $0x9a8] ss:$16 sps:$4 sm:$0xff]  }
 0x239   :  { %5533 = vmatprep.subr.bf16.mxu1 %v7910_v3  ;;  %v7980_v3 = vld [vmem:[#allocation5 + $0xba8] ss:$16 sps:$4 sm:$0xff]  }
 0x23b   :  { %5491 = vmatpush2.bf16.msra.mxu0 %v7905_v5  ;;  %v7985_v5 = vld [vmem:[#allocation5 + $0x98c] ss:$16 sps:$4 sm:$0xff]  }
 0x23c   :  { %5534 = vmatpush2.bf16.msra.mxu1 %v7908_v8  ;;  %5492 = vmatprep.subr.bf16.mxu0 %v7913_v13  ;;  %v7988_v8 = vld [vmem:[#allocation5 + $0xb8c] ss:$16 sps:$4 sm:$0xff]   ;;  %v7983_v13 = vld [vmem:[#allocation5 + $0x988] ss:$16 sps:$4 sm:$0xff]  }
 0x23d   :  { %5535 = vmatprep.subr.bf16.mxu1 %v7916_v9  ;;  %v7986_v9 = vld [vmem:[#allocation5 + $0xb88] ss:$16 sps:$4 sm:$0xff]  }
 0x23f   :  { %5493 = vmatpush2.bf16.msra.mxu0 %v7911_v14  ;;  %v7991_v14 = vld [vmem:[#allocation5 + $0x96c] ss:$16 sps:$4 sm:$0xff]  }
 0x240   :  { %5536 = vmatpush2.bf16.msra.mxu1 %v7914_v15  ;;  %5548 = vmatprep.subr.bf16.mxu0 %v7919_v46  ;;  %v7994_v15 = vld [vmem:[#allocation5 + $0xb6c] ss:$16 sps:$4 sm:$0xff]   ;;  %v7989_v46 = vld [vmem:[#allocation5 + $0x968] ss:$16 sps:$4 sm:$0xff]  }
 0x241   :  { %5591 = vmatprep.subr.bf16.mxu1 %v7922_v41  ;;  %v7992_v41 = vld [vmem:[#allocation5 + $0xb68] ss:$16 sps:$4 sm:$0xff]  }
 0x242   :  { %5495 = vmatmul.mubr.bf16.vlgmr.msra.gmra.mxu0 %v8560_v20  ;;  %v7937_v20 = vld [vmem:[#allocation5 + $0x88c] ss:$16 sps:$4 sm:$0xff]  }
 0x243   :  { %5538 = vmatmul.mubr.bf16.vlgmr.msra.gmra.mxu1 %v8564_v21  ;;  %5549 = vmatpush1.bf16.msra.mxu0 %v7917_v43  ;;  %v7940_v21 = vld [vmem:[#allocation5 + $0xa8c] ss:$16 sps:$4 sm:$0xff]  }
 0x244   :  { %5592 = vmatpush1.bf16.msra.mxu1 %v7920_v47  ;;  %5550 = vmatprep.subr.bf16.mxu0 %v7925_v50  ;;  %v7997_v43 = vld [vmem:[#allocation5 + $0x94c] ss:$16 sps:$4 sm:$0xff]   ;;  %v7995_v50 = vld [vmem:[#allocation5 + $0x948] ss:$16 sps:$4 sm:$0xff]  }
 0x245   :  { %5593 = vmatprep.subr.bf16.mxu1 %v7928_v17  ;;  %5580 = vmatprep.mubr.bf16.mxu0 %v8578_v33  ;;  %v7941_v33 = vld [vmem:[#allocation5 + $0x868] ss:$16 sps:$4 sm:$0xff]   ;;  %v8000_v47 = vld [vmem:[#allocation5 + $0xb4c] ss:$16 sps:$4 sm:$0xff]  }
 0x246   :  { %5623 = vmatprep.mubr.bf16.mxu1 %v8582_v35  ;;  %v7944_v35 = vld [vmem:[#allocation5 + $0xa68] ss:$16 sps:$4 sm:$0xff]  }
 0x247   :  { %5551 = vmatpush1.bf16.msra.mxu0 %v7923_v18  ;;  %v7998_v17 = vld [vmem:[#allocation5 + $0xb48] ss:$16 sps:$4 sm:$0xff]   ;;  %v8003_v18 = vld [vmem:[#allocation5 + $0x92c] ss:$16 sps:$4 sm:$0xff]  }
 0x248   :  { %5594 = vmatpush1.bf16.msra.mxu1 %v7926_v19  ;;  %5552 = vmatprep.subr.bf16.mxu0 %v7931_v22  ;;  %v8006_v19 = vld [vmem:[#allocation5 + $0xb2c] ss:$16 sps:$4 sm:$0xff]   ;;  %v8001_v22 = vld [vmem:[#allocation5 + $0x928] ss:$16 sps:$4 sm:$0xff]  }
 0x249   :  { %5595 = vmatprep.subr.bf16.mxu1 %v7934_v23  ;;  %v8004_v23 = vld [vmem:[#allocation5 + $0xb28] ss:$16 sps:$4 sm:$0xff]  }
 0x24b   :  { %5553 = vmatpush1.bf16.msra.mxu0 %v7929_v26  ;;  %v8009_v26 = vld [vmem:[#allocation5 + $0x90c] ss:$16 sps:$4 sm:$0xff]  }
 0x24c   :  { %5596 = vmatpush1.bf16.msra.mxu1 %v7932_v27  ;;  %5554 = vmatprep.subr.bf16.mxu0 %v7937_v20  ;;  %v8012_v27 = vld [vmem:[#allocation5 + $0xb0c] ss:$16 sps:$4 sm:$0xff]   ;;  %v8007_v20 = vld [vmem:[#allocation5 + $0x908] ss:$16 sps:$4 sm:$0xff]  }
 0x24d   :  { %5597 = vmatprep.subr.bf16.mxu1 %v7940_v21  ;;  %v8010_v21 = vld [vmem:[#allocation5 + $0xb08] ss:$16 sps:$4 sm:$0xff]  }
 0x24f   :  { %5555 = vmatpush1.bf16.msra.mxu0 %v7935_v32  ;;  %v8015_v32 = vld [vmem:[#allocation5 + $0xcec] ss:$16 sps:$4 sm:$0xff]  }
 0x250   :  { %5598 = vmatpush1.bf16.msra.mxu1 %v7938_v34  ;;  %5556 = vmatprep.subr.bf16.mxu0 %v7943_v40  ;;  %v8018_v34 = vld [vmem:[#allocation5 + $0xeec] ss:$16 sps:$4 sm:$0xff]   ;;  %v8013_v40 = vld [vmem:[#allocation5 + $0xce8] ss:$16 sps:$4 sm:$0xff]  }
 0x251   :  { %5599 = vmatprep.subr.bf16.mxu1 %v7946_v42  ;;  %v8016_v42 = vld [vmem:[#allocation5 + $0xee8] ss:$16 sps:$4 sm:$0xff]  }
 0x253   :  { %5557 = vmatpush1.bf16.msra.mxu0 %v7941_v33  ;;  %v8021_v33 = vld [vmem:[#allocation5 + $0xccc] ss:$16 sps:$4 sm:$0xff]  }
 0x254   :  { %5600 = vmatpush1.bf16.msra.mxu1 %v7944_v35  ;;  %5558 = vmatprep.subr.bf16.mxu0 %v7949_v45  ;;  %v8024_v35 = vld [vmem:[#allocation5 + $0xecc] ss:$16 sps:$4 sm:$0xff]   ;;  %v8019_v45 = vld [vmem:[#allocation5 + $0xcc8] ss:$16 sps:$4 sm:$0xff]  }
 0x255   :  { %5601 = vmatprep.subr.bf16.mxu1 %v7952_v51  ;;  %v8022_v51 = vld [vmem:[#allocation5 + $0xec8] ss:$16 sps:$4 sm:$0xff]  }
 0x257   :  { %5559 = vmatpush1.bf16.msra.mxu0 %v7947_v36  ;;  %v8027_v36 = vld [vmem:[#allocation5 + $0xcac] ss:$16 sps:$4 sm:$0xff]  }
 0x258   :  { %5602 = vmatpush1.bf16.msra.mxu1 %v7950_v37  ;;  %5560 = vmatprep.subr.bf16.mxu0 %v7955_v38  ;;  %v8030_v37 = vld [vmem:[#allocation5 + $0xeac] ss:$16 sps:$4 sm:$0xff]   ;;  %v8025_v38 = vld [vmem:[#allocation5 + $0xca8] ss:$16 sps:$4 sm:$0xff]  }
 0x259   :  { %5603 = vmatprep.subr.bf16.mxu1 %v7958_v39  ;;  %v8028_v39 = vld [vmem:[#allocation5 + $0xea8] ss:$16 sps:$4 sm:$0xff]  }
 0x25b   :  { %5561 = vmatpush1.bf16.msra.mxu0 %v7953_v52  ;;  %v8031_v52 = vld [vmem:[#allocation5 + $0xc88] ss:$16 sps:$4 sm:$0xff]  }
 0x25c   :  { %5604 = vmatpush1.bf16.msra.mxu1 %v7956_v54  ;;  %5562 = vmatprep.subr.bf16.mxu0 %v7961_v31  ;;  %v8034_v54 = vld [vmem:[#allocation5 + $0xe88] ss:$16 sps:$4 sm:$0xff]   ;;  %v8039_v31 = vld [vmem:[#allocation5 + $0xc6c] ss:$16 sps:$4 sm:$0xff]  }
 0x25d   :  { %5605 = vmatprep.subr.bf16.mxu1 %v7964_v53  ;;  %v8042_v53 = vld [vmem:[#allocation5 + $0xe6c] ss:$16 sps:$4 sm:$0xff]  }
 0x25f   :  { %5563 = vmatpush1.bf16.msra.mxu0 %v7959_v55  ;;  %v8045_v55 = vld [vmem:[#allocation5 + $0xc4c] ss:$16 sps:$4 sm:$0xff]  }
 0x260   :  { %5606 = vmatpush1.bf16.msra.mxu1 %v7962_v57  ;;  %5564 = vmatprep.subr.bf16.mxu0 %v7967_v58  ;;  %v8048_v57 = vld [vmem:[#allocation5 + $0xe4c] ss:$16 sps:$4 sm:$0xff]   ;;  %v8043_v58 = vld [vmem:[#allocation5 + $0xc48] ss:$16 sps:$4 sm:$0xff]  }
 0x261   :  { %5607 = vmatprep.subr.bf16.mxu1 %v7970_v59  ;;  %v8046_v59 = vld [vmem:[#allocation5 + $0xe48] ss:$16 sps:$4 sm:$0xff]  }
 0x263   :  { %5565 = vmatpush2.bf16.msra.mxu0 %v7965_v6  ;;  %v8051_v6 = vld [vmem:[#allocation5 + $0xc2c] ss:$16 sps:$4 sm:$0xff]  }
 0x264   :  { %5608 = vmatpush2.bf16.msra.mxu1 %v7968_v7  ;;  %5566 = vmatprep.subr.bf16.mxu0 %v7973_v12  ;;  %v8054_v7 = vld [vmem:[#allocation5 + $0xe2c] ss:$16 sps:$4 sm:$0xff]   ;;  %v8049_v12 = vld [vmem:[#allocation5 + $0xc28] ss:$16 sps:$4 sm:$0xff]  }
 0x265   :  { %5609 = vmatprep.subr.bf16.mxu1 %v7976_v61  ;;  %v8052_v61 = vld [vmem:[#allocation5 + $0xe28] ss:$16 sps:$4 sm:$0xff]  }
 0x267   :  { %5567 = vmatpush2.bf16.msra.mxu0 %v7971_v62  ;;  %v8057_v62 = vld [vmem:[#allocation5 + $0xc0c] ss:$16 sps:$4 sm:$0xff]  }
 0x268   :  { %5610 = vmatpush2.bf16.msra.mxu1 %v7974_v63  ;;  %5568 = vmatprep.subr.bf16.mxu0 %v7979_v0  ;;  %v8060_v63 = vld [vmem:[#allocation5 + $0xe0c] ss:$16 sps:$4 sm:$0xff]   ;;  %v8055_v0 = vld [vmem:[#allocation5 + $0xc08] ss:$16 sps:$4 sm:$0xff]  }
 0x269   :  { %5611 = vmatprep.subr.bf16.mxu1 %v7982_v1  ;;  %v8058_v1 = vld [vmem:[#allocation5 + $0xe08] ss:$16 sps:$4 sm:$0xff]  }
 0x26b   :  { %5569 = vmatpush2.bf16.msra.mxu0 %v7977_v2  ;;  %v8063_v2 = vld [vmem:[#allocation5 + $0xdec] ss:$16 sps:$4 sm:$0xff]  }
 0x26c   :  { %5612 = vmatpush2.bf16.msra.mxu1 %v7980_v3  ;;  %5570 = vmatprep.subr.bf16.mxu0 %v7985_v5  ;;  %v8066_v3 = vld [vmem:[#allocation5 + $0xfec] ss:$16 sps:$4 sm:$0xff]   ;;  %v8061_v5 = vld [vmem:[#allocation5 + $0xde8] ss:$16 sps:$4 sm:$0xff]  }
 0x26d   :  { %5613 = vmatprep.subr.bf16.mxu1 %v7988_v8  ;;  %v8064_v8 = vld [vmem:[#allocation5 + $0xfe8] ss:$16 sps:$4 sm:$0xff]  }
 0x26f   :  { %5571 = vmatpush2.bf16.msra.mxu0 %v7983_v13  ;;  %v8069_v13 = vld [vmem:[#allocation5 + $0xdcc] ss:$16 sps:$4 sm:$0xff]  }
 0x270   :  { %5614 = vmatpush2.bf16.msra.mxu1 %v7986_v9  ;;  %5572 = vmatprep.subr.bf16.mxu0 %v7991_v14  ;;  %v8072_v9 = vld [vmem:[#allocation5 + $0xfcc] ss:$16 sps:$4 sm:$0xff]   ;;  %v8067_v14 = vld [vmem:[#allocation5 + $0xdc8] ss:$16 sps:$4 sm:$0xff]  }
 0x271   :  { %5615 = vmatprep.subr.bf16.mxu1 %v7994_v15  ;;  %v8070_v15 = vld [vmem:[#allocation5 + $0xfc8] ss:$16 sps:$4 sm:$0xff]  }
 0x273   :  { %5573 = vmatpush2.bf16.msra.mxu0 %v7989_v46  ;;  %v8075_v46 = vld [vmem:[#allocation5 + $0xdac] ss:$16 sps:$4 sm:$0xff]  }
 0x274   :  { %5616 = vmatpush2.bf16.msra.mxu1 %v7992_v41  ;;  %5574 = vmatprep.subr.bf16.mxu0 %v7997_v43  ;;  %v8078_v41 = vld [vmem:[#allocation5 + $0xfac] ss:$16 sps:$4 sm:$0xff]   ;;  %v8073_v43 = vld [vmem:[#allocation5 + $0xda8] ss:$16 sps:$4 sm:$0xff]  }
 0x275   :  { %5617 = vmatprep.subr.bf16.mxu1 %v8000_v47  ;;  %v8076_v47 = vld [vmem:[#allocation5 + $0xfa8] ss:$16 sps:$4 sm:$0xff]  }
 0x277   :  { %5575 = vmatpush2.bf16.msra.mxu0 %v7995_v50  ;;  %v8081_v50 = vld [vmem:[#allocation5 + $0xd8c] ss:$16 sps:$4 sm:$0xff]  }
 0x278   :  { %5618 = vmatpush2.bf16.msra.mxu1 %v7998_v17  ;;  %5576 = vmatprep.subr.bf16.mxu0 %v8003_v18  ;;  %v8084_v17 = vld [vmem:[#allocation5 + $0xf8c] ss:$16 sps:$4 sm:$0xff]   ;;  %v8079_v18 = vld [vmem:[#allocation5 + $0xd88] ss:$16 sps:$4 sm:$0xff]  }
 0x279   :  { %5619 = vmatprep.subr.bf16.mxu1 %v8006_v19  ;;  %v8082_v19 = vld [vmem:[#allocation5 + $0xf88] ss:$16 sps:$4 sm:$0xff]  }
 0x27b   :  { %5577 = vmatpush2.bf16.msra.mxu0 %v8001_v22  ;;  %v8087_v22 = vld [vmem:[#allocation5 + $0xd6c] ss:$16 sps:$4 sm:$0xff]  }
 0x27c   :  { %5620 = vmatpush2.bf16.msra.mxu1 %v8004_v23  ;;  %5578 = vmatprep.subr.bf16.mxu0 %v8009_v26  ;;  %v8090_v23 = vld [vmem:[#allocation5 + $0xf6c] ss:$16 sps:$4 sm:$0xff]   ;;  %v8085_v26 = vld [vmem:[#allocation5 + $0xd68] ss:$16 sps:$4 sm:$0xff]  }
 0x27d   :  { %5621 = vmatprep.subr.bf16.mxu1 %v8012_v27  ;;  %v8088_v27 = vld [vmem:[#allocation5 + $0xf68] ss:$16 sps:$4 sm:$0xff]  }
 0x27f   :  { %5579 = vmatpush2.bf16.msra.mxu0 %v8007_v20  ;;  %v8093_v20 = vld [vmem:[#allocation5 + $0xd4c] ss:$16 sps:$4 sm:$0xff]  }
 0x280   :  { %5622 = vmatpush2.bf16.msra.mxu1 %v8010_v21  ;;  %5634 = vmatprep.subr.bf16.mxu0 %v8015_v32  ;;  %v8096_v21 = vld [vmem:[#allocation5 + $0xf4c] ss:$16 sps:$4 sm:$0xff]   ;;  %v8091_v32 = vld [vmem:[#allocation5 + $0xd48] ss:$16 sps:$4 sm:$0xff]  }
 0x281   :  { %5677 = vmatprep.subr.bf16.mxu1 %v8018_v34  ;;  %v8094_v34 = vld [vmem:[#allocation5 + $0xf48] ss:$16 sps:$4 sm:$0xff]  }
 0x282   :  { %5581 = vmatmul.mubr.bf16.vlgmr.msra.gmra.mxu0 %v8594_v48  ;;  %v8033_v48 = vld [vmem:[#allocation5 + $0xc8c] ss:$16 sps:$4 sm:$0xff]  }
 0x283   :  { %5624 = vmatmul.mubr.bf16.vlgmr.msra.gmra.mxu1 %v8598_v49  ;;  %5635 = vmatpush1.bf16.msra.mxu0 %v8013_v40  ;;  %v8036_v49 = vld [vmem:[#allocation5 + $0xe8c] ss:$16 sps:$4 sm:$0xff]  }
 0x284   :  { %5678 = vmatpush1.bf16.msra.mxu1 %v8016_v42  ;;  %5636 = vmatprep.subr.bf16.mxu0 %v8021_v33  ;;  %v8099_v40 = vld [vmem:[#allocation5 + $0xd2c] ss:$16 sps:$4 sm:$0xff]   ;;  %v8097_v33 = vld [vmem:[#allocation5 + $0xd28] ss:$16 sps:$4 sm:$0xff]  }
 0x285   :  { %5679 = vmatprep.subr.bf16.mxu1 %v8024_v35  ;;  %5666 = vmatprep.mubr.bf16.mxu0 %v8604_v56  ;;  %v8037_v56 = vld [vmem:[#allocation5 + $0xc68] ss:$16 sps:$4 sm:$0xff]   ;;  %v8102_v42 = vld [vmem:[#allocation5 + $0xf2c] ss:$16 sps:$4 sm:$0xff]  }
 0x286   :  { %5709 = vmatprep.mubr.bf16.mxu1 %v8608_v28  ;;  %v8040_v28 = vld [vmem:[#allocation5 + $0xe68] ss:$16 sps:$4 sm:$0xff]  }
 0x287   :  { %5637 = vmatpush1.bf16.msra.mxu0 %v8019_v45  ;;  %v8100_v35 = vld [vmem:[#allocation5 + $0xf28] ss:$16 sps:$4 sm:$0xff]   ;;  %v8105_v45 = vld [vmem:[#allocation5 + $0xd0c] ss:$16 sps:$4 sm:$0xff]  }
 0x288   :  { %5680 = vmatpush1.bf16.msra.mxu1 %v8022_v51  ;;  %5638 = vmatprep.subr.bf16.mxu0 %v8027_v36  ;;  %v8108_v51 = vld [vmem:[#allocation5 + $0xf0c] ss:$16 sps:$4 sm:$0xff]   ;;  %v8103_v36 = vld [vmem:[#allocation5 + $0xd08] ss:$16 sps:$4 sm:$0xff]  }
 0x289   :  { %5681 = vmatprep.subr.bf16.mxu1 %v8030_v37  ;;  %v8106_v37 = vld [vmem:[#allocation5 + $0xf08] ss:$16 sps:$4 sm:$0xff]  }
 0x28b   :  { %5639 = vmatpush1.bf16.msra.mxu0 %v8025_v38  ;;  %v8111_v38 = vld [vmem:[#allocation5 + $0x10ec] ss:$16 sps:$4 sm:$0xff]  }
 0x28c   :  { %5682 = vmatpush1.bf16.msra.mxu1 %v8028_v39  ;;  %5640 = vmatprep.subr.bf16.mxu0 %v8033_v48  ;;  %v8114_v39 = vld [vmem:[#allocation5 + $0x12ec] ss:$16 sps:$4 sm:$0xff]   ;;  %v8109_v48 = vld [vmem:[#allocation5 + $0x10e8] ss:$16 sps:$4 sm:$0xff]  }
 0x28d   :  { %5683 = vmatprep.subr.bf16.mxu1 %v8036_v49  ;;  %v8112_v49 = vld [vmem:[#allocation5 + $0x12e8] ss:$16 sps:$4 sm:$0xff]  }
 0x28f   :  { %5641 = vmatpush1.bf16.msra.mxu0 %v8031_v52  ;;  %v8117_v52 = vld [vmem:[#allocation5 + $0x10cc] ss:$16 sps:$4 sm:$0xff]  }
 0x290   :  { %5684 = vmatpush1.bf16.msra.mxu1 %v8034_v54  ;;  %5642 = vmatprep.subr.bf16.mxu0 %v8039_v31  ;;  %v8120_v54 = vld [vmem:[#allocation5 + $0x12cc] ss:$16 sps:$4 sm:$0xff]   ;;  %v8115_v31 = vld [vmem:[#allocation5 + $0x10c8] ss:$16 sps:$4 sm:$0xff]  }
 0x291   :  { %5685 = vmatprep.subr.bf16.mxu1 %v8042_v53  ;;  %v8118_v53 = vld [vmem:[#allocation5 + $0x12c8] ss:$16 sps:$4 sm:$0xff]  }
 0x293   :  { %5643 = vmatpush1.bf16.msra.mxu0 %v8037_v56  ;;  %v8123_v56 = vld [vmem:[#allocation5 + $0x10ac] ss:$16 sps:$4 sm:$0xff]  }
 0x294   :  { %5686 = vmatpush1.bf16.msra.mxu1 %v8040_v28  ;;  %5644 = vmatprep.subr.bf16.mxu0 %v8045_v55  ;;  %v8126_v28 = vld [vmem:[#allocation5 + $0x12ac] ss:$16 sps:$4 sm:$0xff]   ;;  %v8121_v55 = vld [vmem:[#allocation5 + $0x10a8] ss:$16 sps:$4 sm:$0xff]  }
 0x295   :  { %5687 = vmatprep.subr.bf16.mxu1 %v8048_v57  ;;  %v8124_v57 = vld [vmem:[#allocation5 + $0x12a8] ss:$16 sps:$4 sm:$0xff]  }
 0x297   :  { %5645 = vmatpush1.bf16.msra.mxu0 %v8043_v58  ;;  %v8127_v58 = vld [vmem:[#allocation5 + $0x1088] ss:$16 sps:$4 sm:$0xff]  }
 0x298   :  { %5688 = vmatpush1.bf16.msra.mxu1 %v8046_v59  ;;  %5646 = vmatprep.subr.bf16.mxu0 %v8051_v6  ;;  %v8130_v59 = vld [vmem:[#allocation5 + $0x1288] ss:$16 sps:$4 sm:$0xff]   ;;  %v8135_v6 = vld [vmem:[#allocation5 + $0x106c] ss:$16 sps:$4 sm:$0xff]  }
 0x299   :  { %5689 = vmatprep.subr.bf16.mxu1 %v8054_v7  ;;  %v8138_v7 = vld [vmem:[#allocation5 + $0x126c] ss:$16 sps:$4 sm:$0xff]  }
 0x29b   :  { %5647 = vmatpush1.bf16.msra.mxu0 %v8049_v12  ;;  %v8141_v12 = vld [vmem:[#allocation5 + $0x104c] ss:$16 sps:$4 sm:$0xff]  }
 0x29c   :  { %5690 = vmatpush1.bf16.msra.mxu1 %v8052_v61  ;;  %5648 = vmatprep.subr.bf16.mxu0 %v8057_v62  ;;  %v8144_v61 = vld [vmem:[#allocation5 + $0x124c] ss:$16 sps:$4 sm:$0xff]   ;;  %v8698_v62 = vpop.f32.mrf.mxu0 }
 0x29d   :  { %5691 = vmatprep.subr.bf16.mxu1 %v8060_v63  ;;  %v8139_v63 = vld [vmem:[#allocation5 + $0x1048] ss:$16 sps:$4 sm:$0xff]  }
 0x29f   :  { %5649 = vmatpush1.bf16.msra.mxu0 %v8055_v0  ;;  %v8142_v0 = vld [vmem:[#allocation5 + $0x1248] ss:$16 sps:$4 sm:$0xff]  }
 0x2a0   :  { %5692 = vmatpush1.bf16.msra.mxu1 %v8058_v1  ;;  %5650 = vmatprep.subr.bf16.mxu0 %v8063_v2  ;;  %v8147_v1 = vld [vmem:[#allocation5 + $0x102c] ss:$16 sps:$4 sm:$0xff]  }
 0x2a1   :  { %5693 = vmatprep.subr.bf16.mxu1 %v8066_v3  ;;  %v8150_v2 = vld [vmem:[#allocation5 + $0x122c] ss:$16 sps:$4 sm:$0xff]   ;;  %v8700_v3 = vpop.f32.mrf.mxu0 }
 0x2a3   :  { %5651 = vmatpush2.bf16.msra.mxu0 %v8061_v5  ;;  %v8145_v5 = vld [vmem:[#allocation5 + $0x1028] ss:$16 sps:$4 sm:$0xff]  }
 0x2a4   :  { %5694 = vmatpush2.bf16.msra.mxu1 %v8064_v8  ;;  %5652 = vmatprep.subr.bf16.mxu0 %v8069_v13  ;;  %v8148_v8 = vld [vmem:[#allocation5 + $0x1228] ss:$16 sps:$4 sm:$0xff]   ;;  %v8153_v13 = vld [vmem:[#allocation5 + $0x100c] ss:$16 sps:$4 sm:$0xff]  }
 0x2a5   :  { %5695 = vmatprep.subr.bf16.mxu1 %v8072_v9  ;;  %v8156_v9 = vld [vmem:[#allocation5 + $0x120c] ss:$16 sps:$4 sm:$0xff]  }
 0x2a7   :  { %5653 = vmatpush2.bf16.msra.mxu0 %v8067_v14  ;;  %v8702_v14 = vpop.f32.mrf.mxu1 }
 0x2a8   :  { %5696 = vmatpush2.bf16.msra.mxu1 %v8070_v15  ;;  %5654 = vmatprep.subr.bf16.mxu0 %v8075_v46  ;;  %v8704_v15 = vpop.f32.mrf.mxu0  ;;  %v8151_v46 = vld [vmem:[#allocation5 + $0x1008] ss:$16 sps:$4 sm:$0xff]  }
 0x2a9   :  { %5697 = vmatprep.subr.bf16.mxu1 %v8078_v41  ;;  %v8154_v41 = vld [vmem:[#allocation5 + $0x1208] ss:$16 sps:$4 sm:$0xff]  }
 0x2ab   :  { %5655 = vmatpush2.bf16.msra.mxu0 %v8073_v43  ;;  %v8159_v43 = vld [vmem:[#allocation5 + $0x11ec] ss:$16 sps:$4 sm:$0xff]  }
 0x2ac   :  { %5698 = vmatpush2.bf16.msra.mxu1 %v8076_v47  ;;  %5656 = vmatprep.subr.bf16.mxu0 %v8081_v50  ;;  %v8162_v47 = vld [vmem:[#allocation5 + $0x13ec] ss:$16 sps:$4 sm:$0xff]   ;;  %v8706_v50 = vpop.f32.mrf.mxu1 }
 0x2ad   :  { %5699 = vmatprep.subr.bf16.mxu1 %v8084_v17  ;;  %v8708_v17 = vpop.f32.mrf.mxu0 }
 0x2af   :  { %5657 = vmatpush2.bf16.msra.mxu0 %v8079_v18  ;;  %v8157_v18 = vld [vmem:[#allocation5 + $0x11e8] ss:$16 sps:$4 sm:$0xff]  }
 0x2b0   :  { %5700 = vmatpush2.bf16.msra.mxu1 %v8082_v19  ;;  %5658 = vmatprep.subr.bf16.mxu0 %v8087_v22  ;;  %v8160_v19 = vld [vmem:[#allocation5 + $0x13e8] ss:$16 sps:$4 sm:$0xff]   ;;  %v8165_v22 = vld [vmem:[#allocation5 + $0x11cc] ss:$16 sps:$4 sm:$0xff]  }
 0x2b1   :  { %5701 = vmatprep.subr.bf16.mxu1 %v8090_v23  ;;  %v8168_v23 = vld [vmem:[#allocation5 + $0x13cc] ss:$16 sps:$4 sm:$0xff]  }
 0x2b3   :  { %5659 = vmatpush2.bf16.msra.mxu0 %v8085_v26  ;;  %v8710_v26 = vpop.f32.mrf.mxu1 }
 0x2b4   :  { %5702 = vmatpush2.bf16.msra.mxu1 %v8088_v27  ;;  %5660 = vmatprep.subr.bf16.mxu0 %v8093_v20  ;;  %v8712_v27 = vpop.f32.mrf.mxu0  ;;  %v8163_v20 = vld [vmem:[#allocation5 + $0x11c8] ss:$16 sps:$4 sm:$0xff]  }
 0x2b5   :  { %5703 = vmatprep.subr.bf16.mxu1 %v8096_v21  ;;  %v8166_v21 = vld [vmem:[#allocation5 + $0x13c8] ss:$16 sps:$4 sm:$0xff]  }
 0x2b7   :  { %5661 = vmatpush2.bf16.msra.mxu0 %v8091_v32  ;;  %v8171_v32 = vld [vmem:[#allocation5 + $0x11ac] ss:$16 sps:$4 sm:$0xff]  }
 0x2b8   :  { %5704 = vmatpush2.bf16.msra.mxu1 %v8094_v34  ;;  %5662 = vmatprep.subr.bf16.mxu0 %v8099_v40  ;;  %v8174_v34 = vld [vmem:[#allocation5 + $0x13ac] ss:$16 sps:$4 sm:$0xff]   ;;  %v8714_v40 = vpop.f32.mrf.mxu1 }
 0x2b9   :  { %5705 = vmatprep.subr.bf16.mxu1 %v8102_v42  ;;  %v8716_v42 = vpop.f32.mrf.mxu0 }
 0x2bb   :  { %5663 = vmatpush2.bf16.msra.mxu0 %v8097_v33  ;;  %v8718_v33 = vpop.f32.mrf.mxu1 }
 0x2bc   :  { %5706 = vmatpush2.bf16.msra.mxu1 %v8100_v35  ;;  %5664 = vmatprep.subr.bf16.mxu0 %v8105_v45  ;;  %v8169_v35 = vld [vmem:[#allocation5 + $0x11a8] ss:$16 sps:$4 sm:$0xff]  }
 0x2bd   :  { %5707 = vmatprep.subr.bf16.mxu1 %v8108_v51  ;;  %v8172_v45 = vld [vmem:[#allocation5 + $0x13a8] ss:$16 sps:$4 sm:$0xff]   ;;  %v8177_v51 = vld [vmem:[#allocation5 + $0x118c] ss:$16 sps:$4 sm:$0xff]  }
 0x2bf   :  { %5665 = vmatpush2.bf16.msra.mxu0 %v8103_v36  ;;  %v8180_v36 = vld [vmem:[#allocation5 + $0x138c] ss:$16 sps:$4 sm:$0xff]  }
 0x2c0   :  { %5708 = vmatpush2.bf16.msra.mxu1 %v8106_v37  ;;  %5720 = vmatprep.subr.bf16.mxu0 %v8111_v38  ;;  %v8720_v37 = vpop.f32.mrf.mxu0  ;;  %v8722_v38 = vpop.f32.mrf.mxu1 }
 0x2c1   :  { %5763 = vmatprep.subr.bf16.mxu1 %v8114_v39  ;;  %v8175_v39 = vld [vmem:[#allocation5 + $0x1188] ss:$16 sps:$4 sm:$0xff]  }
 0x2c2   :  { %5667 = vmatmul.mubr.bf16.vlgmr.msra.gmra.mxu0 %v8622_v10  ;;  %v8129_v10 = vld [vmem:[#allocation5 + $0x108c] ss:$16 sps:$4 sm:$0xff]  }
 0x2c3   :  { %5710 = vmatmul.mubr.bf16.vlgmr.msra.gmra.mxu1 %v8626_v11  ;;  %5721 = vmatpush1.bf16.msra.mxu0 %v8109_v48  ;;  %v8132_v11 = vld [vmem:[#allocation5 + $0x128c] ss:$16 sps:$4 sm:$0xff]   ;;  %v8178_v48 = vld [vmem:[#allocation5 + $0x1388] ss:$16 sps:$4 sm:$0xff]  }
 0x2c4   :  { %5764 = vmatpush1.bf16.msra.mxu1 %v8112_v49  ;;  %5722 = vmatprep.subr.bf16.mxu0 %v8117_v52  ;;  %v8183_v49 = vld [vmem:[#allocation5 + $0x116c] ss:$16 sps:$4 sm:$0xff]  }
 0x2c5   :  { %5765 = vmatprep.subr.bf16.mxu1 %v8120_v54  ;;  %5752 = vmatprep.mubr.bf16.mxu0 %v8632_v16  ;;  %v8133_v16 = vld [vmem:[#allocation5 + $0x1068] ss:$16 sps:$4 sm:$0xff]   ;;  %v8186_v52 = vld [vmem:[#allocation5 + $0x136c] ss:$16 sps:$4 sm:$0xff]   ;;  %v8724_v54 = vpop.f32.mrf.mxu0 }
 0x2c6   :  { %5795 = vmatprep.mubr.bf16.mxu1 %v8636_v44  ;;  %v8136_v44 = vld [vmem:[#allocation5 + $0x1268] ss:$16 sps:$4 sm:$0xff]  }
 0x2c7   :  { %5723 = vmatpush1.bf16.msra.mxu0 %v8115_v31  ;;  %v8726_v31 = vpop.f32.mrf.mxu1 }
 0x2c8   :  { %5766 = vmatpush1.bf16.msra.mxu1 %v8118_v53  ;;  %5724 = vmatprep.subr.bf16.mxu0 %v8123_v56  ;;  %v8728_v53 = vpop.f32.mrf.mxu0  ;;  %v8181_v56 = vld [vmem:[#allocation5 + $0x1168] ss:$16 sps:$4 sm:$0xff]  }
 0x2c9   :  { %5767 = vmatprep.subr.bf16.mxu1 %v8126_v28  ;;  %v8184_v28 = vld [vmem:[#allocation5 + $0x1368] ss:$16 sps:$4 sm:$0xff]  }
 0x2cb   :  { %5725 = vmatpush1.bf16.msra.mxu0 %v8121_v55  ;;  %v8189_v55 = vld [vmem:[#allocation5 + $0x114c] ss:$16 sps:$4 sm:$0xff]  }
 0x2cc   :  { %5768 = vmatpush1.bf16.msra.mxu1 %v8124_v57  ;;  %5726 = vmatprep.subr.bf16.mxu0 %v8129_v10  ;;  %v8192_v57 = vld [vmem:[#allocation5 + $0x134c] ss:$16 sps:$4 sm:$0xff]   ;;  %v8730_v10 = vpop.f32.mrf.mxu1 }
 0x2cd   :  { %5769 = vmatprep.subr.bf16.mxu1 %v8132_v11  ;;  %v8732_v11 = vpop.f32.mrf.mxu0 }
 0x2cf   :  { %5727 = vmatpush1.bf16.msra.mxu0 %v8127_v58  ;;  %v8187_v58 = vld [vmem:[#allocation5 + $0x1148] ss:$16 sps:$4 sm:$0xff]  }
 0x2d0   :  { %5770 = vmatpush1.bf16.msra.mxu1 %v8130_v59  ;;  %5728 = vmatprep.subr.bf16.mxu0 %v8135_v6  ;;  %v8190_v59 = vld [vmem:[#allocation5 + $0x1348] ss:$16 sps:$4 sm:$0xff]   ;;  %v8195_v6 = vld [vmem:[#allocation5 + $0x112c] ss:$16 sps:$4 sm:$0xff]  }
 0x2d1   :  { %5771 = vmatprep.subr.bf16.mxu1 %v8138_v7  ;;  %v8198_v7 = vld [vmem:[#allocation5 + $0x132c] ss:$16 sps:$4 sm:$0xff]  }
 0x2d3   :  { %5729 = vmatpush1.bf16.msra.mxu0 %v8133_v16  ;;  %v8734_v16 = vpop.f32.mrf.mxu1 }
 0x2d4   :  { %5772 = vmatpush1.bf16.msra.mxu1 %v8136_v44  ;;  %5730 = vmatprep.subr.bf16.mxu0 %v8141_v12  ;;  %v8736_v44 = vpop.f32.mrf.mxu0  ;;  %v8193_v12 = vld [vmem:[#allocation5 + $0x1128] ss:$16 sps:$4 sm:$0xff]  }
 0x2d5   :  { %5773 = vmatprep.subr.bf16.mxu1 %v8144_v61  ;;  %v8196_v61 = vld [vmem:[#allocation5 + $0x1328] ss:$16 sps:$4 sm:$0xff]  }
 0x2d7   :  { %5731 = vmatpush1.bf16.msra.mxu0 %v8139_v63  ;;  %v8201_v63 = vld [vmem:[#allocation5 + $0x110c] ss:$16 sps:$4 sm:$0xff]  }
 0x2d8   :  { %5774 = vmatpush1.bf16.msra.mxu1 %v8142_v0  ;;  %5732 = vmatprep.subr.bf16.mxu0 %v8147_v1  ;;  %v8204_v0 = vld [vmem:[#allocation5 + $0x130c] ss:$16 sps:$4 sm:$0xff]   ;;  %v8738_v1 = vpop.f32.mrf.mxu1 }
 0x2d9   :  { %5775 = vmatprep.subr.bf16.mxu1 %v8150_v2  ;;  %v8740_v2 = vpop.f32.mrf.mxu0 }
 0x2db   :  { %5733 = vmatpush1.bf16.msra.mxu0 %v8145_v5  ;;  %v8199_v5 = vld [vmem:[#allocation5 + $0x1108] ss:$16 sps:$4 sm:$0xff]  }
 0x2dc   :  { %5776 = vmatpush1.bf16.msra.mxu1 %v8148_v8  ;;  %5734 = vmatprep.subr.bf16.mxu0 %v8153_v13  ;;  %v8202_v8 = vld [vmem:[#allocation5 + $0x1308] ss:$16 sps:$4 sm:$0xff]   ;;  %v880_v13 = vlaneseq }
 0x2dd   :  { %5777 = vmatprep.subr.bf16.mxu1 %v8156_v9  ;;  %v8207_v9 = vld [vmem:[#allocation5 + $0x14ec] ss:$16 sps:$4 sm:$0xff]  }
 0x2df   :  { %5735 = vmatpush1.bf16.msra.mxu0 %v8151_v46  ;;  %v8210_v46 = vld [vmem:[#allocation5 + $0x16ec] ss:$16 sps:$4 sm:$0xff]  }
 0x2e0   :  { %5778 = vmatpush1.bf16.msra.mxu1 %v8154_v41  ;;  %5736 = vmatprep.subr.bf16.mxu0 %v8159_v43  ;;  %v8742_v41 = vpop.f32.mrf.mxu1  ;;  %v8744_v43 = vpop.f32.mrf.mxu0 }
 0x2e1   :  { %5779 = vmatprep.subr.bf16.mxu1 %v8162_v47  ;;  %v8205_v47 = vld [vmem:[#allocation5 + $0x14e8] ss:$16 sps:$4 sm:$0xff]  }
 0x2e3   :  { %5737 = vmatpush2.bf16.msra.mxu0 %v8157_v18  ;;  %v8208_v18 = vld [vmem:[#allocation5 + $0x16e8] ss:$16 sps:$4 sm:$0xff]  }
 0x2e4   :  { %5780 = vmatpush2.bf16.msra.mxu1 %v8160_v19  ;;  %5738 = vmatprep.subr.bf16.mxu0 %v8165_v22  ;;  %v8746_v19 = vshrl.u32 %v880_v13, 7  ;;  %v8213_v22 = vld [vmem:[#allocation5 + $0x14cc] ss:$16 sps:$4 sm:$0xff]  }
 0x2e5   :  { %5781 = vmatprep.subr.bf16.mxu1 %v8168_v23  ;;  %v8216_v23 = vld [vmem:[#allocation5 + $0x16cc] ss:$16 sps:$4 sm:$0xff]  }
 0x2e7   :  { %5739 = vmatpush2.bf16.msra.mxu0 %v8163_v20  ;;  %v8748_v20 = vpop.f32.mrf.mxu1 }
 0x2e8   :  { %5782 = vmatpush2.bf16.msra.mxu1 %v8166_v21  ;;  %5740 = vmatprep.subr.bf16.mxu0 %v8171_v32  ;;  %v8750_v21 = vpop.f32.mrf.mxu0 }
 0x2e9   :  { %5783 = vmatprep.subr.bf16.mxu1 %v8174_v34  ;;  %v8754_v32 = vpop.f32.mrf.mxu1  ;;  %v8211_v34 = vld [vmem:[#allocation5 + $0x14c8] ss:$16 sps:$4 sm:$0xff]  }
 0x2eb   :  { %5741 = vmatpush2.bf16.msra.mxu0 %v8169_v35  ;;  %v8214_v35 = vld [vmem:[#allocation5 + $0x16c8] ss:$16 sps:$4 sm:$0xff]  }
 0x2ec   :  { %5784 = vmatpush2.bf16.msra.mxu1 %v8172_v45  ;;  %5742 = vmatprep.subr.bf16.mxu0 %v8177_v51  ;;  %v886_v45 = vsub.s32 1, %v8746_v19  ;;  %v8219_v51 = vld [vmem:[#allocation5 + $0x14ac] ss:$16 sps:$4 sm:$0xff]  }
 0x2ed   :  { %5785 = vmatprep.subr.bf16.mxu1 %v8180_v36  ;;  %v8222_v36 = vld [vmem:[#allocation5 + $0x16ac] ss:$16 sps:$4 sm:$0xff]  }
 0x2ef   :  { %5743 = vmatpush2.bf16.msra.mxu0 %v8175_v39  ;;  %v8757_v39 = vld [vmem:[#allocation7] sm:$0xf] }
 0x2f0   :  { %5786 = vmatpush2.bf16.msra.mxu1 %v8178_v48  ;;  %5744 = vmatprep.subr.bf16.mxu0 %v8183_v49  ;;  %v8759_v48 = vpop.f32.mrf.mxu0  ;;  %v8220_v49 = vld [vmem:[#allocation5 + $0x16a8] ss:$16 sps:$4 sm:$0xff]  }
 0x2f1   :  { %5787 = vmatprep.subr.bf16.mxu1 %v8186_v52  ;;  %v887_v52 = vrot.slane %v8757_v39, %v886_v45 }
 0x2f3   :  { %5745 = vmatpush2.bf16.msra.mxu0 %v8181_v56  ;;  %v8225_v56 = vld [vmem:[#allocation5 + $0x148c] ss:$16 sps:$4 sm:$0xff]  }
 0x2f4   :  { %5788 = vmatpush2.bf16.msra.mxu1 %v8184_v28  ;;  %5746 = vmatprep.subr.bf16.mxu0 %v8189_v55  ;;  %v8228_v28 = vld [vmem:[#allocation5 + $0x168c] ss:$16 sps:$4 sm:$0xff]   ;;  %v5158_v55 = vpop.f32.mrf.mxu0 }
 0x2f5   :  { %5789 = vmatprep.subr.bf16.mxu1 %v8192_v57  ;;  %v4901_v57 = vadd.f32 %v8708_v17, %v887_v52  ;;  %v8229_v17 = vld [vmem:[#allocation5 + $0x1468] ss:$16 sps:$4 sm:$0xff]  }
 0x2f7   :  { %5747 = vmatpush2.bf16.msra.mxu0 %v8187_v58 }
 0x2f8   :  { %5790 = vmatpush2.bf16.msra.mxu1 %v8190_v59  ;;  %5748 = vmatprep.subr.bf16.mxu0 %v8195_v6  ;;  %v8226_v59 = vld [vmem:[#allocation5 + $0x1688] ss:$16 sps:$4 sm:$0xff]   ;;  %v4897_v6 = vadd.f32 %v8700_v3, %v887_v52  ;;  %v8237_v3 = vld [vmem:[#allocation5 + $0x144c] ss:$16 sps:$4 sm:$0xff]  }
 0x2f9   :  { %5791 = vmatprep.subr.bf16.mxu1 %v8198_v7  ;;  %v8231_v7 = vld [vmem:[#allocation5 + $0x146c] ss:$16 sps:$4 sm:$0xff]  }
 0x2fb   :  { %5749 = vmatpush2.bf16.msra.mxu0 %v8193_v12  ;;  %v8234_v12 = vld [vmem:[#allocation5 + $0x166c] ss:$16 sps:$4 sm:$0xff]  }
 0x2fc   :  { %5792 = vmatpush2.bf16.msra.mxu1 %v8196_v61  ;;  %5750 = vmatprep.subr.bf16.mxu0 %v8201_v63  ;;  %v4944_v61 = vadd.f32 %v8714_v40, %v4901_v57 }
 0x2fd   :  { %5793 = vmatprep.subr.bf16.mxu1 %v8204_v0 }
 0x2fe   :  { %v4987_v13 = vadd.f32 %v8724_v54, %v4944_v61  ;;  %v8246_v54 = vld [vmem:[#allocation5 + $0x162c] ss:$16 sps:$4 sm:$0xff]  }
 0x2ff   :  { %5751 = vmatpush2.bf16.msra.mxu0 %v8199_v5  ;;  %v8232_v5 = vld [vmem:[#allocation5 + $0x1668] ss:$16 sps:$4 sm:$0xff]  }
 0x300   :  { %5794 = vmatpush2.bf16.msra.mxu1 %v8202_v8  ;;  %5806 = vmatprep.subr.bf16.mxu0 %v8207_v9  ;;  %v4940_v8 = vadd.f32 %v8706_v50, %v4897_v6  ;;  %v8240_v9 = vld [vmem:[#allocation5 + $0x164c] ss:$16 sps:$4 sm:$0xff]  }
 0x301   :  { %5849 = vmatprep.subr.bf16.mxu1 %v8210_v46  ;;  %v8243_v50 = vld [vmem:[#allocation5 + $0x142c] ss:$16 sps:$4 sm:$0xff]  }
 0x302   :  { %5753 = vmatmul.mubr.bf16.vlgmr.msra.gmra.mxu0 %v8652_v29  ;;  %v8763_v29 = vpop.f32.mrf.mxu1 }
 0x303   :  { %5796 = vmatmul.mubr.bf16.vlgmr.msra.gmra.mxu1 %v8656_v30  ;;  %5807 = vmatpush1.bf16.msra.mxu0 %v8205_v47  ;;  %v8217_v30 = vld [vmem:[#allocation5 + $0x14a8] ss:$16 sps:$4 sm:$0xff]   ;;  %v4983_v47 = vadd.f32 %v8716_v42, %v4940_v8  ;;  %v8261_v8 = vld [vmem:[#allocation5 + $0x15cc] ss:$16 sps:$4 sm:$0xff]  }
 0x304   :  { %5850 = vmatpush1.bf16.msra.mxu1 %v8208_v18  ;;  %5808 = vmatprep.subr.bf16.mxu0 %v8213_v22  ;;  %v8767_v58 = vpop.f32.mrf.mxu1  ;;  %v8235_v18 = vld [vmem:[#allocation5 + $0x1448] ss:$16 sps:$4 sm:$0xff]  }
 0x305   :  { %5851 = vmatprep.subr.bf16.mxu1 %v8216_v23  ;;  %5838 = vmatprep.mubr.bf16.mxu0 %v8660_v60  ;;  %v8769_v60 = vpop.f32.mrf.mxu0  ;;  %v8238_v22 = vld [vmem:[#allocation5 + $0x1648] ss:$16 sps:$4 sm:$0xff]   ;;  %v5030_v23 = vadd.f32 %v8730_v10, %v4987_v13  ;;  %v8252_v10 = vld [vmem:[#allocation5 + $0x160c] ss:$16 sps:$4 sm:$0xff]  }
 0x306   :  { %5881 = vmatprep.mubr.bf16.mxu1 %v8664_v4  ;;  %v8223_v4 = vld [vmem:[#allocation5 + $0x1488] ss:$16 sps:$4 sm:$0xff]   ;;  %v5201_v63 = vpop.f32.mrf.mxu1 }
 0x307   :  { %5809 = vmatpush1.bf16.msra.mxu0 %v8211_v34  ;;  %v8773_v0 = vpop.f32.mrf.mxu0  ;;  %v5073_v45 = vadd.f32 %v8740_v2, %v5030_v23  ;;  %v8241_v42 = vld [vmem:[#allocation5 + $0x1428] ss:$16 sps:$4 sm:$0xff]   ;;  %v8270_v23 = vld [vmem:[#allocation5 + $0x17ac] ss:$16 sps:$4 sm:$0xff]  }
 0x308   :  { %5852 = vmatpush1.bf16.msra.mxu1 %v8214_v35  ;;  %5810 = vmatprep.subr.bf16.mxu0 %v8219_v51  ;;  %v8777_v46 = vpop.f32.mrf.mxu1  ;;  %v5026_v35 = vadd.f32 %v8722_v38, %v4983_v47  ;;  %v8247_v38 = vld [vmem:[#allocation5 + $0x1408] ss:$16 sps:$4 sm:$0xff]  }
 0x309   :  { %5853 = vmatprep.subr.bf16.mxu1 %v8222_v36  ;;  %v8780_v40 = vpop.f32.mrf.mxu0  ;;  %v8244_v36 = vld [vmem:[#allocation5 + $0x1628] ss:$16 sps:$4 sm:$0xff]  }
 0x30a   :  { %v5283_v34 = vpop.f32.mrf.mxu1  ;;  %v8250_v2 = vld [vmem:[#allocation5 + $0x1608] ss:$16 sps:$4 sm:$0xff]  }
 0x30b   :  { %5811 = vmatpush1.bf16.msra.mxu0 %v8217_v30  ;;  %v5244_v51 = vpop.f32.mrf.mxu0  ;;  %v5069_v30 = vadd.f32 %v8732_v11, %v5026_v35  ;;  %v8255_v11 = vld [vmem:[#allocation5 + $0x15ec] ss:$16 sps:$4 sm:$0xff]  }
 0x30c   :  { %5854 = vmatpush1.bf16.msra.mxu1 %v8220_v49  ;;  %5812 = vmatprep.subr.bf16.mxu0 %v8225_v56  ;;  %v8249_v49 = vld [vmem:[#allocation5 + $0x140c] ss:$16 sps:$4 sm:$0xff]   ;;  %v8786_v52 = vpop.f32.mrf.mxu1 }
 0x30d   :  { %5855 = vmatprep.subr.bf16.mxu1 %v8228_v28  ;;  %v8788_v56 = vpop.f32.mrf.mxu0  ;;  %v5116_v28 = vadd.f32 %v8748_v20, %v5073_v45  ;;  %v5112_v57 = vadd.f32 %v8738_v1, %v5069_v30  ;;  %v8253_v20 = vld [vmem:[#allocation5 + $0x15e8] ss:$16 sps:$4 sm:$0xff]   ;;  %v8264_v1 = vld [vmem:[#allocation5 + $0x17cc] ss:$16 sps:$4 sm:$0xff]  }
 0x30e   :  { %v5287_v6 = vpop.f32.mrf.mxu1  ;;  %v8273_v30 = vld [vmem:[#allocation5 + $0x158c] ss:$16 sps:$4 sm:$0xff]  }
 0x30f   :  { %5813 = vmatpush1.bf16.msra.mxu0 %v8223_v4  ;;  %v5159_v4 = vadd.f32 %v5158_v55, %v5116_v28 }
 0x310   :  { %5856 = vmatpush1.bf16.msra.mxu1 %v8226_v59  ;;  %5814 = vmatprep.subr.bf16.mxu0 %v8231_v7  ;;  %v8258_v59 = vld [vmem:[#allocation5 + $0x17ec] ss:$16 sps:$4 sm:$0xff]   ;;  %v5326_v7 = vpop.f32.mrf.mxu0  ;;  %v8793_v61 = vpop.f32.mrf.mxu1 }
 0x311   :  { %5857 = vmatprep.subr.bf16.mxu1 %v8234_v12  ;;  %v5155_v12 = vadd.f32 %v8750_v21, %v5112_v57  ;;  %v8259_v21 = vld [vmem:[#allocation5 + $0x15c8] ss:$16 sps:$4 sm:$0xff]  }
 0x312   :  { %v8795_v55 = vpop.f32.mrf.mxu0  ;;  %v5369_v47 = vpop.f32.mrf.mxu1  ;;  %v8274_v57 = vld [vmem:[#allocation5 + $0x1788] ss:$16 sps:$4 sm:$0xff]  }
 0x313   :  { %5815 = vmatpush1.bf16.msra.mxu0 %v8229_v17  ;;  %v8256_v17 = vld [vmem:[#allocation5 + $0x17e8] ss:$16 sps:$4 sm:$0xff]   ;;  %v5198_v13 = vadd.f32 %v8763_v29, %v5155_v12 }
 0x314   :  { %5858 = vmatpush1.bf16.msra.mxu1 %v8232_v5  ;;  %5816 = vmatprep.subr.bf16.mxu0 %v8237_v3  ;;  %v5202_v5 = vadd.f32 %v5201_v63, %v5159_v4  ;;  %v8267_v63 = vld [vmem:[#allocation5 + $0x15ac] ss:$16 sps:$4 sm:$0xff]   ;;  %v8801_v45 = vpop.f32.mrf.mxu1  ;;  %v8265_v29 = vld [vmem:[#allocation5 + $0x15a8] ss:$16 sps:$4 sm:$0xff]  }
 0x315   :  { %5859 = vmatprep.subr.bf16.mxu1 %v8240_v9  ;;  %v882_v9 = vsub.s32 0, %v8746_v19 }
 0x316   :  { %v5245_v3 = vadd.f32 %v5244_v51, %v5202_v5  ;;  %v8268_v51 = vld [vmem:[#allocation5 + $0x17a8] ss:$16 sps:$4 sm:$0xff]   ;;  %v8288_v5 = vld [vmem:[#allocation5 + $0x174c] ss:$16 sps:$4 sm:$0xff]  }
 0x317   :  { %5817 = vmatpush1.bf16.msra.mxu0 %v8235_v18  ;;  %v8262_v18 = vld [vmem:[#allocation5 + $0x17c8] ss:$16 sps:$4 sm:$0xff]   ;;  %v883_v35 = vrot.slane %v8757_v39, %v882_v9 }
 0x318   :  { %5860 = vmatpush1.bf16.msra.mxu1 %v8238_v22  ;;  %5818 = vmatprep.subr.bf16.mxu0 %v8243_v50  ;;  %v5241_v22 = vadd.f32 %v8773_v0, %v5198_v13  ;;  %v5330_v50 = vpop.f32.mrf.mxu0  ;;  %v8276_v0 = vld [vmem:[#allocation5 + $0x178c] ss:$16 sps:$4 sm:$0xff]   ;;  %v8286_v13 = vld [vmem:[#allocation5 + $0x1748] ss:$16 sps:$4 sm:$0xff]  }
 0x319   :  { %5861 = vmatprep.subr.bf16.mxu1 %v8246_v54  ;;  %v5288_v54 = vadd.f32 %v5287_v6, %v5245_v3  ;;  %v4895_v28 = vadd.f32 %v8698_v62, %v883_v35  ;;  %v8277_v62 = vld [vmem:[#allocation5 + $0x1568] ss:$16 sps:$4 sm:$0xff]  }
 0x31b   :  { %5819 = vmatpush1.bf16.msra.mxu0 %v8241_v42  ;;  %v5284_v42 = vadd.f32 %v5283_v34, %v5241_v22  ;;  %v8282_v34 = vld [vmem:[#allocation5 + $0x176c] ss:$16 sps:$4 sm:$0xff]   ;;  %v4938_v12 = vadd.f32 %v8702_v14, %v4895_v28  ;;  %v8311_v28 = vld [vmem:[#allocation8 + $0x50] sm:$0xff]  }
 0x31c   :  { %5862 = vmatpush1.bf16.msra.mxu1 %v8244_v36  ;;  %5820 = vmatprep.subr.bf16.mxu0 %v8249_v49  ;;  %v5331_v36 = vadd.f32 %v5330_v50, %v5288_v54  ;;  %v4899_v49 = vadd.f32 %v8704_v15, %v883_v35  ;;  %v8291_v14 = vld [vmem:[#allocation5 + $0x152c] ss:$16 sps:$4 sm:$0xff]  }
 0x31d   :  { %5863 = vmatprep.subr.bf16.mxu1 %v8252_v10  ;;  %v5327_v10 = vadd.f32 %v5326_v7, %v5284_v42  ;;  %v8280_v7 = vld [vmem:[#allocation5 + $0x1768] ss:$16 sps:$4 sm:$0xff]   ;;  %v8302_v35 = vld [vmem:[#allocation8 + $0x38] sm:$0xff]  }
 0x31f   :  { %5821 = vmatpush1.bf16.msra.mxu0 %v8247_v38  ;;  %v5373_v38 = vpop.f32.mrf.mxu1  ;;  %v5370_v6 = vadd.f32 %v5369_v47, %v5327_v10  ;;  %v8309_v10 = vld [vmem:[#allocation8 + $0x58] sm:$0xff]  }
 0x320   :  { %5864 = vmatpush1.bf16.msra.mxu1 %v8250_v2  ;;  %5822 = vmatprep.subr.bf16.mxu0 %v8255_v11  ;;  %v8271_v2 = vld [vmem:[#allocation5 + $0x1588] ss:$16 sps:$4 sm:$0xff]   ;;  %v5374_v4 = vadd.f32 %v5373_v38, %v5331_v36  ;;  %v8279_v11 = vld [vmem:[#allocation5 + $0x156c] ss:$16 sps:$4 sm:$0xff]  }
 0x321   :  { %5865 = vmatprep.subr.bf16.mxu1 %v8258_v59  ;;  %v4942_v59 = vadd.f32 %v8710_v26, %v4899_v49  ;;  %v8283_v26 = vld [vmem:[#allocation5 + $0x1548] ss:$16 sps:$4 sm:$0xff]   ;;  %v8318_v49 = vld [vmem:[#allocation8 + $0xb8] sm:$0xff]   ;;  %v8314_v38 = vld [vmem:[#allocation8 + $0x8] sm:$0xff]  }
 0x323   :  { %5823 = vmatpush2.bf16.msra.mxu0 %v8253_v20  ;;  %v4985_v15 = vadd.f32 %v8720_v37, %v4942_v59  ;;  %v5893_v20 = vpack.c.bf16 %v5374_v4, %v5370_v6  ;;  %v8294_v37 = vld [vmem:[#allocation5 + $0x172c] ss:$16 sps:$4 sm:$0xff]   ;;  %v8319_v4 = vld [vmem:[#allocation8 + $0xf0] sm:$0xff]   ;;  %v8323_v6 = vld [vmem:[#allocation8 + $0xe0] sm:$0xff]  }
 0x324   :  { %5866 = vmatpush2.bf16.msra.mxu1 %v8256_v17  ;;  %5824 = vmatprep.subr.bf16.mxu0 %v8261_v8  ;;  %v8285_v17 = vld [vmem:[#allocation5 + $0x154c] ss:$16 sps:$4 sm:$0xff]   ;;  %v4981_v8 = vadd.f32 %v8712_v27, %v4938_v12  ;;  %v8289_v27 = vld [vmem:[#allocation5 + $0x1528] ss:$16 sps:$4 sm:$0xff]  }
 0x325   :  { %5867 = vmatprep.subr.bf16.mxu1 %v8264_v1  ;;  %v5028_v1 = vadd.f32 %v8726_v31, %v4985_v15  ;;  %8333 = vtanh.bf16 %v5893_v20  ;;  %v8297_v31 = vld [vmem:[#allocation5 + $0x150c] ss:$16 sps:$4 sm:$0xff]   ;;  %v8324_v12 = vld [vmem:[#allocation8 + $0xa0] sm:$0xff]   ;;  %v8328_v20 = vld [vmem:[#allocation8 + $0x90] sm:$0xff]  }
 0x326   :  { %v5024_v3 = vadd.f32 %v8718_v33, %v4981_v8  ;;  %v8295_v33 = vld [vmem:[#allocation5 + $0x1508] ss:$16 sps:$4 sm:$0xff]   ;;  %v8322_v59 = vld [vmem:[#allocation8 + $0xa8] sm:$0xff]   ;;  %v8325_v15 = vld [vmem:[#allocation8 + $0xd8] sm:$0xff]  }
 0x327   :  { %5825 = vmatpush2.bf16.msra.mxu0 %v8259_v21  ;;  %v5071_v9 = vadd.f32 %v8736_v44, %v5028_v1  ;;  %v8292_v21 = vld [vmem:[#allocation5 + $0x1728] ss:$16 sps:$4 sm:$0xff]  }
 0x328   :  { %5868 = vmatpush2.bf16.msra.mxu1 %v8262_v18  ;;  %5826 = vmatprep.subr.bf16.mxu0 %v8267_v63  ;;  %v5067_v47 = vadd.f32 %v8728_v53, %v5024_v3  ;;  %v8300_v18 = vld [vmem:[#allocation5 + $0x170c] ss:$16 sps:$4 sm:$0xff]   ;;  %v8298_v44 = vld [vmem:[#allocation5 + $0x1708] ss:$16 sps:$4 sm:$0xff]  }
 0x329   :  { %5869 = vmatprep.subr.bf16.mxu1 %v8270_v23  ;;  %v5114_v22 = vadd.f32 %v8742_v41, %v5071_v9  ;;  %v8301_v53 = vld [vmem:[#allocation8 + $0x78] sm:$0xff]   ;;  %v8303_v41 = vld [vmem:[#allocation8 + $0x70] sm:$0xff]   ;;  %v8331_v8 = vld [vmem:[#allocation8 + $0xc0] sm:$0xff]  }
 0x32a   :  { %v5110_v63 = vadd.f32 %v8734_v16, %v5067_v47  ;;  %v8332_v1 = vld [vmem:[#allocation8 + $0x80] sm:$0xff]  }
 0x32b   :  { %5827 = vmatpush2.bf16.msra.mxu0 %v8265_v29  ;;  %v5157_v23 = vadd.f32 %v8759_v48, %v5114_v22 }
 0x32c   :  { %5870 = vmatpush2.bf16.msra.mxu1 %v8268_v51  ;;  %5828 = vmatprep.subr.bf16.mxu0 %v8273_v30  ;;  %v5153_v50 = vadd.f32 %v8744_v43, %v5110_v63  ;;  %v8304_v43 = vld [vmem:[#allocation8 + $0x30] sm:$0xff]   ;;  %v8307_v30 = vld [vmem:[#allocation8 + $0x60] sm:$0xff]  }
 0x32d   :  { %5871 = vmatprep.subr.bf16.mxu1 %v8276_v0  ;;  %v5200_v54 = vadd.f32 %v8767_v58, %v5157_v23  ;;  %v8305_v58 = vld [vmem:[#allocation8 + $0x68] sm:$0xff]   ;;  %v8317_v0 = vld [vmem:[#allocation8 + $0xf8] sm:$0xff]  }
 0x32e   :  { %v5196_v16 = vadd.f32 %v8754_v32, %v5153_v50 }
 0x32f   :  { %5829 = vmatpush2.bf16.msra.mxu0 %v8271_v2  ;;  %v5243_v48 = vadd.f32 %v8780_v40, %v5200_v54  ;;  %v8306_v40 = vld [vmem:[#allocation8 + $0x28] sm:$0xff]   ;;  %v8315_v2 = vld [vmem:[#allocation8 + $0x40] sm:$0xff]  }
 0x330   :  { %5872 = vmatpush2.bf16.msra.mxu1 %v8274_v57  ;;  %5830 = vmatprep.subr.bf16.mxu0 %v8279_v11  ;;  %v5239_v51 = vadd.f32 %v8769_v60, %v5196_v16  ;;  %v8308_v60 = vld [vmem:[#allocation8 + $0x20] sm:$0xff]   ;;  %v8320_v11 = vld [vmem:[#allocation8 + $0xb0] sm:$0xff]  }
 0x331   :  { %5873 = vmatprep.subr.bf16.mxu1 %v8282_v34  ;;  %v5286_v42 = vadd.f32 %v8786_v52, %v5243_v48  ;;  %v8316_v57 = vld [vmem:[#allocation8] sm:$0xff]   ;;  %v8321_v34 = vld [vmem:[#allocation8 + $0xe8] sm:$0xff]  }
 0x332   :  { %v5282_v36 = vadd.f32 %v8777_v46, %v5239_v51 }
 0x333   :  { %5831 = vmatpush2.bf16.msra.mxu0 %v8277_v62  ;;  %v8334_v29 = vpop.eup %8333  ;;  %v5329_v32 = vadd.f32 %v8795_v55, %v5286_v42  ;;  %v8310_v55 = vld [vmem:[#allocation8 + $0x18] sm:$0xff]  }
 0x334   :  { %5874 = vmatpush2.bf16.msra.mxu1 %v8280_v7  ;;  %5832 = vmatprep.subr.bf16.mxu0 %v8285_v17  ;;  %v8326_v62 = vld [vmem:[#allocation8 + $0x98] sm:$0xff]   ;;  %v8327_v7 = vld [vmem:[#allocation8 + $0xd0] sm:$0xff]   ;;  %v8329_v17 = vld [vmem:[#allocation8 + $0xc8] sm:$0xff]  }
 0x335   :  { %5875 = vmatprep.subr.bf16.mxu1 %v8288_v5  ;;  %v8330_v5 = vld [vmem:[#allocation8 + $0x88] sm:$0xff]  }
 0x337   :  { %5833 = vmatpush2.bf16.msra.mxu0 %v8283_v26  ;;  %v5410_v26 = vpop.f32.mrf.mxu0 }
 0x338   :  { %5876 = vmatpush2.bf16.msra.mxu1 %v8286_v13  ;;  %5834 = vmatprep.subr.bf16.mxu0 %v8291_v14  ;;  %v5453_v13 = vpop.f32.mrf.mxu1 }
 0x339   :  { %5877 = vmatprep.subr.bf16.mxu1 %v8294_v37  ;;  %v5412_v14 = vpop.f32.mrf.mxu0 }
 0x33a   :  { %v5455_v37 = vpop.f32.mrf.mxu1 }
 0x33b   :  { %5835 = vmatpush2.bf16.msra.mxu0 %v8289_v27  ;;  %v5414_v3 = vpop.f32.mrf.mxu0 }
 0x33c   :  { %5878 = vmatpush2.bf16.msra.mxu1 %v8292_v21  ;;  %5836 = vmatprep.subr.bf16.mxu0 %v8297_v31  ;;  %v5457_v9 = vpop.f32.mrf.mxu1 }
 0x33d   :  { %5879 = vmatprep.subr.bf16.mxu1 %v8300_v18  ;;  %v5416_v47 = vpop.f32.mrf.mxu0 }
 0x33e   :  { %v5459_v27 = vpop.f32.mrf.mxu1 }
 0x33f   :  { %5837 = vmatpush2.bf16.msra.mxu0 %v8295_v33  ;;  %v5496_v21 = vpop.f32.mrf.mxu0 }
 0x340   :  { %5880 = vmatpush2.bf16.msra.mxu1 %v8298_v44  ;;  %7091 = vmatprep.subr.bf16.mxu0 %v8301_v53  ;;  %v5539_v31 = vpop.f32.mrf.mxu1 }
 0x341   :  { %7113 = vmatprep.subr.bf16.mxu1 %v8317_v0  ;;  %v5498_v18 = vpop.f32.mrf.mxu0 }
 0x342   :  { %5839 = vmatmul.mubr.bf16.vlgmr.msra.gmra.mxu0 %v8672_v24  ;;  %v5325_v24 = vadd.f32 %v8788_v56, %v5282_v36  ;;  %v8312_v56 = vld [vmem:[#allocation8 + $0x10] sm:$0xff]   ;;  %v5541_v22 = vpop.f32.mrf.mxu1 }
 0x343   :  { %5882 = vmatmul.mubr.bf16.vlgmr.msra.gmra.mxu1 %v8676_v25  ;;  %7092 = vmatpush3.bf16.msra.mxu0 %v8302_v35  ;;  %v5372_v25 = vadd.f32 %v8801_v45, %v5329_v32  ;;  %v8313_v45 = vld [vmem:[#allocation8 + $0x48] sm:$0xff]   ;;  %v5500_v63 = vpop.f32.mrf.mxu0 }
 0x344   :  { %6195 = vmatprep.mubr.bf16.mxu0 %v8334_v29  ;;  %7093 = vmatprep.subr.bf16.mxu0 %v8303_v41  ;;  %v5368_v52 = vadd.f32 %v8793_v61, %v5325_v24  ;;  %v5543_v23 = vpop.f32.mrf.mxu1  ;;  %v890_v41 = vsub.s32 2, %v8746_v19  ;;  %v894_v29 = vsub.s32 3, %v8746_v19 }
 0x345   :  { %7114 = vmatpush3.bf16.msra.mxu1 %v8318_v49  ;;  %v5502_v33 = vpop.f32.mrf.mxu0 }
 0x346   :  { %v5892_v46 = vpack.c.bf16 %v5372_v25, %v5368_v52  ;;  %7115 = vmatprep.subr.bf16.mxu1 %v8319_v4  ;;  %v5545_v44 = vpop.f32.mrf.mxu1  ;;  %v891_v51 = vrot.slane %v8757_v39, %v890_v41  ;;  %v895_v42 = vrot.slane %v8757_v39, %v894_v29 }
 0x347   :  { %7094 = vmatpush3.bf16.msra.mxu0 %v8304_v43  ;;  %v5582_v53 = vpop.f32.mrf.mxu0 }
 0x348   :  { %7095 = vmatprep.subr.bf16.mxu0 %v8305_v58  ;;  %8335 = vtanh.bf16 %v5892_v46  ;;  %v5625_v50 = vpop.f32.mrf.mxu1  ;;  %v5415_v24 = vadd.f32 %v5414_v3, %v891_v51  ;;  %v5417_v0 = vadd.f32 %v5416_v47, %v895_v42 }
 0x349   :  { %7116 = vmatpush3.bf16.msra.mxu1 %v8320_v11  ;;  %v5584_v54 = vpop.f32.mrf.mxu0 }
 0x34a   :  { %7117 = vmatprep.subr.bf16.mxu1 %v8321_v34  ;;  %v5627_v35 = vpop.f32.mrf.mxu1  ;;  %v5458_v52 = vadd.f32 %v5457_v9, %v5415_v24 }
 0x34b   :  { %7096 = vmatpush3.bf16.msra.mxu0 %v8306_v40  ;;  %v5586_v16 = vpop.f32.mrf.mxu0  ;;  %v5411_v40 = vadd.f32 %v5410_v26, %v891_v51 }
 0x34c   :  { %7097 = vmatprep.subr.bf16.mxu0 %v8307_v30  ;;  %v5629_v48 = vpop.f32.mrf.mxu1  ;;  %v5413_v30 = vadd.f32 %v5412_v14, %v895_v42 }
 0x34d   :  { %7118 = vmatpush3.bf16.msra.mxu1 %v8322_v59  ;;  %v5588_v43 = vpop.f32.mrf.mxu0  ;;  %v5454_v49 = vadd.f32 %v5453_v13, %v5411_v40 }
 0x34e   :  { %7119 = vmatprep.subr.bf16.mxu1 %v8323_v6  ;;  %v5631_v58 = vpop.f32.mrf.mxu1 }
 0x34f   :  { %7098 = vmatpush3.bf16.msra.mxu0 %v8308_v60  ;;  %v5497_v46 = vadd.f32 %v5496_v21, %v5454_v49 }
 0x350   :  { %7099 = vmatprep.subr.bf16.mxu0 %v8309_v10  ;;  %v5456_v10 = vadd.f32 %v5455_v37, %v5413_v30 }
 0x351   :  { %7120 = vmatpush3.bf16.msra.mxu1 %v8324_v12 }
 0x352   :  { %7121 = vmatprep.subr.bf16.mxu1 %v8325_v15 }
 0x353   :  { %7100 = vmatpush3.bf16.msra.mxu0 %v8310_v55 }
 0x354   :  { %7101 = vmatprep.subr.bf16.mxu0 %v8311_v28  ;;  %v5460_v28 = vadd.f32 %v5459_v27, %v5417_v0 }
 0x355   :  { %7122 = vmatpush3.bf16.msra.mxu1 %v8326_v62 }
 0x356   :  { %v8336_v61 = vpop.eup %8335  ;;  %7123 = vmatprep.subr.bf16.mxu1 %v8327_v7 }
 0x357   :  { %7102 = vmatpush3.bf16.msra.mxu0 %v8312_v56  ;;  %v5499_v56 = vadd.f32 %v5498_v18, %v5456_v10 }
 0x358   :  { %7103 = vmatprep.subr.bf16.mxu0 %v8313_v45  ;;  %v5501_v45 = vadd.f32 %v5500_v63, %v5458_v52 }
 0x359   :  { %7124 = vmatpush3.bf16.msra.mxu1 %v8328_v20 }
 0x35a   :  { %7125 = vmatprep.subr.bf16.mxu1 %v8329_v17  ;;  %v5544_v4 = vadd.f32 %v5543_v23, %v5501_v45  ;;  %v7058_v45 = vld [vmem:[#allocation10] ss:$0 sm:$0xff] }
 0x35b   :  { %7104 = vmatpush3.bf16.msra.mxu0 %v8314_v38  ;;  %v5503_v38 = vadd.f32 %v5502_v33, %v5460_v28 }
 0x35c   :  { %7105 = vmatprep.subr.bf16.mxu0 %v8315_v2  ;;  %v5540_v2 = vadd.f32 %v5539_v31, %v5497_v46  ;;  %v5587_v15 = vadd.f32 %v5586_v16, %v5544_v4 }
 0x35d   :  { %7126 = vmatpush3.bf16.msra.mxu1 %v8330_v5  ;;  %v5546_v6 = vadd.f32 %v5545_v44, %v5503_v38 }
 0x35e   :  { %7127 = vmatprep.subr.bf16.mxu1 %v8331_v8  ;;  %v5583_v11 = vadd.f32 %v5582_v53, %v5540_v2  ;;  %v5630_v8 = vadd.f32 %v5629_v48, %v5587_v15 }
 0x35f   :  { %7106 = vmatpush3.bf16.msra.mxu0 %v8316_v57  ;;  %v5589_v62 = vadd.f32 %v5588_v43, %v5546_v6 }
 0x360   :  { %v5626_v7 = vadd.f32 %v5625_v50, %v5583_v11 }
 0x361   :  { %7128 = vmatpush3.bf16.msra.mxu1 %v8332_v1  ;;  %v5632_v26 = vadd.f32 %v5631_v58, %v5589_v62 }
 0x362   :  { %6196 = vmatmul.mubr.bf16.vlgmr.msra.gmra.mxu0 %v8336_v61  ;;  %v5542_v61 = vadd.f32 %v5541_v22, %v5499_v56 }
 0x364   :  { %v5585_v12 = vadd.f32 %v5584_v54, %v5542_v61 }
 0x366   :  { %v5628_v5 = vadd.f32 %v5627_v35, %v5585_v12 }
 0x382   :  { %v5668_v36 = vpop.f32.mrf.mxu0 }
 0x383   :  { %v5711_v32 = vpop.f32.mrf.mxu1  ;;  %v5669_v1 = vadd.f32 %v5668_v36, %v5626_v7 }
 0x384   :  { %v5670_v25 = vpop.f32.mrf.mxu0 }
 0x385   :  { %v5713_v60 = vpop.f32.mrf.mxu1  ;;  %v5671_v13 = vadd.f32 %v5670_v25, %v5628_v5  ;;  %v5712_v47 = vadd.f32 %v5711_v32, %v5669_v1 }
 0x386   :  { %v5672_v55 = vpop.f32.mrf.mxu0 }
 0x387   :  { %v5715_v19 = vpop.f32.mrf.mxu1  ;;  %v5673_v14 = vadd.f32 %v5672_v55, %v5630_v8  ;;  %v5714_v27 = vadd.f32 %v5713_v60, %v5671_v13 }
 0x388   :  { %v5674_v39 = vpop.f32.mrf.mxu0 }
 0x389   :  { %v5717_v57 = vpop.f32.mrf.mxu1  ;;  %v5675_v9 = vadd.f32 %v5674_v39, %v5632_v26  ;;  %v5716_v21 = vadd.f32 %v5715_v19, %v5673_v14 }
 0x38b   :  { %v5718_v63 = vadd.f32 %v5717_v57, %v5675_v9 }
 0x3c2   :  { %v5754_v34 = vpop.f32.mrf.mxu0 }
 0x3c3   :  { %v5797_v59 = vpop.f32.mrf.mxu1  ;;  %v5755_v31 = vadd.f32 %v5754_v34, %v5712_v47 }
 0x3c4   :  { %v5756_v20 = vpop.f32.mrf.mxu0 }
 0x3c5   :  { %v5799_v17 = vpop.f32.mrf.mxu1  ;;  %v5757_v23 = vadd.f32 %v5756_v20, %v5714_v27  ;;  %v5798_v54 = vadd.f32 %v5797_v59, %v5755_v31 }
 0x3c6   :  { %v5758_v37 = vpop.f32.mrf.mxu0 }
 0x3c7   :  { %v5801_v3 = vpop.f32.mrf.mxu1  ;;  %v5759_v33 = vadd.f32 %v5758_v37, %v5716_v21  ;;  %v5800_v16 = vadd.f32 %v5799_v17, %v5757_v23 }
 0x3c8   :  { %v5760_v18 = vpop.f32.mrf.mxu0 }
 0x3c9   :  { %v5803_v22 = vpop.f32.mrf.mxu1  ;;  %v5761_v50 = vadd.f32 %v5760_v18, %v5718_v63  ;;  %v5802_v48 = vadd.f32 %v5801_v3, %v5759_v33 }
 0x3cb   :  { %v5804_v58 = vadd.f32 %v5803_v22, %v5761_v50 }
 0x402   :  { %v5840_v44 = vpop.f32.mrf.mxu0 }
 0x403   :  { %v5883_v53 = vpop.f32.mrf.mxu1  ;;  %v5841_v29 = vadd.f32 %v5840_v44, %v5798_v54 }
 0x404   :  { %v5842_v35 = vpop.f32.mrf.mxu0 }
 0x405   :  { %v5885_v41 = vpop.f32.mrf.mxu1  ;;  %v5843_v42 = vadd.f32 %v5842_v35, %v5800_v16  ;;  %v5884_v24 = vadd.f32 %v5883_v53, %v5841_v29 }
 0x406   :  { %v5844_v51 = vpop.f32.mrf.mxu0 }
 0x407   :  { %v5887_v43 = vpop.f32.mrf.mxu1  ;;  %v5845_v36 = vadd.f32 %v5844_v51, %v5802_v48  ;;  %v5886_v60 = vadd.f32 %v5885_v41, %v5843_v42 }
 0x408   :  { %v5846_v32 = vpop.f32.mrf.mxu0 }
 0x409   :  { %v5888_v40 = vadd.f32 %v5887_v43, %v5845_v36  ;;  %v5847_v30 = vadd.f32 %v5846_v32, %v5804_v58  ;;  %v5889_v25 = vpop.f32.mrf.mxu1 }
 0x40b   :  { %v5890_v0 = vadd.f32 %v5889_v25, %v5847_v30  ;;  %v5894_v49 = vpack.c.bf16 %v5888_v40, %v5884_v24 }
 0x40d   :  { %v5895_v10 = vpack.c.bf16 %v5890_v0, %v5886_v60 }
 0x40f   :  { %8337 = vtanh.bf16 %v5895_v10 }
 0x410   :  { %8339 = vtanh.bf16 %v5894_v49 }
 0x41d   :  { %v8338_v52 = vpop.eup %8337 }
 0x41e   :  { %v8340_v46 = vpop.eup %8339  ;;  %6236 = vmatprep.mubr.bf16.mxu1 %v8338_v52 }
 0x41f   :  { %6237 = vmatmul.mubr.bf16.vlgmr.msra.gmra.mxu1 %v8340_v46 }
 0x422   :  { %v7107_v55 = vpop.f32.mrf.mxu0 }
 0x424   :  { %v7108_v19 = vpop.f32.mrf.mxu0 }
 0x425   :  { %v7109_v56 = vadd.f32 %v7108_v19, %v7107_v55 }
 0x426   :  { %v7110_v28 = vpop.f32.mrf.mxu0 }
 0x427   :  { %v6198_v57 = vadd.f32 %v7109_v56, %v7058_v45 }
 0x428   :  { %v7111_v38 = vpop.f32.mrf.mxu0 }
 0x429   :  { %v7112_v61 = vadd.f32 %v7111_v38, %v7110_v28 }
 0x42b   :  { %v6201_v6 = vadd.f32 %v7112_v61, %v7058_v45 }
 0x4df   :  { %v7129_v2 = vpop.f32.mrf.mxu1 }
 0x4e1   :  { %v7130_v39 = vpop.f32.mrf.mxu1 }
 0x4e2   :  { %v7131_v4 = vadd.f32 %v7130_v39, %v7129_v2 }
 0x4e3   :  { %v7132_v11 = vpop.f32.mrf.mxu1 }
 0x4e4   :  { %v6239_v34 = vadd.f32 %v7131_v4, %v6198_v57 }
 0x4e5   :  { %v7133_v59 = vpop.f32.mrf.mxu1 }
 0x4e6   :  { %6245 = vst [vmem:[#allocation11] sm:$0xff] %v6239_v34  ;;  %v7134_v12 = vadd.f32 %v7133_v59, %v7132_v11 }
 0x4e8   :  { %v6242_v15 = vadd.f32 %v7134_v12, %v6201_v6 }
 0x4ea   :  { %6246 = vst [vmem:[#allocation11 + $0x8] sm:$0xff] %v6242_v15 }
 0x4eb   :  { %8452 = shalt.err (!%p8449_p1)
}
 0x4ec   :  { %s8481_s23 = smov 128   ;;  %s8482_s24 = smov 8  }
 0x4ed   :  { %6258 = dma.vmem_to_hbm [thread:$0]  %s6253_s4, 256, %s8841_s5, [#allocation4], %s8481_s23, %s8481_s23, %s8482_s24  }
 0x4ee   :  { %8467 = dma.done.wait [#allocation4], 256  }
 0x4ef   :  { %8468 = vsyncadd [#allocation4], 4294967040 }
 0x4f0   :  { %6262 = vsyncpa [#allocation3], 1 }
 0x4f1   :  { %6263 = vsyncpa [#allocation6], 1 }
 0x4f2   :  { %6264 = vsyncpa [#allocation9], 1 }
 0x4f3   :  { %6265 = vsyncpa [#allocation4], 1 }

</bundles_post_ra>
